<compile_context>
chip_gen: v5e
topology: v5e:2x2
jax: 0.10.0
libtpu: 0.0.40
codegen_flags: <defaults>
</compile_context>

<pallas_src>
import functools
import math

import jax
import jax.numpy as jnp
from jax import lax
from jax.experimental import pallas as pl
from jax.experimental.pallas import tpu as pltpu


_DEFAULT_BLOCK_BUDGET = 2 * 1024 * 1024  # bytes per image block (in / out / noise)


# ---------------------------------------------------------------------------
# Shared AdaIN math on a (B, c_tile, HW) channel tile.
# ---------------------------------------------------------------------------
def _adain_body(x, s, w, b, o_ref, eps):
    ct = x.shape[1]
    # Single fused MXU matmul: [gamma | beta] = s @ [Wg | Wb] + [bg | bb].
    gb = jnp.dot(s, w, preferred_element_type=jnp.float32,
                 precision=lax.Precision.HIGHEST) + b                  # (B, 2*ct)
    gamma = gb[:, :ct]                                                  # (B, ct)
    beta = gb[:, ct:]                                                   # (B, ct)
    # Instance-norm statistics over H*W (lane axis); unbiased=False like torch.
    mu = jnp.mean(x, axis=-1, keepdims=True)                            # (B, ct, 1)
    var = jnp.mean(jnp.square(x - mu), axis=-1, keepdims=True)          # (B, ct, 1)
    # 2-op affine epilogue: out = x * a + shift.
    a = gamma[:, :, None] * lax.rsqrt(var + eps)                        # (B, ct, 1)
    shift = beta[:, :, None] - mu * a                                   # (B, ct, 1)
    o_ref[...] = (x * a + shift).astype(o_ref.dtype)


def _adain_kernel(x_ref, s_ref, w_ref, b_ref, o_ref, *, eps):
    _adain_body(x_ref[...].astype(jnp.float32),
                s_ref[...].astype(jnp.float32),
                w_ref[0].astype(jnp.float32),
                b_ref[0].astype(jnp.float32),
                o_ref, eps)


def _adain_noise_kernel(x_ref, n_ref, s_ref, w_ref, b_ref, logit_ref, o_ref, *, eps):
    scale = jnp.exp(logit_ref[0].astype(jnp.float32))                   # (1, ct)
    x = (x_ref[...].astype(jnp.float32)
         + scale[:, :, None] * n_ref[...].astype(jnp.float32))
    _adain_body(x,
                s_ref[...].astype(jnp.float32),
                w_ref[0].astype(jnp.float32),
                b_ref[0].astype(jnp.float32),
                o_ref, eps)


# ---------------------------------------------------------------------------
# Channel-tile selection: largest legal tile fitting the per-block budget.
# ---------------------------------------------------------------------------
def _pick_c_tile(B, C, HW, itemsize, block_budget_bytes):
    """c_tile divides C and is a multiple of 8 (sublane dim) or equals C."""
    if C % 8 != 0:
        return C                              # tiny / unaligned channel count
    per_channel_bytes = B * HW * itemsize
    cands = sorted({d for d in range(8, C + 1, 8) if C % d == 0}, reverse=True)
    for ct in cands:
        if ct * per_channel_bytes <= block_budget_bytes:
            return ct
    # TODO(synk): also tile H*W for gigantic feature maps (needs masked stats).
    return cands[-1]


# ---------------------------------------------------------------------------
# Wrapper: one pallas_call, channel-tiled "parallel" grid, NCHW in / NCHW out.
# ---------------------------------------------------------------------------
def adaptive_instance_norm_2d(content, style, params, *, eps=1e-5,
                              noise_key=None,
                              block_budget_bytes=_DEFAULT_BLOCK_BUDGET):
    """content: (B, C, H, W); style: (B, S).

    params: gamma_w/beta_w (S, C), gamma_b/beta_b (C,), optional
    noise_scale_logit (C,) which enables the learned-scale noise injection.
    """
    B, C, H, W = content.shape
    S = style.shape[-1]
    HW = H * W
    x = content.reshape(B, C, HW)   # free: merges contiguous trailing dims

    logit = params.get("noise_scale_logit", None)
    c_tile = _pick_c_tile(B, C, HW, jnp.dtype(content.dtype).itemsize,
                          block_budget_bytes)
    num_tiles = C // c_tile

    # Per-tile concatenated weights/biases; leading tile axis keeps every
    # block's last two dims equal to the full array dims (always layout-legal).
    def tile_last(a, rows):        # (rows, C) -> (num_tiles, rows, c_tile)
        return a.reshape(rows, num_tiles, c_tile).transpose(1, 0, 2)

    wg, wb = params["gamma_w"], params["beta_w"]
    bg = jnp.asarray(params["gamma_b"]).reshape(1, C)
    bb = jnp.asarray(params["beta_b"]).reshape(1, C)
    w_cat = jnp.concatenate([tile_last(wg, S), tile_last(wb, S)], axis=-1)
    b_cat = jnp.concatenate([tile_last(bg, 1), tile_last(bb, 1)], axis=-1)

    img_spec = pl.BlockSpec((B, c_tile, HW), lambda i: (0, i, 0))
    sty_spec = pl.BlockSpec((B, S), lambda i: (0, 0))
    w_spec = pl.BlockSpec((1, S, 2 * c_tile), lambda i: (i, 0, 0))
    bias_spec = pl.BlockSpec((1, 1, 2 * c_tile), lambda i: (i, 0, 0))

    out_shape = jax.ShapeDtypeStruct((B, C, HW), content.dtype)
    cparams = pltpu.CompilerParams(dimension_semantics=("parallel",))

    if logit is None:
        out = pl.pallas_call(
            functools.partial(_adain_kernel, eps=eps),
            grid=(num_tiles,),
            in_specs=[img_spec, sty_spec, w_spec, bias_spec],
            out_specs=img_spec,
            out_shape=out_shape,
            compiler_params=cparams,
        )(x, style, w_cat, b_cat)
    else:
        # TODO(synk): on real TPUs the noise could be drawn with the in-kernel
        # hardware PRNG (pltpu.prng_random_bits) to avoid this extra HBM read,
        # but that primitive has no interpret/CPU lowering, so we keep the
        # portable path: jax.random noise streamed through the same pipeline.
        if noise_key is None:
            noise_key = jax.random.PRNGKey(0)
        noise = jax.random.normal(noise_key, (B, C, HW), content.dtype)
        logit_t = jnp.asarray(logit).reshape(num_tiles, 1, c_tile)
        logit_spec = pl.BlockSpec((1, 1, c_tile), lambda i: (i, 0, 0))
        out = pl.pallas_call(
            functools.partial(_adain_noise_kernel, eps=eps),
            grid=(num_tiles,),
            in_specs=[img_spec, img_spec, sty_spec, w_spec, bias_spec, logit_spec],
            out_specs=img_spec,
            out_shape=out_shape,
            compiler_params=cparams,
        )(x, noise, style, w_cat, b_cat, logit_t)

    return out.reshape(B, C, H, W)


# ---------------------------------------------------------------------------
# Pure-JAX reference (matches the PyTorch module).
# ---------------------------------------------------------------------------
def adain_reference(content, style, params, eps=1e-5):
    gamma = jnp.dot(style, params["gamma_w"], precision=lax.Precision.HIGHEST) \
        + jnp.asarray(params["gamma_b"]).reshape(-1)
    beta = jnp.dot(style, params["beta_w"], precision=lax.Precision.HIGHEST) \
        + jnp.asarray(params["beta_b"]).reshape(-1)
    x = content.astype(jnp.float32)
    mu = x.mean(axis=(2, 3), keepdims=True)
    var = jnp.square(x - mu).mean(axis=(2, 3), keepdims=True)
    normed = (x - mu) / jnp.sqrt(var + eps)
    return normed * gamma[:, :, None, None] + beta[:, :, None, None]


if __name__ == "__main__":
    key = jax.random.PRNGKey(0)
    kc, ks, kgw, kgb, kbw, kbb, kl, kn = jax.random.split(key, 8)

    B, C, H, W, S = 2, 256, 16, 16, 128   # num_features=256, style_dim=128
    content = jax.random.normal(kc, (B, C, H, W), jnp.float32)
    style = jax.random.normal(ks, (B, S), jnp.float32)

    bound = 1.0 / math.sqrt(S)
    params = dict(
        gamma_w=jax.random.uniform(kgw, (S, C), jnp.float32, -bound, bound),
        gamma_b=jax.random.uniform(kgb, (C,), jnp.float32, -bound, bound),
        beta_w=jax.random.uniform(kbw, (S, C), jnp.float32, -bound, bound),
        beta_b=jax.random.uniform(kbb, (C,), jnp.float32, -bound, bound),
    )
    params_noise = dict(
        params, noise_scale_logit=0.2 * jax.random.normal(kl, (C,), jnp.float32))

    # --- noise_input=False: exact check, default (single-step) tiling --------
    out0 = jax.block_until_ready(adaptive_instance_norm_2d(content, style, params))
    ref0 = adain_reference(content, style, params)
    assert out0.shape == (B, C, H, W) and out0.dtype == content.dtype
    assert bool(jnp.all(jnp.isfinite(out0)))
    assert bool(jnp.allclose(out0, ref0, atol=1e-3, rtol=1e-3)), \
        float(jnp.max(jnp.abs(out0 - ref0)))

    # --- noise_input=False: forced multi-tile grid (exercises the index_map) -
    out0t = jax.block_until_ready(
        adaptive_instance_norm_2d(content, style, params,
                                  block_budget_bytes=128 * 1024))
    assert bool(jnp.allclose(out0t, ref0, atol=1e-3, rtol=1e-3))

    # --- noise_input=True: the jax.random noise is reproducible -> exact -----
    out1 = jax.block_until_ready(
        adaptive_instance_norm_2d(content, style, params_noise, noise_key=kn))
    noise = jax.random.normal(kn, (B, C, H * W), content.dtype).reshape(B, C, H, W)
    scale = jnp.exp(params_noise["noise_scale_logit"])[None, :, None, None]
    ref1 = adain_reference(content + scale * noise, style, params)
    assert bool(jnp.all(jnp.isfinite(out1)))
    assert bool(jnp.allclose(out1, ref1, atol=1e-3, rtol=1e-3)), \
        float(jnp.max(jnp.abs(out1 - ref1)))
    assert float(jnp.max(jnp.abs(out1 - out0))) > 1e-2   # noise actually injected

    # --- bf16 content stays bf16 end-to-end ----------------------------------
    content_bf = content.astype(jnp.bfloat16)
    out_bf = jax.block_until_ready(
        adaptive_instance_norm_2d(content_bf, style, params))
    ref_bf = adain_reference(content_bf, style, params)
    assert out_bf.dtype == jnp.bfloat16
    assert bool(jnp.allclose(out_bf.astype(jnp.float32), ref_bf,
                             atol=5e-2, rtol=5e-2))

    print("KERNEL_OK")
</pallas_src>

<mosaic_0001>
module attributes {stable_mosaic.version = 11 : i64} {
  func.func @_adain_kernel(%arg0: i32, %arg1: memref<2x256x256xf32, #tpu.memory_space<vmem>>, %arg2: memref<2x128xf32, #tpu.memory_space<vmem>>, %arg3: memref<1x128x512xf32, #tpu.memory_space<vmem>>, %arg4: memref<1x1x512xf32, #tpu.memory_space<vmem>>, %arg5: memref<2x256x256xf32, #tpu.memory_space<vmem>>) attributes {dimension_semantics = [#tpu.dimension_semantics<parallel>], iteration_bounds = array<i64: 1>, scalar_prefetch = 0 : i64, scratch_operands = 0 : i64, tpu.core_type = #tpu.core_type<tc>, window_params = [{transform_indices = @transform_0, window_bounds = array<i64: 2, 256, 256>}, {pipeline_mode = #tpu.pipeline_mode<synchronous>, transform_indices = @transform_1, window_bounds = array<i64: 2, 128>}, {transform_indices = @transform_2, window_bounds = array<i64: 1, 128, 512>}, {transform_indices = @transform_3, window_bounds = array<i64: 1, 1, 512>}, {transform_indices = @transform_4, window_bounds = array<i64: 2, 256, 256>}]} {
    %c0 = arith.constant 0 : index
    %c0_0 = arith.constant 0 : index
    %c0_1 = arith.constant 0 : index
    %0 = vector.load %arg1[%c0, %c0_0, %c0_1] : memref<2x256x256xf32, #tpu.memory_space<vmem>>, vector<2x256x256xf32>
    %c0_2 = arith.constant 0 : index
    %c0_3 = arith.constant 0 : index
    %1 = vector.load %arg2[%c0_2, %c0_3] : memref<2x128xf32, #tpu.memory_space<vmem>>, vector<2x128xf32>
    %c0_4 = arith.constant 0 : index
    %c0_5 = arith.constant 0 : index
    %c0_6 = arith.constant 0 : index
    %2 = vector.load %arg3[%c0_4, %c0_5, %c0_6] : memref<1x128x512xf32, #tpu.memory_space<vmem>>, vector<1x128x512xf32>
    %3 = vector.shape_cast %2 : vector<1x128x512xf32> to vector<128x512xf32>
    %c0_7 = arith.constant 0 : index
    %c0_8 = arith.constant 0 : index
    %c0_9 = arith.constant 0 : index
    %4 = vector.load %arg4[%c0_7, %c0_8, %c0_9] : memref<1x1x512xf32, #tpu.memory_space<vmem>>, vector<1x1x512xf32>
    %5 = vector.shape_cast %4 : vector<1x1x512xf32> to vector<1x512xf32>
    %cst = arith.constant dense<0.000000e+00> : vector<2x512xf32>
    %6 = tpu.matmul %1, %3, %cst {dimension_numbers = #tpu.dot_dimension_numbers<[1], [0], [0], [1], [0, 0, 1, 1], [], []>, precision = #tpu.contract_precision<fp32>} : vector<2x128xf32>, vector<128x512xf32>, vector<2x512xf32> -> vector<2x512xf32>
    %7 = vector.broadcast %5 : vector<1x512xf32> to vector<2x512xf32>
    %8 = arith.addf %6, %7 : vector<2x512xf32>
    %9 = vector.extract_strided_slice %8 {offsets = [0, 0], sizes = [2, 256], strides = [1, 1]} : vector<2x512xf32> to vector<2x256xf32>
    %10 = vector.extract_strided_slice %8 {offsets = [0, 256], sizes = [2, 256], strides = [1, 1]} : vector<2x512xf32> to vector<2x256xf32>
    %cst_10 = arith.constant dense<0.000000e+00> : vector<2x256xf32>
    %11 = vector.multi_reduction <add>, %0, %cst_10 [2] : vector<2x256x256xf32> to vector<2x256xf32>
    %12 = vector.shape_cast %11 : vector<2x256xf32> to vector<2x256x1xf32>
    %cst_11 = arith.constant 2.560000e+02 : f32
    %13 = vector.broadcast %cst_11 : f32 to vector<2x256x1xf32>
    %14 = arith.divf %12, %13 : vector<2x256x1xf32>
    %15 = vector.broadcast %14 : vector<2x256x1xf32> to vector<2x256x256xf32>
    %16 = arith.subf %0, %15 : vector<2x256x256xf32>
    %17 = arith.mulf %16, %16 : vector<2x256x256xf32>
    %cst_12 = arith.constant dense<0.000000e+00> : vector<2x256xf32>
    %18 = vector.multi_reduction <add>, %17, %cst_12 [2] : vector<2x256x256xf32> to vector<2x256xf32>
    %19 = vector.shape_cast %18 : vector<2x256xf32> to vector<2x256x1xf32>
    %cst_13 = arith.constant 2.560000e+02 : f32
    %20 = vector.broadcast %cst_13 : f32 to vector<2x256x1xf32>
    %21 = arith.divf %19, %20 : vector<2x256x1xf32>
    %22 = vector.shape_cast %9 : vector<2x256xf32> to vector<2x256x1xf32>
    %cst_14 = arith.constant 9.99999974E-6 : f32
    %23 = vector.broadcast %cst_14 : f32 to vector<2x256x1xf32>
    %24 = arith.addf %21, %23 : vector<2x256x1xf32>
    %25 = math.rsqrt %24 : vector<2x256x1xf32>
    %26 = arith.mulf %22, %25 : vector<2x256x1xf32>
    %27 = vector.shape_cast %10 : vector<2x256xf32> to vector<2x256x1xf32>
    %28 = arith.mulf %14, %26 : vector<2x256x1xf32>
    %29 = arith.subf %27, %28 : vector<2x256x1xf32>
    %30 = vector.broadcast %26 : vector<2x256x1xf32> to vector<2x256x256xf32>
    %31 = arith.mulf %0, %30 : vector<2x256x256xf32>
    %32 = vector.broadcast %29 : vector<2x256x1xf32> to vector<2x256x256xf32>
    %33 = arith.addf %31, %32 : vector<2x256x256xf32>
    %c0_15 = arith.constant 0 : index
    %c0_16 = arith.constant 0 : index
    %c0_17 = arith.constant 0 : index
    %34 = vector.load %arg5[%c0_15, %c0_16, %c0_17] : memref<2x256x256xf32, #tpu.memory_space<vmem>>, vector<2x256x256xf32>
    tpu.vector_store %arg5[%c0_15, %c0_16, %c0_17], %33 {strides = array<i32>} : memref<2x256x256xf32, #tpu.memory_space<vmem>>, vector<2x256x256xf32>,
    return
  }
  func.func @transform_0(%arg0: i32) -> (i32, i32, i32) {
    %c0_i32 = arith.constant 0 : i32
    %c0_i32_0 = arith.constant 0 : i32
    %c0_i32_1 = arith.constant 0 : i32
    return %c0_i32, %arg0, %c0_i32_0 : i32, i32, i32
  }
  func.func @transform_1(%arg0: i32) -> (i32, i32) {
    %c0_i32 = arith.constant 0 : i32
    %c0_i32_0 = arith.constant 0 : i32
    %c0_i32_1 = arith.constant 0 : i32
    return %c0_i32, %c0_i32_0 : i32, i32
  }
  func.func @transform_2(%arg0: i32) -> (i32, i32, i32) {
    %c0_i32 = arith.constant 0 : i32
    %c0_i32_0 = arith.constant 0 : i32
    %c0_i32_1 = arith.constant 0 : i32
    return %arg0, %c0_i32, %c0_i32_0 : i32, i32, i32
  }
  func.func @transform_3(%arg0: i32) -> (i32, i32, i32) {
    %c0_i32 = arith.constant 0 : i32
    %c0_i32_0 = arith.constant 0 : i32
    %c0_i32_1 = arith.constant 0 : i32
    return %arg0, %c0_i32, %c0_i32_0 : i32, i32, i32
  }
  func.func @transform_4(%arg0: i32) -> (i32, i32, i32) {
    %c0_i32 = arith.constant 0 : i32
    %c0_i32_0 = arith.constant 0 : i32
    %c0_i32_1 = arith.constant 0 : i32
    return %c0_i32, %arg0, %c0_i32_0 : i32, i32, i32
  }
}

</mosaic_0001>

<bundles_post_ra>
// kernel: tpu_custom_call.1
= control target key start
LH: loop header
LB: loop body
LE: loop exit
PB: predicated region body
PF: predicated region fallthrough
CT: control target
= control target key end

     0   :  { %9 = vsyncpa [#allocation3], 0  ;;  %s8132_s0 = inlined_call_operand.hbm [shape: f32[2,256,256], index: 0, kind: input, shape index: {}]   ;;  %s8133_s1 = inlined_call_operand.hbm [shape: f32[2,128], index: 1, kind: input, shape index: {}]   ;;  %s8134_s2 = inlined_call_operand.hbm [shape: f32[1,128,512], index: 2, kind: input, shape index: {}]   ;;  %s8135_s3 = inlined_call_operand.hbm [shape: f32[1,1,512], index: 3, kind: input, shape index: {}]   ;;  %s8136_s4 = inlined_call_operand.hbm [shape: f32[2,256,256], index: 4, kind: output, shape index: {}]  }
   0x1   :  { %10 = vsyncpa [#allocation6], 0 }
   0x2   :  { %11 = vsyncpa [#allocation9], 0  ;;  %s31_s17 = sshll.u32 %s8133_s1, 4  ;;  %s32_s17 = int_to_ptr.hbm [resolvable:$true] %s31_s17 }
   0x3   :  { %12 = vsyncpa [#allocation4], 0  ;;  %s5140_s18 = smov [#allocation5]   ;;  %s17_s22 = sshll.u32 %s8132_s0, 4  ;;  %s18_s22 = int_to_ptr.hbm [resolvable:$true] %s17_s22 }
   0x4   :  { %s33_s19 = sshll.u32 %s5140_s18, 4  ;;  %s5141_s23 = smov [#allocation2]   ;;  %s34_s19 = int_to_ptr.vmem [resolvable:$true] %s33_s19 }
   0x5   :  { %36 = dma.hbm_to_vmem [thread:$0]  %s32_s17, 32, %s34_s19, [#allocation6]  }
   0x6   :  { %s19_s24 = sshll.u32 %s5141_s23, 4  ;;  %s5142_s25 = smov 256   ;;  %s20_s24 = int_to_ptr.vmem [resolvable:$true] %s19_s24 }
   0x7   :  { %s5143_s26 = smov 16   ;;  %s41_s28 = sshll.u32 %s8134_s2, 4  ;;  %s42_s28 = int_to_ptr.hbm [resolvable:$true] %s41_s28 }
   0x8   :  { %25 = dma.hbm_to_vmem [thread:$0]  %s18_s22, 16384, %s20_s24, [#allocation3], %s5142_s25, %s5142_s25, %s5143_s26  }
   0x9   :  { %s5144_s29 = smov [#allocation7]   ;;  %s55_s6 = sshll.u32 %s8135_s3, 4  ;;  %s56_s6 = int_to_ptr.hbm [resolvable:$true] %s55_s6 }
   0xa   :  { %s43_s30 = sshll.u32 %s5144_s29, 4  ;;  %s5145_s7 = smov 512   ;;  %s44_s30 = int_to_ptr.vmem [resolvable:$true] %s43_s30 }
   0xb   :  { %s5146_s8 = smov 32   ;;  %s5147_s9 = smov [#allocation8]  }
   0xc   :  { %49 = dma.hbm_to_vmem [thread:$0]  %s42_s28, 8192, %s44_s30, [#allocation6], %s5145_s7, %s5145_s7, %s5146_s8  }
   0xd   :  { %s57_s10 = sshll.u32 %s5147_s9, 4  ;;  %s58_s10 = int_to_ptr.vmem [resolvable:$true] %s57_s10 }
   0xe   :  { %60 = dma.hbm_to_vmem [thread:$0]  %s56_s6, 64, %s58_s10, [#allocation9]  }
   0xf   :  { %5132 = dma.done.wait [#allocation3], 16384  }
  0x10   :  { %5133 = vsyncadd [#allocation3], 4294950912 }
  0x11   :  { %5134 = dma.done.wait [#allocation6], 8224  }
  0x12   :  { %5135 = vsyncadd [#allocation6], 4294959072 }
  0x13   :  { %5136 = dma.done.wait [#allocation9], 64  }
  0x14   :  { %5137 = vsyncadd [#allocation9], 4294967232  ;;  %v85_v0 = vld [vmem:[#allocation2 + $0x40] sm:$0xff]  ;;  %v86_v1 = vld [vmem:[#allocation2 + $0x48] sm:$0xff]  ;;  %s5149_s2 = smov [#allocation10]   ;;  %s4481_s13 = sshll.u32 %s8136_s4, 4  ;;  %s4482_s13 = int_to_ptr.hbm [resolvable:$true] %s4481_s13 }
  0x15   :  { %v81_v2 = vld [vmem:[#allocation2 + $0x20] sm:$0xff]  ;;  %v1656_v3 = vadd.f32 %v86_v1, %v85_v0  ;;  %v82_v4 = vld [vmem:[#allocation2 + $0x28] sm:$0xff]  ;;  %v87_v9 = vld [vmem:[#allocation2 + $0x50] sm:$0xff]  ;;  %s4479_s3 = sshll.u32 %s5149_s2, 4  ;;  %s4480_s3 = int_to_ptr.vmem [resolvable:$true] %s4479_s3 }
  0x16   :  { %v77_v5 = vld [vmem:[#allocation2] sm:$0xff]  ;;  %v78_v6 = vld [vmem:[#allocation2 + $0x8] sm:$0xff]  ;;  %v1650_v7 = vadd.f32 %v82_v4, %v81_v2  ;;  %v88_v10 = vld [vmem:[#allocation2 + $0x58] sm:$0xff] }
  0x17   :  { %v1644_v8 = vadd.f32 %v78_v6, %v77_v5  ;;  %1657 = vadd.xlane.f32.xlu2 %v1656_v3  ;;  %v83_v11 = vld [vmem:[#allocation2 + $0x30] sm:$0xff]  ;;  %v84_v12 = vld [vmem:[#allocation2 + $0x38] sm:$0xff]  ;;  %v1659_v15 = vadd.f32 %v88_v10, %v87_v9  ;;  %v93_v18 = vld [vmem:[#allocation2 + $0x80] sm:$0xff] }
  0x18   :  { %1651 = vadd.xlane.f32.xlu1 %v1650_v7  ;;  %v79_v13 = vld [vmem:[#allocation2 + $0x10] sm:$0xff]  ;;  %v80_v14 = vld [vmem:[#allocation2 + $0x18] sm:$0xff]  ;;  %v1653_v16 = vadd.f32 %v84_v12, %v83_v11  ;;  %v94_v19 = vld [vmem:[#allocation2 + $0x88] sm:$0xff] }
  0x19   :  { %1645 = vadd.xlane.f32.xlu0 %v1644_v8  ;;  %v1647_v17 = vadd.f32 %v80_v14, %v79_v13  ;;  %v91_v20 = vld [vmem:[#allocation2 + $0x70] sm:$0xff]  ;;  %v92_v21 = vld [vmem:[#allocation2 + $0x78] sm:$0xff]  ;;  %v89_v22 = vld [vmem:[#allocation2 + $0x60] sm:$0xff]  ;;  %v1668_v24 = vadd.f32 %v94_v19, %v93_v18 }
  0x1a   :  { %v90_v23 = vld [vmem:[#allocation2 + $0x68] sm:$0xff]  ;;  %v1665_v25 = vadd.f32 %v92_v21, %v91_v20  ;;  %v99_v27 = vld [vmem:[#allocation2 + $0xb0] sm:$0xff]  ;;  %v100_v28 = vld [vmem:[#allocation2 + $0xb8] sm:$0xff] }
  0x1b   :  { %v1662_v26 = vadd.f32 %v90_v23, %v89_v22  ;;  %v97_v29 = vld [vmem:[#allocation2 + $0xa0] sm:$0xff]  ;;  %v98_v30 = vld [vmem:[#allocation2 + $0xa8] sm:$0xff]  ;;  %v95_v31 = vld [vmem:[#allocation2 + $0x90] sm:$0xff]  ;;  %v1677_v33 = vadd.f32 %v100_v28, %v99_v27 }
  0x1c   :  { %v96_v32 = vld [vmem:[#allocation2 + $0x98] sm:$0xff]  ;;  %v1674_v34 = vadd.f32 %v98_v30, %v97_v29  ;;  %v105_v36 = vld [vmem:[#allocation2 + $0xe0] sm:$0xff]  ;;  %v106_v37 = vld [vmem:[#allocation2 + $0xe8] sm:$0xff] }
  0x1d   :  { %v1671_v35 = vadd.f32 %v96_v32, %v95_v31  ;;  %v103_v38 = vld [vmem:[#allocation2 + $0xd0] sm:$0xff]  ;;  %v104_v39 = vld [vmem:[#allocation2 + $0xd8] sm:$0xff]  ;;  %v101_v40 = vld [vmem:[#allocation2 + $0xc0] sm:$0xff]  ;;  %v1686_v42 = vadd.f32 %v106_v37, %v105_v36 }
  0x1e   :  { %v102_v41 = vld [vmem:[#allocation2 + $0xc8] sm:$0xff]  ;;  %v1683_v43 = vadd.f32 %v104_v39, %v103_v38  ;;  %v111_v45 = vld [vmem:[#allocation2 + $0x110] sm:$0xff]  ;;  %v112_v46 = vld [vmem:[#allocation2 + $0x118] sm:$0xff] }
  0x1f   :  { %1660 = vadd.xlane.f32.xlu2 %v1659_v15  ;;  %v1680_v44 = vadd.f32 %v102_v41, %v101_v40  ;;  %v109_v47 = vld [vmem:[#allocation2 + $0x100] sm:$0xff]  ;;  %v110_v48 = vld [vmem:[#allocation2 + $0x108] sm:$0xff]  ;;  %v107_v49 = vld [vmem:[#allocation2 + $0xf0] sm:$0xff]  ;;  %v1695_v51 = vadd.f32 %v112_v46, %v111_v45 }
  0x20   :  { %1654 = vadd.xlane.f32.xlu1 %v1653_v16  ;;  %v108_v50 = vld [vmem:[#allocation2 + $0xf8] sm:$0xff]  ;;  %v1692_v52 = vadd.f32 %v110_v48, %v109_v47  ;;  %v117_v54 = vld [vmem:[#allocation2 + $0x140] sm:$0xff]  ;;  %v118_v55 = vld [vmem:[#allocation2 + $0x148] sm:$0xff] }
  0x21   :  { %1648 = vadd.xlane.f32.xlu0 %v1647_v17  ;;  %v1689_v53 = vadd.f32 %v108_v50, %v107_v49  ;;  %v115_v56 = vld [vmem:[#allocation2 + $0x130] sm:$0xff]  ;;  %v116_v57 = vld [vmem:[#allocation2 + $0x138] sm:$0xff]  ;;  %v113_v58 = vld [vmem:[#allocation2 + $0x120] sm:$0xff]  ;;  %v1704_v60 = vadd.f32 %v118_v55, %v117_v54 }
  0x22   :  { %v114_v59 = vld [vmem:[#allocation2 + $0x128] sm:$0xff]  ;;  %v1701_v61 = vadd.f32 %v116_v57, %v115_v56  ;;  %v123_v63 = vld [vmem:[#allocation2 + $0x170] sm:$0xff]  ;;  %v124_v0 = vld [vmem:[#allocation2 + $0x178] sm:$0xff] }
  0x23   :  { %v1698_v62 = vadd.f32 %v114_v59, %v113_v58  ;;  %v121_v1 = vld [vmem:[#allocation2 + $0x160] sm:$0xff]  ;;  %v122_v2 = vld [vmem:[#allocation2 + $0x168] sm:$0xff]  ;;  %v119_v3 = vld [vmem:[#allocation2 + $0x150] sm:$0xff]  ;;  %v1713_v5 = vadd.f32 %v124_v0, %v123_v63 }
  0x24   :  { %v120_v4 = vld [vmem:[#allocation2 + $0x158] sm:$0xff]  ;;  %v1710_v6 = vadd.f32 %v122_v2, %v121_v1  ;;  %v129_v8 = vld [vmem:[#allocation2 + $0x1a0] sm:$0xff]  ;;  %v130_v9 = vld [vmem:[#allocation2 + $0x1a8] sm:$0xff] }
  0x25   :  { %v1707_v7 = vadd.f32 %v120_v4, %v119_v3  ;;  %v127_v10 = vld [vmem:[#allocation2 + $0x190] sm:$0xff]  ;;  %v128_v11 = vld [vmem:[#allocation2 + $0x198] sm:$0xff]  ;;  %v125_v12 = vld [vmem:[#allocation2 + $0x180] sm:$0xff]  ;;  %v1722_v14 = vadd.f32 %v130_v9, %v129_v8 }
  0x26   :  { %v126_v13 = vld [vmem:[#allocation2 + $0x188] sm:$0xff]  ;;  %v1719_v15 = vadd.f32 %v128_v11, %v127_v10  ;;  %v135_v17 = vld [vmem:[#allocation2 + $0x1d0] sm:$0xff]  ;;  %v136_v18 = vld [vmem:[#allocation2 + $0x1d8] sm:$0xff] }
  0x27   :  { %1669 = vadd.xlane.f32.xlu2 %v1668_v24  ;;  %v1716_v16 = vadd.f32 %v126_v13, %v125_v12  ;;  %v133_v19 = vld [vmem:[#allocation2 + $0x1c0] sm:$0xff]  ;;  %v134_v20 = vld [vmem:[#allocation2 + $0x1c8] sm:$0xff]  ;;  %v131_v21 = vld [vmem:[#allocation2 + $0x1b0] sm:$0xff]  ;;  %v1731_v23 = vadd.f32 %v136_v18, %v135_v17 }
  0x28   :  { %1666 = vadd.xlane.f32.xlu1 %v1665_v25  ;;  %v132_v22 = vld [vmem:[#allocation2 + $0x1b8] sm:$0xff]  ;;  %v1728_v24 = vadd.f32 %v134_v20, %v133_v19  ;;  %v142_v27 = vld [vmem:[#allocation2 + $0x208] sm:$0xff]  ;;  %v139_v28 = vld [vmem:[#allocation2 + $0x1f0] sm:$0xff] }
  0x29   :  { %1663 = vadd.xlane.f32.xlu0 %v1662_v26  ;;  %v1725_v25 = vadd.f32 %v132_v22, %v131_v21  ;;  %v141_v26 = vld [vmem:[#allocation2 + $0x200] sm:$0xff]  ;;  %v140_v29 = vld [vmem:[#allocation2 + $0x1f8] sm:$0xff]  ;;  %v138_v31 = vld [vmem:[#allocation2 + $0x1e8] sm:$0xff] }
  0x2a   :  { %v137_v30 = vld [vmem:[#allocation2 + $0x1e0] sm:$0xff]  ;;  %v1740_v32 = vadd.f32 %v142_v27, %v141_v26  ;;  %v148_v36 = vld [vmem:[#allocation2 + $0x238] sm:$0xff]  ;;  %v146_v38 = vld [vmem:[#allocation2 + $0x228] sm:$0xff] }
  0x2b   :  { %v145_v37 = vld [vmem:[#allocation2 + $0x220] sm:$0xff]  ;;  %v143_v39 = vld [vmem:[#allocation2 + $0x210] sm:$0xff]  ;;  %v144_v40 = vld [vmem:[#allocation2 + $0x218] sm:$0xff] }
  0x2c   :  { %v153_v45 = vld [vmem:[#allocation2 + $0x260] sm:$0xff]  ;;  %v154_v47 = vld [vmem:[#allocation2 + $0x268] sm:$0xff]  ;;  %v151_v48 = vld [vmem:[#allocation2 + $0x250] sm:$0xff] }
  0x2d   :  { %v262_v49 = vld [vmem:[#allocation7 + $0x1c0] sm:$0xff]  ;;  %v152_v50 = vld [vmem:[#allocation2 + $0x258] sm:$0xff]  ;;  %v1758_v56 = vadd.f32 %v154_v47, %v153_v45  ;;  %v159_v4 = vld [vmem:[#allocation2 + $0x290] sm:$0xff] }
  0x2e   :  { %v5196_v54 = vand.u32 4294901760, %v262_v49  ;;  %v258_v55 = vld [vmem:[#allocation7 + $0x1a0] sm:$0xff]  ;;  %v160_v8 = vld [vmem:[#allocation2 + $0x298] sm:$0xff] }
  0x2f   :  { %1678 = vadd.xlane.f32.xlu2 %v1677_v33  ;;  %v1737_v33 = vadd.f32 %v140_v29, %v139_v28  ;;  %v5205_v59 = vand.u32 4294901760, %v258_v55  ;;  %v250_v3 = vld [vmem:[#allocation7 + $0x160] sm:$0xff]  ;;  %v1767_v22 = vadd.f32 %v160_v8, %v159_v4  ;;  %v164_v47 = vld [vmem:[#allocation2 + $0x2b8] sm:$0xff] }
  0x30   :  { %1675 = vadd.xlane.f32.xlu1 %v1674_v34  ;;  %v1734_v34 = vadd.f32 %v138_v31, %v137_v30  ;;  %v5201_v57 = vsub.f32 %v262_v49, %v5196_v54  ;;  %v157_v9 = vld [vmem:[#allocation2 + $0x280] sm:$0xff]  ;;  %v5228_v11 = vand.u32 4294901760, %v250_v3  ;;  %v158_v13 = vld [vmem:[#allocation2 + $0x288] sm:$0xff] }
  0x31   :  { %1672 = vadd.xlane.f32.xlu0 %v1671_v35  ;;  %v147_v35 = vld [vmem:[#allocation2 + $0x230] sm:$0xff]  ;;  %v5213_v0 = vsub.f32 %v258_v55, %v5205_v59  ;;  %v246_v12 = vld [vmem:[#allocation7 + $0x140] sm:$0xff]  ;;  %v1764_v26 = vadd.f32 %v158_v13, %v157_v9 }
  0x32   :  { %v1749_v41 = vadd.f32 %v148_v36, %v147_v35  ;;  %v8150_v1 = vand.u32 4294901760, %v5201_v57  ;;  %v5234_v18 = vand.u32 4294901760, %v246_v12  ;;  %v5238_v19 = vsub.f32 %v250_v3, %v5228_v11  ;;  %v242_v21 = vld [vmem:[#allocation7 + $0x120] sm:$0xff] }
  0x33   :  { %v238_v30 = vld [vmem:[#allocation7 + $0x100] sm:$0xff] }
  0x34   :  { %v8146_v29 = vand.u32 4294901760, %v5238_v19  ;;  %v234_v36 = vld [vmem:[#allocation7 + $0xe0] sm:$0xff] }
  0x35   :  { %v230_v45 = vld [vmem:[#allocation7 + $0xc0] sm:$0xff] }
  0x36   :  { %v348_v35 = vsub.f32 %v5238_v19, %v8146_v29  ;;  %v162_v49 = vld [vmem:[#allocation2 + $0x2a8] sm:$0xff]  ;;  %v5281_v55 = vand.u32 4294901760, %v230_v45 }
  0x37   :  { %1687 = vadd.xlane.f32.xlu2 %v1686_v42  ;;  %v1746_v42 = vadd.f32 %v146_v38, %v145_v37  ;;  %v165_v37 = vld [vmem:[#allocation2 + $0x2c0] sm:$0xff]  ;;  %v166_v38 = vld [vmem:[#allocation2 + $0x2c8] sm:$0xff] }
  0x38   :  { %1684 = vadd.xlane.f32.xlu1 %v1683_v43  ;;  %v1743_v43 = vadd.f32 %v144_v40, %v143_v39  ;;  %v5293_v3 = vsub.f32 %v230_v45, %v5281_v55  ;;  %v222_v9 = vld [vmem:[#allocation7 + $0x80] sm:$0xff] }
  0x39   :  { %1681 = vadd.xlane.f32.xlu0 %v1680_v44  ;;  %v266_v44 = vld [vmem:[#allocation7 + $0x1e0] sm:$0xff] }
  0x3a   :  { %v5190_v46 = vand.u32 4294901760, %v266_v44 }
  0x3c   :  { %281 = vmatpush.msra.mxu0 %v5190_v46  ;;  %477 = vmatpush.msra.mxu3 %v5190_v46 }
  0x3e   :  { %283 = vmatpush.msra.mxu0 %v5196_v54  ;;  %479 = vmatpush.msra.mxu3 %v5196_v54 }
  0x3f   :  { %1696 = vadd.xlane.f32.xlu2 %v1695_v51  ;;  %v149_v51 = vld [vmem:[#allocation2 + $0x240] sm:$0xff] }
  0x40   :  { %1693 = vadd.xlane.f32.xlu1 %v1692_v52  ;;  %v150_v52 = vld [vmem:[#allocation2 + $0x248] sm:$0xff]  ;;  %285 = vmatpush.msra.mxu0 %v5205_v59 }
  0x41   :  { %1690 = vadd.xlane.f32.xlu0 %v1689_v53  ;;  %v5193_v53 = vsub.f32 %v266_v44, %v5190_v46  ;;  %481 = vmatpush.msra.mxu3 %v5205_v59  ;;  %v5274_v44 = vand.u32 4294901760, %v234_v36 }
  0x43   :  { %424 = vmatpush.msra.mxu2 %v5193_v53  ;;  %v8153_v58 = vand.u32 4294901760, %v5193_v53 }
  0x45   :  { %427 = vmatpush.msra.mxu2 %v5201_v57  ;;  %v324_v63 = vsub.f32 %v5193_v53, %v8153_v58  ;;  %v181_v58 = vld [vmem:[#allocation2 + $0x340] sm:$0xff] }
  0x47   :  { %1705 = vadd.xlane.f32.xlu2 %v1704_v60  ;;  %v1755_v60 = vadd.f32 %v152_v50, %v151_v48  ;;  %430 = vmatpush.msra.mxu2 %v5213_v0  ;;  %v161_v48 = vld [vmem:[#allocation2 + $0x2a0] sm:$0xff] }
  0x48   :  { %1702 = vadd.xlane.f32.xlu1 %v1701_v61  ;;  %v1752_v61 = vadd.f32 %v150_v52, %v149_v51 }
  0x49   :  { %1699 = vadd.xlane.f32.xlu0 %v1698_v62  ;;  %v254_v62 = vld [vmem:[#allocation7 + $0x180] sm:$0xff] }
  0x4a   :  { %v5217_v2 = vand.u32 4294901760, %v254_v62 }
  0x4c   :  { %v5226_v10 = vsub.f32 %v254_v62, %v5217_v2  ;;  %287 = vmatpush.msra.mxu0 %v5217_v2  ;;  %483 = vmatpush.msra.mxu3 %v5217_v2 }
  0x4e   :  { %433 = vmatpush.msra.mxu2 %v5226_v10  ;;  %v8147_v20 = vand.u32 4294901760, %v5226_v10  ;;  %289 = vmatpush.msra.mxu0 %v5228_v11 }
  0x4f   :  { %1714 = vadd.xlane.f32.xlu2 %v1713_v5  ;;  %v325_v5 = vand.u32 4294901760, %v324_v63  ;;  %485 = vmatpush.msra.mxu3 %v5228_v11 }
  0x50   :  { %1711 = vadd.xlane.f32.xlu1 %v1710_v6  ;;  %v330_v6 = vsub.f32 %v5201_v57, %v8150_v1  ;;  %436 = vmatpush.msra.mxu2 %v5238_v19  ;;  %v342_v28 = vsub.f32 %v5226_v10, %v8147_v20 }
  0x51   :  { %1708 = vadd.xlane.f32.xlu0 %v1707_v7  ;;  %v8148_v7 = vand.u32 4294901760, %v5213_v0  ;;  %326 = vmatpush.msra.mxu1 %v325_v5 }
  0x52   :  { %291 = vmatpush.msra.mxu0 %v5234_v18  ;;  %487 = vmatpush.msra.mxu3 %v5234_v18 }
  0x53   :  { %v336_v17 = vsub.f32 %v5213_v0, %v8148_v7 }
  0x57   :  { %1723 = vadd.xlane.f32.xlu2 %v1722_v14  ;;  %v155_v14 = vld [vmem:[#allocation2 + $0x270] sm:$0xff] }
  0x58   :  { %1720 = vadd.xlane.f32.xlu1 %v1719_v15  ;;  %v156_v15 = vld [vmem:[#allocation2 + $0x278] sm:$0xff] }
  0x59   :  { %1717 = vadd.xlane.f32.xlu0 %v1716_v16  ;;  %v331_v16 = vand.u32 4294901760, %v330_v6  ;;  %v1761_v27 = vadd.f32 %v156_v15, %v155_v14  ;;  %v1770_v6 = vadd.f32 %v162_v49, %v161_v48  ;;  %v8140_v14 = vand.u32 4294901760, %v5293_v3  ;;  %v210_v49 = vld [vmem:[#allocation7 + $0x20] sm:$0xff] }
  0x5b   :  { %332 = vmatpush.msra.mxu1 %v331_v16  ;;  %v5310_v16 = vand.u32 4294901760, %v222_v9 }
  0x5f   :  { %1732 = vadd.xlane.f32.xlu2 %v1731_v23  ;;  %v337_v23 = vand.u32 4294901760, %v336_v17  ;;  %v218_v17 = vld [vmem:[#allocation7 + $0x60] sm:$0xff] }
  0x60   :  { %1729 = vadd.xlane.f32.xlu1 %v1728_v24  ;;  %v5244_v24 = vsub.f32 %v246_v12, %v5234_v18 }
  0x61   :  { %1726 = vadd.xlane.f32.xlu0 %v1725_v25  ;;  %v5246_v25 = vand.u32 4294901760, %v242_v21  ;;  %338 = vmatpush.msra.mxu1 %v337_v23 }
  0x62   :  { %439 = vmatpush.msra.mxu2 %v5244_v24 }
  0x63   :  { %v5256_v31 = vsub.f32 %v242_v21, %v5246_v25  ;;  %293 = vmatpush.msra.mxu0 %v5246_v25  ;;  %489 = vmatpush.msra.mxu3 %v5246_v25  ;;  %v171_v21 = vld [vmem:[#allocation2 + $0x2f0] sm:$0xff] }
  0x65   :  { %442 = vmatpush.msra.mxu2 %v5256_v31 }
  0x67   :  { %1741 = vadd.xlane.f32.xlu2 %v1740_v32  ;;  %v8145_v32 = vand.u32 4294901760, %v5244_v24 }
  0x68   :  { %1738 = vadd.xlane.f32.xlu1 %v1737_v33  ;;  %v5259_v33 = vand.u32 4294901760, %v238_v30 }
  0x69   :  { %1735 = vadd.xlane.f32.xlu0 %v1734_v34  ;;  %v343_v34 = vand.u32 4294901760, %v342_v28  ;;  %v354_v39 = vsub.f32 %v5244_v24, %v8145_v32  ;;  %v169_v28 = vld [vmem:[#allocation2 + $0x2e0] sm:$0xff] }
  0x6a   :  { %v5271_v40 = vsub.f32 %v238_v30, %v5259_v33  ;;  %295 = vmatpush.msra.mxu0 %v5259_v33  ;;  %491 = vmatpush.msra.mxu3 %v5259_v33 }
  0x6b   :  { %344 = vmatpush.msra.mxu1 %v343_v34  ;;  %v355_v50 = vand.u32 4294901760, %v354_v39  ;;  %v5319_v34 = vsub.f32 %v222_v9, %v5310_v16 }
  0x6c   :  { %v8143_v52 = vand.u32 4294901760, %v5271_v40  ;;  %445 = vmatpush.msra.mxu2 %v5271_v40  ;;  %297 = vmatpush.msra.mxu0 %v5274_v44 }
  0x6d   :  { %493 = vmatpush.msra.mxu3 %v5274_v44  ;;  %v8138_v48 = vand.u32 4294901760, %v5319_v34 }
  0x6e   :  { %v366_v63 = vsub.f32 %v5271_v40, %v8143_v52  ;;  %299 = vmatpush.msra.mxu0 %v5281_v55 }
  0x6f   :  { %1750 = vadd.xlane.f32.xlu2 %v1749_v41  ;;  %v8144_v41 = vand.u32 4294901760, %v5256_v31  ;;  %495 = vmatpush.msra.mxu3 %v5281_v55 }
  0x70   :  { %1747 = vadd.xlane.f32.xlu1 %v1746_v42  ;;  %v163_v42 = vld [vmem:[#allocation2 + $0x2b0] sm:$0xff]  ;;  %v367_v12 = vand.u32 4294901760, %v366_v63 }
  0x71   :  { %1744 = vadd.xlane.f32.xlu0 %v1743_v43  ;;  %v349_v43 = vand.u32 4294901760, %v348_v35  ;;  %v360_v51 = vsub.f32 %v5256_v31, %v8144_v41  ;;  %v1773_v5 = vadd.f32 %v164_v47, %v163_v42  ;;  %v214_v35 = vld [vmem:[#allocation7 + $0x40] sm:$0xff] }
  0x72   :  { %v5328_v45 = vand.u32 4294901760, %v214_v35 }
  0x73   :  { %350 = vmatpush.msra.mxu1 %v349_v43  ;;  %v361_v62 = vand.u32 4294901760, %v360_v51 }
  0x74   :  { %8298 = vst [vmem:[#allocation15_spill] sm:$0xff] %v5328_v45 }
  0x75   :  { %356 = vmatpush.msra.mxu1 %v355_v50 }
  0x77   :  { %1759 = vadd.xlane.f32.xlu2 %v1758_v56  ;;  %v1776_v56 = vadd.f32 %v166_v38, %v165_v37  ;;  %362 = vmatpush.msra.mxu1 %v361_v62  ;;  %v167_v37 = vld [vmem:[#allocation2 + $0x2d0] sm:$0xff]  ;;  %v168_v38 = vld [vmem:[#allocation2 + $0x2d8] sm:$0xff]  ;;  %v5341_v62 = vsub.f32 %v214_v35, %v5328_v45 }
  0x78   :  { %1756 = vadd.xlane.f32.xlu1 %v1755_v60  ;;  %v5286_v60 = vsub.f32 %v234_v36, %v5274_v44  ;;  %v170_v36 = vld [vmem:[#allocation2 + $0x2e8] sm:$0xff]  ;;  %v1779_v9 = vadd.f32 %v168_v38, %v167_v37  ;;  %v177_v37 = vld [vmem:[#allocation2 + $0x320] sm:$0xff] }
  0x79   :  { %1753 = vadd.xlane.f32.xlu0 %v1752_v61  ;;  %v226_v61 = vld [vmem:[#allocation7 + $0xa0] sm:$0xff]  ;;  %368 = vmatpush.msra.mxu1 %v367_v12  ;;  %v390_v12 = vsub.f32 %v5319_v34, %v8138_v48  ;;  %v176_v48 = vld [vmem:[#allocation2 + $0x318] sm:$0xff] }
  0x7a   :  { %v5295_v4 = vand.u32 4294901760, %v226_v61  ;;  %v8142_v8 = vand.u32 4294901760, %v5286_v60  ;;  %448 = vmatpush.msra.mxu2 %v5286_v60 }
  0x7c   :  { %v5302_v13 = vsub.f32 %v226_v61, %v5295_v4  ;;  %v372_v15 = vsub.f32 %v5286_v60, %v8142_v8  ;;  %451 = vmatpush.msra.mxu2 %v5293_v3  ;;  %301 = vmatpush.msra.mxu0 %v5295_v4 }
  0x7d   :  { %497 = vmatpush.msra.mxu3 %v5295_v4 }
  0x7e   :  { %v8139_v23 = vand.u32 4294901760, %v5302_v13  ;;  %v373_v30 = vand.u32 4294901760, %v372_v15  ;;  %454 = vmatpush.msra.mxu2 %v5302_v13  ;;  %303 = vmatpush.msra.mxu0 %v5310_v16  ;;  %v5349_v15 = vand.u32 4294901760, %v210_v49 }
  0x7f   :  { %1768 = vadd.xlane.f32.xlu2 %v1767_v22  ;;  %v378_v22 = vsub.f32 %v5293_v3, %v8140_v14  ;;  %499 = vmatpush.msra.mxu3 %v5310_v16 }
  0x80   :  { %1765 = vadd.xlane.f32.xlu1 %v1764_v26  ;;  %v5316_v26 = vand.u32 4294901760, %v218_v17  ;;  %v384_v42 = vsub.f32 %v5302_v13, %v8139_v23  ;;  %374 = vmatpush.msra.mxu1 %v373_v30  ;;  %8299 = vst [vmem:[#allocation16_spill] sm:$0xff] %v5349_v15  ;;  %v5361_v30 = vsub.f32 %v210_v49, %v5349_v15  ;;  %v175_v49 = vld [vmem:[#allocation2 + $0x310] sm:$0xff] }
  0x81   :  { %1762 = vadd.xlane.f32.xlu0 %v1761_v27  ;;  %v172_v27 = vld [vmem:[#allocation2 + $0x2f8] sm:$0xff]  ;;  %v379_v39 = vand.u32 4294901760, %v378_v22  ;;  %457 = vmatpush.msra.mxu2 %v5319_v34  ;;  %v8141_v22 = vand.u32 4294901760, %v5341_v62  ;;  %v1791_v20 = vadd.f32 %v176_v48, %v175_v49 }
  0x82   :  { %v5326_v43 = vsub.f32 %v218_v17, %v5316_v26  ;;  %v385_v61 = vand.u32 4294901760, %v384_v42  ;;  %v206_v17 = vld [vmem:[#allocation7] sm:$0xff]  ;;  %305 = vmatpush.msra.mxu0 %v5316_v26  ;;  %v8149_v23 = vand.u32 4294901760, %v5361_v30  ;;  %501 = vmatpush.msra.mxu3 %v5316_v26 }
  0x83   :  { %380 = vmatpush.msra.mxu1 %v379_v39  ;;  %v402_v39 = vsub.f32 %v5341_v62, %v8141_v22  ;;  %v174_v22 = vld [vmem:[#allocation2 + $0x308] sm:$0xff] }
  0x84   :  { %v8137_v63 = vand.u32 4294901760, %v5326_v43  ;;  %460 = vmatpush.msra.mxu2 %v5326_v43  ;;  %307 = vmatpush.msra.mxu0 %v5328_v45 }
  0x85   :  { %386 = vmatpush.msra.mxu1 %v385_v61  ;;  %503 = vmatpush.msra.mxu3 %v5328_v45 }
  0x86   :  { %463 = vmatpush.msra.mxu2 %v5341_v62  ;;  %309 = vmatpush.msra.mxu0 %v5349_v15 }
  0x87   :  { %1777 = vadd.xlane.f32.xlu2 %v1776_v56  ;;  %v1785_v56 = vadd.f32 %v172_v27, %v171_v21  ;;  %v396_v21 = vsub.f32 %v5326_v43, %v8137_v63  ;;  %v5356_v27 = vand.u32 4294901760, %v206_v17  ;;  %v259_v63 = vld [vmem:[#allocation7 + $0x1a8] sm:$0xff]  ;;  %505 = vmatpush.msra.mxu3 %v5349_v15 }
  0x88   :  { %1774 = vadd.xlane.f32.xlu1 %v1773_v5  ;;  %v267_v5 = vld [vmem:[#allocation7 + $0x1e8] sm:$0xff]  ;;  %v5377_v61 = vand.u32 4294901760, %v259_v63  ;;  %466 = vmatpush.msra.mxu2 %v5361_v30 }
  0x89   :  { %1771 = vadd.xlane.f32.xlu0 %v1770_v6  ;;  %v1782_v6 = vadd.f32 %v170_v36, %v169_v28  ;;  %8300 = vst [vmem:[#allocation17_spill] sm:$0xff] %v5356_v27  ;;  %v391_v28 = vand.u32 4294901760, %v390_v12  ;;  %v5363_v35 = vand.u32 4294901760, %v267_v5  ;;  %v263_v36 = vld [vmem:[#allocation7 + $0x1c8] sm:$0xff]  ;;  %v397_v38 = vand.u32 4294901760, %v396_v21  ;;  %v173_v21 = vld [vmem:[#allocation2 + $0x300] sm:$0xff]  ;;  %311 = vmatpush.msra.mxu0 %v5356_v27 }
  0x8a   :  { %v5330_v47 = vpop.xlane.xlu2 %1657  ;;  %v5369_v42 = vsub.f32 %v206_v17, %v5356_v27  ;;  %v178_v12 = vld [vmem:[#allocation2 + $0x328] sm:$0xff]  ;;  %v5372_v14 = vand.u32 4294901760, %v263_v36  ;;  %8304 = vst [vmem:[#allocation21_spill] sm:$0xff] %v5377_v61  ;;  %v403_v17 = vand.u32 4294901760, %v402_v39  ;;  %v5400_v7 = vsub.f32 %v259_v63, %v5377_v61  ;;  %507 = vmatpush.msra.mxu3 %v5356_v27 }
  0x8b   :  { %v5335_v50 = vpop.xlane.xlu1 %1651  ;;  %8301 = vst [vmem:[#allocation18_spill] sm:$0xff] %v5363_v35  ;;  %392 = vmatpush.msra.mxu1 %v391_v28  ;;  %v1794_v29 = vadd.f32 %v178_v12, %v177_v37  ;;  %v1788_v1 = vadd.f32 %v174_v22, %v173_v21  ;;  %v5148_v37 = vmov 256.0   ;;  %v247_v21 = vld [vmem:[#allocation7 + $0x148] sm:$0xff] }
  0x8c   :  { %v5337_v51 = vpop.xlane.xlu0 %1645  ;;  %8302 = vst [vmem:[#allocation19_spill] sm:$0xff] %v5369_v42  ;;  %v5390_v41 = vsub.f32 %v263_v36, %v5372_v14  ;;  %4626 = vrcp.f32 %v5148_v37  ;;  %v183_v37 = vld [vmem:[#allocation2 + $0x350] sm:$0xff]  ;;  %469 = vmatpush.msra.mxu2 %v5369_v42 }
  0x8d   :  { %398 = vmatpush.msra.mxu1 %v397_v38  ;;  %8307 = vst [vmem:[#allocation24_spill] sm:$0xff] %v5400_v7 }
  0x8e   :  { %8306 = vst [vmem:[#allocation23_spill] sm:$0xff] %v5390_v41  ;;  %v8158_v22 = vand.u32 4294901760, %v5390_v41  ;;  %622 = vmatpush.msrb.mxu2 %v5363_v35 }
  0x8f   :  { %1786 = vadd.xlane.f32.xlu2 %v1785_v56  ;;  %v5375_v56 = vsub.f32 %v267_v5, %v5363_v35  ;;  %v408_v5 = vsub.f32 %v5361_v30, %v8149_v23  ;;  %v251_v23 = vld [vmem:[#allocation7 + $0x168] sm:$0xff]  ;;  %404 = vmatpush.msra.mxu1 %v403_v17 }
  0x90   :  { %1783 = vadd.xlane.f32.xlu1 %v1782_v6  ;;  %v8151_v6 = vand.u32 4294901760, %v5369_v42  ;;  %v5415_v12 = vand.u32 4294901760, %v251_v23  ;;  %624 = vmatpush.msrb.mxu2 %v5372_v14 }
  0x91   :  { %1780 = vadd.xlane.f32.xlu0 %v1779_v9  ;;  %8303 = vst [vmem:[#allocation20_spill] sm:$0xff] %v5375_v56  ;;  %v255_v9 = vld [vmem:[#allocation7 + $0x188] sm:$0xff]  ;;  %v8152_v52 = vand.u32 4294901760, %v5375_v56  ;;  %v409_v63 = vand.u32 4294901760, %v408_v5  ;;  %v671_v5 = vsub.f32 %v5390_v41, %v8158_v22  ;;  %v8309_v22 = vand.u32 4294901760, %v5400_v7 }
  0x92   :  { %v5381_v8 = vpop.xlane.xlu2 %1660  ;;  %v5392_v28 = vand.u32 4294901760, %v255_v9  ;;  %v414_v48 = vsub.f32 %v5369_v42, %v8151_v6  ;;  %v5424_v6 = vand.u32 4294901760, %v247_v21  ;;  %v5428_v15 = vsub.f32 %v251_v23, %v5415_v12  ;;  %v179_v42 = vld [vmem:[#allocation2 + $0x330] sm:$0xff]  ;;  %v5443_v35 = vpop.eup %4626  ;;  %626 = vmatpush.msrb.mxu2 %v5377_v61 }
  0x93   :  { %8305 = vst [vmem:[#allocation22_spill] sm:$0xff] %v5381_v8  ;;  %v5394_v39 = vpop.xlane.xlu1 %1654  ;;  %v665_v36 = vsub.f32 %v5375_v56, %v8152_v52  ;;  %v184_v52 = vld [vmem:[#allocation2 + $0x358] sm:$0xff]  ;;  %v182_v56 = vld [vmem:[#allocation2 + $0x348] sm:$0xff]  ;;  %410 = vmatpush.msra.mxu1 %v409_v63  ;;  %v8312_v23 = vand.u32 4294901760, %v5193_v53  ;;  %v8315_v41 = vand.u32 4294901760, %v5201_v57  ;;  %v8318_v57 = vand.u32 4294901760, %v5213_v0 }
  0x94   :  { %v5396_v32 = vpop.xlane.xlu0 %1648  ;;  %v5418_v49 = vsub.f32 %v255_v9, %v5392_v28  ;;  %v415_v38 = vand.u32 4294901760, %v414_v48  ;;  %8308 = vst [vmem:[#allocation25_spill] sm:$0xff] %v5428_v15  ;;  %v672_v9 = vand.u32 4294901760, %v671_v5  ;;  %v239_v8 = vld [vmem:[#allocation7 + $0x108] sm:$0xff]  ;;  %v1800_v5 = vadd.f32 %v182_v56, %v181_v58  ;;  %628 = vmatpush.msrb.mxu2 %v5392_v28 }
  0x95   :  { %v666_v17 = vand.u32 4294901760, %v665_v36  ;;  %v180_v36 = vld [vmem:[#allocation2 + $0x338] sm:$0xff]  ;;  %518 = vmatpush.msrb.mxu0 %v8312_v23  ;;  %v231_v58 = vld [vmem:[#allocation7 + $0xc8] sm:$0xff]  ;;  %vm1841_vm0 = vweird.f32 %v5443_v35 }
  0x96   :  { %v1797_v23 = vadd.f32 %v180_v36, %v179_v42  ;;  %416 = vmatpush.msra.mxu1 %v415_v38  ;;  %v1837_v42 = vmul.f32 256.0, %v5443_v35  ;;  %630 = vmatpush.msrb.mxu2 %v5415_v12 }
  0x97   :  { %1795 = vadd.xlane.f32.xlu2 %v1794_v29  ;;  %v243_v29 = vld [vmem:[#allocation7 + $0x128] sm:$0xff]  ;;  %667 = vmatpush.msrb.mxu3 %v666_v17 }
  0x98   :  { %1792 = vadd.xlane.f32.xlu1 %v1791_v20  ;;  %v677_v20 = vsub.f32 %v5400_v7, %v8309_v22  ;;  %v1803_v22 = vadd.f32 %v184_v52, %v183_v37  ;;  %v5453_v53 = vand.u32 4294901760, %v243_v29  ;;  %522 = vmatpush.msrb.mxu0 %v8315_v41  ;;  %v8316_v37 = vand.u32 4294901760, %v5428_v15  ;;  %v189_v41 = vld [vmem:[#allocation2 + $0x380] sm:$0xff] }
  0x99   :  { %1789 = vadd.xlane.f32.xlu0 %v1788_v1  ;;  %v5435_v1 = vsub.f32 %v247_v21, %v5424_v6  ;;  %v8313_v21 = vand.u32 4294901760, %v5418_v49  ;;  %585 = vmatpush.msrb.mxu1 %v5190_v46 }
  0x9a   :  { %v5437_v48 = vpop.xlane.xlu2 %1669  ;;  %8314 = vst [vmem:[#allocation28_spill] sm:$0xff] %v5453_v53  ;;  %v678_v52 = vand.u32 4294901760, %v677_v20  ;;  %v689_v17 = vsub.f32 %v5428_v15, %v8316_v37  ;;  %673 = vmatpush.msrb.mxu3 %v672_v9  ;;  %526 = vmatpush.msrb.mxu0 %v8318_v57  ;;  %v5470_v56 = vsub.f32 %v243_v29, %v5453_v53  ;;  %v190_v20 = vld [vmem:[#allocation2 + $0x388] sm:$0xff]  ;;  %v187_v9 = vld [vmem:[#allocation2 + $0x370] sm:$0xff]  ;;  %v188_v37 = vld [vmem:[#allocation2 + $0x378] sm:$0xff]  ;;  %v1838_v15 = vsub.f32 1.0, %v1837_v42 }
  0x9b   :  { %8310 = vst [vmem:[#allocation26_spill] sm:$0xff] %v5435_v1  ;;  %v5445_v63 = vpop.xlane.xlu1 %1666  ;;  %v683_v7 = vsub.f32 %v5418_v49, %v8313_v21  ;;  %v8171_v27 = vand.u32 4294901760, %v5435_v1  ;;  %v5463_v21 = vand.u32 4294901760, %v239_v8  ;;  %587 = vmatpush.msrb.mxu1 %v5196_v54  ;;  %v185_v54 = vld [vmem:[#allocation2 + $0x360] sm:$0xff]  ;;  %v227_v57 = vld [vmem:[#allocation7 + $0xa8] sm:$0xff]  ;;  %632 = vmatpush.msrb.mxu2 %v5424_v6 }
  0x9c   :  { %8311 = vst [vmem:[#allocation27_spill] sm:$0xff] %v5437_v48  ;;  %v5447_v45 = vpop.xlane.xlu0 %1663  ;;  %v235_v48 = vld [vmem:[#allocation7 + $0xe8] sm:$0xff]  ;;  %679 = vmatpush.msrb.mxu3 %v678_v52  ;;  %v690_v29 = vand.u32 4294901760, %v689_v17 }
  0x9d   :  { %8317 = vst [vmem:[#allocation29_spill] sm:$0xff] %v5463_v21  ;;  %v684_v46 = vand.u32 4294901760, %v683_v7  ;;  %v5472_v38 = vand.u32 4294901760, %v235_v48  ;;  %v5475_v36 = vsub.f32 %v239_v8, %v5463_v21  ;;  %v695_v0 = vsub.f32 %v5435_v1, %v8171_v27  ;;  %v186_v7 = vld [vmem:[#allocation2 + $0x368] sm:$0xff]  ;;  %589 = vmatpush.msrb.mxu1 %v5205_v59  ;;  %634 = vmatpush.msrb.mxu2 %v5453_v53  ;;  %v201_v53 = vld [vmem:[#allocation2 + $0x3e0] sm:$0xff] }
  0x9e   :  { %v8174_v8 = vand.u32 4294901760, %v5470_v56  ;;  %v8320_v27 = vand.u32 4294901760, %v5226_v10  ;;  %v1806_v42 = vadd.f32 %v186_v7, %v185_v54  ;;  %v8322_v59 = vand.u32 4294901760, %v5238_v19  ;;  %v196_v54 = vld [vmem:[#allocation2 + $0x3b8] sm:$0xff]  ;;  %v223_v7 = vld [vmem:[#allocation7 + $0x88] sm:$0xff] }
  0x9f   :  { %1804 = vadd.xlane.f32.xlu2 %v1803_v22  ;;  %v5480_v22 = vand.u32 4294901760, %v231_v58  ;;  %685 = vmatpush.msrb.mxu3 %v684_v46  ;;  %v8324_v46 = vand.u32 4294901760, %v5475_v36 }
  0xa0   :  { %1801 = vadd.xlane.f32.xlu1 %v1800_v5  ;;  %530 = vmatpush.msrb.mxu0 %v8320_v27  ;;  %v1812_v5 = vadd.f32 %v190_v20, %v189_v41  ;;  %v1809_v27 = vadd.f32 %v188_v37, %v187_v9  ;;  %v696_v41 = vand.u32 4294901760, %v695_v0  ;;  %v8325_v9 = vand.u32 4294901760, %v5244_v24 }
  0xa1   :  { %1798 = vadd.xlane.f32.xlu0 %v1797_v23  ;;  %v5486_v23 = vsub.f32 %v235_v48, %v5472_v38  ;;  %v5494_v1 = vsub.f32 %v231_v58, %v5480_v22  ;;  %v701_v48 = vsub.f32 %v5470_v56, %v8174_v8  ;;  %591 = vmatpush.msrb.mxu1 %v5217_v2  ;;  %v5508_v58 = vand.u32 4294901760, %v227_v57  ;;  %v195_v2 = vld [vmem:[#allocation2 + $0x3b0] sm:$0xff] }
  0xa2   :  { %v5488_v61 = vpop.xlane.xlu2 %1678  ;;  %534 = vmatpush.msrb.mxu0 %v8322_v59  ;;  %691 = vmatpush.msrb.mxu3 %v690_v29  ;;  %v707_v20 = vsub.f32 %v5475_v36, %v8324_v46  ;;  %v1839_v8 = vmul.f32 %v5443_v35, %v1838_v15  ;;  %v193_v15 = vld [vmem:[#allocation2 + $0x3a0] sm:$0xff]  ;;  %v191_v29 = vld [vmem:[#allocation2 + $0x390] sm:$0xff]  ;;  %v192_v59 = vld [vmem:[#allocation2 + $0x398] sm:$0xff]  ;;  %v5528_v46 = vand.u32 4294901760, %v223_v7 }
  0xa3   :  { %8319 = vst [vmem:[#allocation30_spill] sm:$0xff] %v5486_v23  ;;  %v5496_v52 = vpop.xlane.xlu1 %1675  ;;  %v8175_v10 = vand.u32 4294901760, %v5486_v23  ;;  %593 = vmatpush.msrb.mxu1 %v5228_v11  ;;  %v8176_v19 = vand.u32 4294901760, %v5494_v1  ;;  %v702_v37 = vand.u32 4294901760, %v701_v48  ;;  %v5524_v24 = vsub.f32 %v227_v57, %v5508_v58  ;;  %v194_v11 = vld [vmem:[#allocation2 + $0x3a8] sm:$0xff]  ;;  %636 = vmatpush.msrb.mxu2 %v5463_v21 }
  0xa4   :  { %8321 = vst [vmem:[#allocation31_spill] sm:$0xff] %v5494_v1  ;;  %v5498_v17 = vpop.xlane.xlu0 %1672  ;;  %538 = vmatpush.msrb.mxu0 %v8325_v9  ;;  %697 = vmatpush.msrb.mxu3 %v696_v41  ;;  %v708_v48 = vand.u32 4294901760, %v707_v20  ;;  %v1840_v9 = vadd.f32 %v5443_v35, %v1839_v8  ;;  %v1821_v20 = vadd.f32 %v196_v54, %v195_v2  ;;  %v8327_v8 = vand.u32 4294901760, %v5271_v40  ;;  %v215_v21 = vld [vmem:[#allocation7 + $0x48] sm:$0xff] }
  0xa5   :  { %8323 = vst [vmem:[#allocation32_spill] sm:$0xff] %v5508_v58  ;;  %v713_v0 = vsub.f32 %v5486_v23, %v8175_v10  ;;  %595 = vmatpush.msrb.mxu1 %v5234_v18  ;;  %v719_v57 = vsub.f32 %v5494_v1, %v8176_v19  ;;  %v1815_v10 = vadd.f32 %v192_v59, %v191_v29  ;;  %v219_v1 = vld [vmem:[#allocation7 + $0x68] sm:$0xff]  ;;  %v8328_v40 = vand.u32 4294901760, %v5286_v60  ;;  %v197_v59 = vld [vmem:[#allocation2 + $0x3c0] sm:$0xff] }
  0xa6   :  { %703 = vmatpush.msrb.mxu3 %v702_v37  ;;  %638 = vmatpush.msrb.mxu2 %v5472_v38  ;;  %v211_v23 = vld [vmem:[#allocation7 + $0x28] sm:$0xff]  ;;  %v5553_v37 = vand.u32 4294901760, %v219_v1  ;;  %v5563_v54 = vsel %vm1841_vm0, %v5443_v35, %v1840_v9 }
  0xa7   :  { %1813 = vadd.xlane.f32.xlu2 %v1812_v5  ;;  %v8326_v5 = vand.u32 4294901760, %v5256_v31  ;;  %v714_v18 = vand.u32 4294901760, %v713_v0  ;;  %597 = vmatpush.msrb.mxu1 %v5246_v25  ;;  %v202_v2 = vld [vmem:[#allocation2 + $0x3e8] sm:$0xff]  ;;  %v5556_v0 = vsub.f32 %v223_v7, %v5528_v46  ;;  %v5558_v25 = vand.u32 4294901760, %v215_v21  ;;  %v200_v7 = vld [vmem:[#allocation2 + $0x3d8] sm:$0xff] }
  0xa8   :  { %1810 = vadd.xlane.f32.xlu1 %v1809_v27  ;;  %709 = vmatpush.msrb.mxu3 %v708_v48  ;;  %v5567_v60 = vand.u32 4294901760, %v211_v23  ;;  %v5571_v29 = vmul.f32 %v5563_v54, %v5396_v32  ;;  %v198_v48 = vld [vmem:[#allocation2 + $0x3c8] sm:$0xff]  ;;  %v5575_v9 = vsub.f32 %v219_v1, %v5553_v37  ;;  %v1830_v32 = vadd.f32 %v202_v2, %v201_v53 }
  0xa9   :  { %1807 = vadd.xlane.f32.xlu0 %v1806_v42  ;;  %542 = vmatpush.msrb.mxu0 %v8326_v5  ;;  %v8185_v42 = vand.u32 4294901760, %v5524_v24  ;;  %v1818_v5 = vadd.f32 %v194_v11, %v193_v15  ;;  %8329 = vst [vmem:[#allocation33_spill] sm:$0xff] %v5556_v0  ;;  %v199_v15 = vld [vmem:[#allocation2 + $0x3d0] sm:$0xff]  ;;  %v720_v11 = vand.u32 4294901760, %v719_v57  ;;  %v8186_v35 = vand.u32 4294901760, %v5556_v0 }
  0xaa   :  { %v5531_v27 = vpop.xlane.xlu2 %1687  ;;  %599 = vmatpush.msrb.mxu1 %v5259_v33  ;;  %640 = vmatpush.msrb.mxu2 %v5480_v22  ;;  %8330 = vst [vmem:[#allocation34_spill] sm:$0xff] %v5571_v29  ;;  %v5578_v33 = vsub.f32 %v215_v21, %v5558_v25  ;;  %v5582_v57 = vmul.f32 %v5563_v54, %v5337_v51  ;;  %v4757_v51 = vld [vmem:[#allocation2 + $0x18] sm:$0xff] }
  0xab   :  { %v5540_v31 = vpop.xlane.xlu1 %1684  ;;  %546 = vmatpush.msrb.mxu0 %v8327_v8  ;;  %v725_v19 = vsub.f32 %v5524_v24, %v8185_v42  ;;  %715 = vmatpush.msrb.mxu3 %v714_v18  ;;  %v207_v8 = vld [vmem:[#allocation7 + $0x8] sm:$0xff]  ;;  %v8332_v18 = vand.u32 4294901760, %v5293_v3  ;;  %v731_v1 = vsub.f32 %v5556_v0, %v8186_v35  ;;  %v1827_v53 = vadd.f32 %v200_v7, %v199_v15 }
  0xac   :  { %v5542_v41 = vpop.xlane.xlu0 %1681  ;;  %8331 = vst [vmem:[#allocation35_spill] sm:$0xff] %v5582_v57  ;;  %601 = vmatpush.msrb.mxu1 %v5274_v44  ;;  %v5592_v42 = vand.u32 4294901760, %v207_v8  ;;  %642 = vmatpush.msrb.mxu2 %v5508_v58  ;;  %v5598_v3 = vsub.f32 %v211_v23, %v5567_v60  ;;  %v1910_v21 = vsub.f32 %v4757_v51, %v5571_v29  ;;  %v8334_v15 = vand.u32 4294901760, %v5302_v13  ;;  %v4759_v58 = vld [vmem:[#allocation2 + $0x8] sm:$0xff] }
  0xad   :  { %550 = vmatpush.msrb.mxu0 %v8328_v40  ;;  %v205_v40 = vld [vmem:[#allocation5] sm:$0x3]  ;;  %721 = vmatpush.msrb.mxu3 %v720_v11  ;;  %v732_v11 = vand.u32 4294901760, %v731_v1  ;;  %v8335_v23 = vand.u32 4294901760, %v5575_v9  ;;  %v1908_v0 = vsub.f32 %v4759_v58, %v5582_v57  ;;  %v8336_v51 = vand.u32 4294901760, %v5578_v33 }
  0xae   :  { %v5600_v44 = vand.u32 4294901760, %v205_v40  ;;  %603 = vmatpush.msrb.mxu1 %v5281_v55  ;;  %644 = vmatpush.msrb.mxu2 %v5528_v46  ;;  %v8192_v55 = vand.u32 4294901760, %v5598_v3  ;;  %v8337_v1 = vand.u32 4294901760, %v5319_v34  ;;  %v5632_v58 = vmul.f32 %v5563_v54, %v5335_v50 }
  0xaf   :  { %1822 = vadd.xlane.f32.xlu2 %v1821_v20  ;;  %v726_v20 = vand.u32 4294901760, %v725_v19  ;;  %554 = vmatpush.msrb.mxu0 %v8332_v18  ;;  %v1824_v19 = vadd.f32 %v198_v48, %v197_v59  ;;  %v4756_v18 = vld [vmem:[#allocation2 + $0x10] sm:$0xff]  ;;  %v737_v7 = vsub.f32 %v5575_v9, %v8335_v23  ;;  %v4758_v59 = vld [vmem:[#allocation2] sm:$0xff]  ;;  %v743_v13 = vsub.f32 %v5578_v33, %v8336_v51 }
  0xb0   :  { %1819 = vadd.xlane.f32.xlu1 %v1818_v5  ;;  %8333 = vst [vmem:[#allocation36_spill] sm:$0xff] %v5600_v44  ;;  %v1909_v35 = vsub.f32 %v4756_v18, %v5571_v29  ;;  %v1907_v48 = vsub.f32 %v4758_v59, %v5582_v57  ;;  %605 = vmatpush.msrb.mxu1 %v5295_v4 }
  0xb1   :  { %1816 = vadd.xlane.f32.xlu0 %v1815_v10  ;;  %558 = vmatpush.msrb.mxu0 %v8334_v15  ;;  %v5625_v18 = vsub.f32 %v205_v40, %v5600_v44  ;;  %v5628_v15 = vsub.f32 %v207_v8, %v5592_v42  ;;  %8339 = vst [vmem:[#allocation38_spill] sm:$0xff] %v5632_v58  ;;  %v8340_v40 = vand.u32 4294901760, %v5326_v43  ;;  %v203_v43 = vld [vmem:[#allocation2 + $0x3f0] sm:$0xff] }
  0xb2   :  { %v5594_v10 = vpop.xlane.xlu2 %1696  ;;  %727 = vmatpush.msrb.mxu3 %v726_v20  ;;  %646 = vmatpush.msrb.mxu2 %v5553_v37  ;;  %v738_v20 = vand.u32 4294901760, %v737_v7  ;;  %v749_v34 = vsub.f32 %v5598_v3, %v8192_v55  ;;  %v2037_v4 = vmul.f32 %v1909_v35, %v1909_v35  ;;  %v2038_v23 = vmul.f32 %v1910_v21, %v1910_v21 }
  0xb3   :  { %v5602_v5 = vpop.xlane.xlu1 %1693  ;;  %562 = vmatpush.msrb.mxu0 %v8337_v1  ;;  %8338 = vst [vmem:[#allocation37_spill] sm:$0xff] %v5625_v18  ;;  %v8191_v8 = vand.u32 4294901760, %v5628_v15  ;;  %v5642_v59 = vand.u32 4294901760, %v5625_v18  ;;  %v2035_v50 = vmul.f32 %v1907_v48, %v1907_v48  ;;  %v744_v7 = vand.u32 4294901760, %v743_v13  ;;  %607 = vmatpush.msrb.mxu1 %v5310_v16  ;;  %v4760_v13 = vld [vmem:[#allocation2 + $0x20] sm:$0xff] }
  0xb4   :  { %v5604_v2 = vpop.xlane.xlu0 %1690  ;;  %733 = vmatpush.msrb.mxu3 %v732_v11  ;;  %v2036_v11 = vmul.f32 %v1908_v0, %v1908_v0  ;;  %v5646_v51 = vmul.f32 %v5563_v54, %v5330_v47  ;;  %v5650_v35 = vmul.f32 %v5563_v54, %v5394_v39  ;;  %648 = vmatpush.msrb.mxu2 %v5558_v25  ;;  %v8344_v0 = vand.u32 4294901760, %v5341_v62 }
  0xb5   :  { %566 = vmatpush.msrb.mxu0 %v8340_v40  ;;  %8341 = vst [vmem:[#allocation39_spill] sm:$0xff] %v5642_v59  ;;  %v755_v47 = vsub.f32 %v5628_v15, %v8191_v8  ;;  %v315_v39 = vsub.f32 %v5625_v18, %v5642_v59  ;;  %v2166_v16 = vadd.f32 %v2038_v23, %v2037_v4  ;;  %v4762_v8 = vld [vmem:[#allocation2 + $0x30] sm:$0xff]  ;;  %v4763_v4 = vld [vmem:[#allocation2 + $0x40] sm:$0xff] }
  0xb6   :  { %8342 = vst [vmem:[#allocation40_spill] sm:$0xff] %v5646_v51  ;;  %739 = vmatpush.msrb.mxu3 %v738_v20  ;;  %v1911_v1 = vsub.f32 %v4760_v13, %v5632_v58  ;;  %v4761_v20 = vld [vmem:[#allocation2 + $0x28] sm:$0xff]  ;;  %609 = vmatpush.msrb.mxu1 %v5316_v26  ;;  %v2163_v40 = vadd.f32 %v2036_v11, %v2035_v50  ;;  %v8347_v26 = vld [vmem:[#allocation22_spill] sm:$0xff] }
  0xb7   :  { %1831 = vadd.xlane.f32.xlu2 %v1830_v32  ;;  %8343 = vst [vmem:[#allocation41_spill] sm:$0xff] %v5650_v35  ;;  %v204_v32 = vld [vmem:[#allocation2 + $0x3f8] sm:$0xff]  ;;  %570 = vmatpush.msrb.mxu0 %v8344_v0  ;;  %v1912_v62 = vsub.f32 %v4761_v20, %v5632_v58  ;;  %v8345_v0 = vand.u32 4294901760, %v5361_v30  ;;  %v1913_v55 = vsub.f32 %v4762_v8, %v5650_v35  ;;  %v4764_v13 = vld [vmem:[#allocation2 + $0x48] sm:$0xff]  ;;  %v756_v8 = vand.u32 4294901760, %v755_v47 }
  0xb8   :  { %1828 = vadd.xlane.f32.xlu1 %v1827_v53  ;;  %v750_v53 = vand.u32 4294901760, %v749_v34  ;;  %650 = vmatpush.msrb.mxu2 %v5567_v60  ;;  %v1833_v34 = vadd.f32 %v204_v32, %v203_v43  ;;  %v1915_v23 = vsub.f32 %v4763_v4, %v5646_v51  ;;  %v1916_v29 = vsub.f32 %v4764_v13, %v5646_v51  ;;  %v8346_v20 = vld [vmem:[#allocation15_spill] sm:$0xff]  ;;  %v4765_v11 = vld [vmem:[#allocation2 + $0x38] sm:$0xff]  ;;  %v8351_v4 = vld [vmem:[#allocation20_spill] sm:$0xff] }
  0xb9   :  { %1825 = vadd.xlane.f32.xlu0 %v1824_v19  ;;  %745 = vmatpush.msrb.mxu3 %v744_v7  ;;  %v5680_v50 = vmul.f32 %v5563_v54, %v8347_v26  ;;  %v1914_v30 = vsub.f32 %v4765_v11, %v5650_v35  ;;  %v5684_v7 = vand.u32 4294901760, %v315_v39  ;;  %v5688_v43 = vmul.f32 %v5563_v54, %v5445_v63  ;;  %v8354_v26 = vld [vmem:[#allocation19_spill] sm:$0xff]  ;;  %v8356_v63 = vld [vmem:[#allocation16_spill] sm:$0xff]  ;;  %v4767_v35 = vld [vmem:[#allocation2 + $0x58] sm:$0xff] }
  0xba   :  { %v5654_v21 = vpop.xlane.xlu2 %1705  ;;  %574 = vmatpush.msrb.mxu0 %v8345_v0  ;;  %611 = vmatpush.msrb.mxu1 %v8346_v20  ;;  %v2039_v32 = vmul.f32 %v1911_v1, %v1911_v1  ;;  %v2040_v0 = vmul.f32 %v1912_v62, %v1912_v62  ;;  %v8352_v13 = vand.u32 4294901760, %v8351_v4  ;;  %v5694_v20 = vmul.f32 %v5563_v54, %v5447_v45  ;;  %v4766_v62 = vld [vmem:[#allocation2 + $0x50] sm:$0xff] }
  0xbb   :  { %v5663_v19 = vpop.xlane.xlu1 %1702  ;;  %652 = vmatpush.msrb.mxu2 %v5592_v42  ;;  %8348 = vst [vmem:[#allocation15_spill] sm:$0xff] %v5680_v50  ;;  %751 = vmatpush.msrb.mxu3 %v750_v53  ;;  %v2041_v53 = vmul.f32 %v1913_v55, %v1913_v55  ;;  %v2043_v47 = vmul.f32 %v1915_v23, %v1915_v23  ;;  %v8355_v11 = vand.u32 4294901760, %v8354_v26  ;;  %v8357_v55 = vld [vmem:[#allocation27_spill] sm:$0xff]  ;;  %v4768_v26 = vld [vmem:[#allocation2 + $0x70] sm:$0xff] }
  0xbc   :  { %v5665_v48 = vpop.xlane.xlu0 %1699  ;;  %472 = vmatmul.f32.vlgmr.msra.gmra.mxu2 %v5625_v18  ;;  %8349 = vst [vmem:[#allocation22_spill] sm:$0xff] %v5684_v7  ;;  %v2044_v39 = vmul.f32 %v1916_v29, %v1916_v29  ;;  %613 = vmatpush.msrb.mxu1 %v8356_v63  ;;  %v2042_v1 = vmul.f32 %v1914_v30, %v1914_v30 }
  0xbd   :  { %8350 = vst [vmem:[#allocation42_spill] sm:$0xff] %v5688_v43  ;;  %859 = vmatpush.msra.mxu2 %v8352_v13  ;;  %578 = vmatpush.msrb.mxu0 %v8355_v11  ;;  %v1917_v13 = vsub.f32 %v4766_v62, %v5680_v50  ;;  %v1918_v45 = vsub.f32 %v4767_v35, %v5680_v50  ;;  %v4769_v35 = vld [vmem:[#allocation2 + $0x78] sm:$0xff]  ;;  %v4770_v11 = vld [vmem:[#allocation2 + $0x60] sm:$0xff]  ;;  %v4771_v62 = vld [vmem:[#allocation2 + $0x68] sm:$0xff] }
  0xbe   :  { %8353 = vst [vmem:[#allocation20_spill] sm:$0xff] %v5694_v20  ;;  %757 = vmatpush.msrb.mxu3 %v756_v8  ;;  %317 = vmatmul.f32.vlgmr.msra.gmra.mxu0 %v5684_v7  ;;  %v5706_v29 = vmul.f32 %v5563_v54, %v8357_v55  ;;  %v2169_v23 = vadd.f32 %v2040_v0, %v2039_v32  ;;  %v8359_v50 = vld [vmem:[#allocation23_spill] sm:$0xff]  ;;  %v8361_v32 = vld [vmem:[#allocation18_spill] sm:$0xff] }
  0xbf   :  { %2167 = vadd.xlane.f32.xlu2 %v2166_v16  ;;  %v1921_v30 = vsub.f32 %v4768_v26, %v5688_v43  ;;  %511 = vmatmul.f32.vlgmr.msra.gmra.mxu3 %v5642_v59  ;;  %v1922_v8 = vsub.f32 %v4769_v35, %v5688_v43  ;;  %v1919_v63 = vsub.f32 %v4770_v11, %v5694_v20  ;;  %v8360_v58 = vand.u32 4294901760, %v8359_v50  ;;  %v8364_v35 = vld [vmem:[#allocation17_spill] sm:$0xff] }
  0xc0   :  { %2164 = vadd.xlane.f32.xlu1 %v2163_v40  ;;  %8358 = vst [vmem:[#allocation19_spill] sm:$0xff] %v5706_v29  ;;  %765 = vmatpush.msra.mxu0 %v8351_v4  ;;  %v1920_v55 = vsub.f32 %v4771_v62, %v5694_v20  ;;  %v5723_v0 = vmul.f32 %v5563_v54, %v5496_v52 }
  0xc1   :  { %1834 = vadd.xlane.f32.xlu0 %v1833_v34  ;;  %863 = vmatpush.msra.mxu2 %v8360_v58  ;;  %v5727_v4 = vmul.f32 %v5563_v54, %v5498_v17  ;;  %v2175_v26 = vadd.f32 %v2044_v39, %v2043_v47  ;;  %v2172_v11 = vadd.f32 %v2042_v1, %v2041_v53  ;;  %v8365_v58 = vld [vmem:[#allocation24_spill] sm:$0xff]  ;;  %v4772_v47 = vld [vmem:[#allocation2 + $0x80] sm:$0xff] }
  0xc2   :  { %v5699_v16 = vpop.xlane.xlu2 %1714  ;;  %926 = vmatpush.msra.mxu3 %v8361_v32  ;;  %8362 = vst [vmem:[#allocation16_spill] sm:$0xff] %v5723_v0  ;;  %615 = vmatpush.msrb.mxu1 %v8364_v35  ;;  %v2045_v62 = vmul.f32 %v1917_v13, %v1917_v13  ;;  %v2046_v20 = vmul.f32 %v1918_v45, %v1918_v45  ;;  %v8366_v43 = vand.u32 4294901760, %v8365_v58  ;;  %v4773_v13 = vld [vmem:[#allocation2 + $0x88] sm:$0xff]  ;;  %v4774_v45 = vld [vmem:[#allocation2 + $0xa0] sm:$0xff]  ;;  %v8369_v35 = vand.u32 4294901760, %v5418_v49 }
  0xc3   :  { %v5708_v34 = vpop.xlane.xlu1 %1711  ;;  %8363 = vst [vmem:[#allocation27_spill] sm:$0xff] %v5727_v4  ;;  %768 = vmatpush.msra.mxu0 %v8359_v50  ;;  %418 = vmatmul.f32.vlgmr.msra.gmra.mxu1 %v5600_v44  ;;  %v5736_v52 = vmul.f32 %v5563_v54, %v5488_v61  ;;  %v2049_v17 = vmul.f32 %v1921_v30, %v1921_v30 }
  0xc4   :  { %v5710_v40 = vpop.xlane.xlu0 %1708  ;;  %867 = vmatpush.msra.mxu2 %v8366_v43  ;;  %818 = vmatpush.msra.mxu1 %v8361_v32  ;;  %v1923_v39 = vsub.f32 %v4772_v47, %v5706_v29  ;;  %v2050_v50 = vmul.f32 %v1922_v8, %v1922_v8  ;;  %v2047_v53 = vmul.f32 %v1919_v63, %v1919_v63  ;;  %v4777_v47 = vld [vmem:[#allocation2 + $0x98] sm:$0xff] }
  0xc5   :  { %8367 = vst [vmem:[#allocation23_spill] sm:$0xff] %v5736_v52  ;;  %v2048_v1 = vmul.f32 %v1920_v55, %v1920_v55  ;;  %928 = vmatpush.msra.mxu3 %v5372_v14  ;;  %v1924_v43 = vsub.f32 %v4773_v13, %v5706_v29  ;;  %v1927_v61 = vsub.f32 %v4774_v45, %v5723_v0  ;;  %v4776_v55 = vld [vmem:[#allocation2 + $0x90] sm:$0xff] }
  0xc6   :  { %771 = vmatpush.msra.mxu0 %v8365_v58  ;;  %v2178_v63 = vadd.f32 %v2046_v20, %v2045_v62  ;;  %v1925_v32 = vsub.f32 %v4776_v55, %v5727_v4  ;;  %820 = vmatpush.msra.mxu1 %v5372_v14  ;;  %v5761_v58 = vmul.f32 %v5563_v54, %v5542_v41  ;;  %v8372_v62 = vld [vmem:[#allocation21_spill] sm:$0xff] }
  0xc7   :  { %2176 = vadd.xlane.f32.xlu2 %v2175_v26  ;;  %v4775_v26 = vld [vmem:[#allocation2 + $0xa8] sm:$0xff]  ;;  %871 = vmatpush.msra.mxu2 %v8369_v35  ;;  %v1926_v20 = vsub.f32 %v4777_v47, %v5727_v4  ;;  %v2184_v13 = vadd.f32 %v2050_v50, %v2049_v17  ;;  %v2181_v45 = vadd.f32 %v2048_v1, %v2047_v53  ;;  %v8376_v17 = vld [vmem:[#allocation26_spill] sm:$0xff]  ;;  %v4778_v50 = vld [vmem:[#allocation2 + $0xb0] sm:$0xff] }
  0xc8   :  { %2173 = vadd.xlane.f32.xlu1 %v2172_v11  ;;  %v1928_v30 = vsub.f32 %v4775_v26, %v5723_v0  ;;  %v5757_v11 = vmul.f32 %v5563_v54, %v5540_v31  ;;  %8371 = vst [vmem:[#allocation24_spill] sm:$0xff] %v5761_v58  ;;  %930 = vmatpush.msra.mxu3 %v8372_v62  ;;  %v8373_v31 = vld [vmem:[#allocation25_spill] sm:$0xff]  ;;  %v4811_v0 = vld [vmem:[#allocation2 + $0x1c8] sm:$0xff] }
  0xc9   :  { %2170 = vadd.xlane.f32.xlu0 %v2169_v23  ;;  %v5747_v23 = vmul.f32 %v5563_v54, %v5531_v27  ;;  %774 = vmatpush.msra.mxu0 %v5418_v49  ;;  %v2051_v26 = vmul.f32 %v1923_v39, %v1923_v39  ;;  %v8374_v55 = vand.u32 4294901760, %v8373_v31  ;;  %v2052_v41 = vmul.f32 %v1924_v43, %v1924_v43  ;;  %v4779_v43 = vld [vmem:[#allocation2 + $0xb8] sm:$0xff] }
  0xca   :  { %v5749_v8 = vpop.xlane.xlu2 %1723  ;;  %8370 = vst [vmem:[#allocation17_spill] sm:$0xff] %v5757_v11  ;;  %822 = vmatpush.msra.mxu1 %v8372_v62  ;;  %v2055_v35 = vmul.f32 %v1927_v61, %v1927_v61  ;;  %v2056_v29 = vmul.f32 %v1928_v30, %v1928_v30  ;;  %932 = vmatpush.msra.mxu3 %v5392_v28  ;;  %v8377_v39 = vand.u32 4294901760, %v8376_v17  ;;  %v4780_v30 = vld [vmem:[#allocation2 + $0xd0] sm:$0xff]  ;;  %v4781_v62 = vld [vmem:[#allocation2 + $0xd8] sm:$0xff] }
  0xcb   :  { %8368 = vst [vmem:[#allocation18_spill] sm:$0xff] %v5747_v23  ;;  %v5768_v14 = vpop.xlane.xlu1 %1720  ;;  %875 = vmatpush.msra.mxu2 %v8374_v55  ;;  %777 = vmatpush.msra.mxu0 %v8373_v31  ;;  %v5777_v49 = vmul.f32 %v5563_v54, %v5594_v10  ;;  %v2053_v47 = vmul.f32 %v1925_v32, %v1925_v32  ;;  %v4813_v4 = vld [vmem:[#allocation2 + $0x1d8] sm:$0xff] }
  0xcc   :  { %v5763_v27 = vpop.xlane.xlu0 %1717  ;;  %824 = vmatpush.msra.mxu1 %v5392_v28  ;;  %v1929_v53 = vsub.f32 %v4778_v50, %v5736_v52  ;;  %v2054_v1 = vmul.f32 %v1926_v20, %v1926_v20  ;;  %934 = vmatpush.msra.mxu3 %v5415_v12  ;;  %v1930_v61 = vsub.f32 %v4779_v43, %v5736_v52  ;;  %v4783_v50 = vld [vmem:[#allocation2 + $0xe8] sm:$0xff] }
  0xcd   :  { %8375 = vst [vmem:[#allocation21_spill] sm:$0xff] %v5777_v49  ;;  %879 = vmatpush.msra.mxu2 %v8377_v39  ;;  %v1933_v10 = vsub.f32 %v4780_v30, %v5757_v11  ;;  %v5788_v32 = vmul.f32 %v5563_v54, %v5602_v5  ;;  %v5792_v28 = vmul.f32 %v5563_v54, %v5604_v2  ;;  %v8381_v2 = vand.u32 4294901760, %v5470_v56 }
  0xce   :  { %v1934_v20 = vsub.f32 %v4781_v62, %v5757_v11  ;;  %v2187_v31 = vadd.f32 %v2052_v41, %v2051_v26  ;;  %v2193_v55 = vadd.f32 %v2056_v29, %v2055_v35  ;;  %780 = vmatpush.msra.mxu0 %v8376_v17  ;;  %826 = vmatpush.msra.mxu1 %v5415_v12  ;;  %v4784_v17 = vld [vmem:[#allocation2 + $0xc0] sm:$0xff]  ;;  %v8382_v62 = vand.u32 4294901760, %v5475_v36 }
  0xcf   :  { %2185 = vadd.xlane.f32.xlu2 %v2184_v13  ;;  %8378 = vst [vmem:[#allocation25_spill] sm:$0xff] %v5788_v32  ;;  %v5797_v13 = vmul.f32 %v5563_v54, %v5654_v21  ;;  %883 = vmatpush.msra.mxu2 %v8381_v2  ;;  %v1936_v21 = vsub.f32 %v4783_v50, %v5747_v23  ;;  %v8383_v2 = vld [vmem:[#allocation28_spill] sm:$0xff] }
  0xd0   :  { %8379 = vst [vmem:[#allocation26_spill] sm:$0xff] %v5792_v28  ;;  %2182 = vadd.xlane.f32.xlu1 %v2181_v45  ;;  %936 = vmatpush.msra.mxu3 %v5424_v6  ;;  %v4782_v45 = vld [vmem:[#allocation2 + $0xe0] sm:$0xff]  ;;  %v2190_v29 = vadd.f32 %v2054_v1, %v2053_v47  ;;  %v2058_v41 = vmul.f32 %v1930_v61, %v1930_v61 }
  0xd1   :  { %2179 = vadd.xlane.f32.xlu0 %v2178_v63  ;;  %8380 = vst [vmem:[#allocation43_spill] sm:$0xff] %v5797_v13  ;;  %v2057_v63 = vmul.f32 %v1929_v53, %v1929_v53  ;;  %v1935_v39 = vsub.f32 %v4782_v45, %v5747_v23  ;;  %v2061_v35 = vmul.f32 %v1933_v10, %v1933_v10  ;;  %v4785_v53 = vld [vmem:[#allocation2 + $0xc8] sm:$0xff]  ;;  %v8386_v10 = vld [vmem:[#allocation30_spill] sm:$0xff]  ;;  %v8388_v45 = vld [vmem:[#allocation29_spill] sm:$0xff] }
  0xd2   :  { %v5801_v5 = vpop.xlane.xlu2 %1732  ;;  %783 = vmatpush.msra.mxu0 %v5470_v56  ;;  %828 = vmatpush.msra.mxu1 %v5424_v6  ;;  %v2062_v12 = vmul.f32 %v1934_v20, %v1934_v20  ;;  %v1931_v43 = vsub.f32 %v4784_v17, %v5761_v58  ;;  %v1932_v30 = vsub.f32 %v4785_v53, %v5761_v58  ;;  %v4786_v6 = vld [vmem:[#allocation2 + $0x100] sm:$0xff]  ;;  %v8387_v20 = vand.u32 4294901760, %v8386_v10  ;;  %v4787_v17 = vld [vmem:[#allocation2 + $0x108] sm:$0xff]  ;;  %v240_v58 = vld [vmem:[#allocation7 + $0x110] sm:$0xff] }
  0xd3   :  { %887 = vmatpush.msra.mxu2 %v8382_v62  ;;  %938 = vmatpush.msra.mxu3 %v8383_v2  ;;  %v5819_v47 = vmul.f32 %v5563_v54, %v5663_v19  ;;  %v5823_v56 = vmul.f32 %v5563_v54, %v5665_v48  ;;  %v1939_v1 = vsub.f32 %v4786_v6, %v5788_v32  ;;  %v5828_v61 = vpop.xlane.xlu1 %1729 }
  0xd4   :  { %v5808_v26 = vpop.xlane.xlu0 %1726  ;;  %786 = vmatpush.msra.mxu0 %v5475_v36  ;;  %830 = vmatpush.msra.mxu1 %v8383_v2  ;;  %v2063_v19 = vmul.f32 %v1935_v39, %v1935_v39  ;;  %v2064_v50 = vmul.f32 %v1936_v21, %v1936_v21  ;;  %v1940_v48 = vsub.f32 %v4787_v17, %v5788_v32  ;;  %v4788_v36 = vld [vmem:[#allocation2 + $0x110] sm:$0xff]  ;;  %v4789_v2 = vld [vmem:[#allocation2 + $0x118] sm:$0xff] }
  0xd5   :  { %8384 = vst [vmem:[#allocation28_spill] sm:$0xff] %v5819_v47  ;;  %891 = vmatpush.msra.mxu2 %v8387_v20  ;;  %940 = vmatpush.msra.mxu3 %v8388_v45  ;;  %v2196_v53 = vadd.f32 %v2058_v41, %v2057_v63  ;;  %v1941_v62 = vsub.f32 %v4788_v36, %v5777_v49  ;;  %v4790_v21 = vld [vmem:[#allocation2 + $0x130] sm:$0xff] }
  0xd6   :  { %8385 = vst [vmem:[#allocation44_spill] sm:$0xff] %v5823_v56  ;;  %789 = vmatpush.msra.mxu0 %v8386_v10  ;;  %v1942_v6 = vsub.f32 %v4789_v2, %v5777_v49  ;;  %v2202_v20 = vadd.f32 %v2062_v12, %v2061_v35  ;;  %v2059_v11 = vmul.f32 %v1931_v43, %v1931_v43  ;;  %v4791_v10 = vld [vmem:[#allocation2 + $0x138] sm:$0xff] }
  0xd7   :  { %2194 = vadd.xlane.f32.xlu2 %v2193_v55  ;;  %v2060_v52 = vmul.f32 %v1932_v30, %v1932_v30  ;;  %v5839_v39 = vmul.f32 %v5563_v54, %v5699_v16  ;;  %832 = vmatpush.msra.mxu1 %v8388_v45  ;;  %v8390_v55 = vld [vmem:[#allocation31_spill] sm:$0xff]  ;;  %v1945_v41 = vsub.f32 %v4790_v21, %v5819_v47  ;;  %v8393_v45 = vand.u32 4294901760, %v5524_v24  ;;  %v248_v49 = vld [vmem:[#allocation7 + $0x150] sm:$0xff] }
  0xd8   :  { %2191 = vadd.xlane.f32.xlu1 %v2190_v29  ;;  %v8391_v63 = vand.u32 4294901760, %v8390_v55  ;;  %v1946_v17 = vsub.f32 %v4791_v10, %v5819_v47  ;;  %942 = vmatpush.msra.mxu3 %v5472_v38  ;;  %v5850_v16 = vadd.f32 %v2064_v50, %v2063_v19  ;;  %v2067_v35 = vmul.f32 %v1939_v1, %v1939_v1  ;;  %v4792_v19 = vld [vmem:[#allocation2 + $0xf0] sm:$0xff]  ;;  %v4793_v50 = vld [vmem:[#allocation2 + $0xf8] sm:$0xff] }
  0xd9   :  { %2188 = vadd.xlane.f32.xlu0 %v2187_v31  ;;  %8389 = vst [vmem:[#allocation30_spill] sm:$0xff] %v5839_v39  ;;  %v268_v31 = vld [vmem:[#allocation7 + $0x1f0] sm:$0xff]  ;;  %792 = vmatpush.msra.mxu0 %v8390_v55  ;;  %v2068_v12 = vmul.f32 %v1940_v48, %v1940_v48  ;;  %v5854_v43 = vmul.f32 %v5563_v54, %v5708_v34 }
  0xda   :  { %895 = vmatpush.msra.mxu2 %v8391_v63  ;;  %v5846_v29 = vpop.xlane.xlu2 %1741  ;;  %834 = vmatpush.msra.mxu1 %v5472_v38  ;;  %v2069_v36 = vmul.f32 %v1941_v62, %v1941_v62  ;;  %v2070_v2 = vmul.f32 %v1942_v6, %v1942_v6  ;;  %v2199_v63 = vadd.f32 %v2060_v52, %v2059_v11  ;;  %v5865_v34 = vand.u32 4294901760, %v268_v31  ;;  %v264_v55 = vld [vmem:[#allocation7 + $0x1d0] sm:$0xff]  ;;  %v4794_v11 = vld [vmem:[#allocation2 + $0x140] sm:$0xff] }
  0xdb   :  { %8392 = vst [vmem:[#allocation29_spill] sm:$0xff] %v5854_v43  ;;  %944 = vmatpush.msra.mxu3 %v5480_v22  ;;  %v1937_v1 = vsub.f32 %v4792_v19, %v5792_v28  ;;  %v1938_v48 = vsub.f32 %v4793_v50, %v5792_v28  ;;  %795 = vmatpush.msra.mxu0 %v5524_v24  ;;  %v8394_v38 = vld [vmem:[#allocation33_spill] sm:$0xff]  ;;  %v8397_v24 = vld [vmem:[#allocation32_spill] sm:$0xff] }
  0xdc   :  { %v5856_v30 = vpop.xlane.xlu0 %1735  ;;  %899 = vmatpush.msra.mxu2 %v8393_v45  ;;  %836 = vmatpush.msra.mxu1 %v5480_v22  ;;  %v8395_v21 = vand.u32 4294901760, %v8394_v38  ;;  %v2073_v62 = vmul.f32 %v1945_v41, %v1945_v41  ;;  %v2074_v52 = vmul.f32 %v1946_v17, %v1946_v17  ;;  %v1947_v6 = vsub.f32 %v4794_v11, %v5797_v13  ;;  %v4795_v19 = vld [vmem:[#allocation2 + $0x148] sm:$0xff]  ;;  %v260_v50 = vld [vmem:[#allocation7 + $0x1b0] sm:$0xff]  ;;  %v4796_v17 = vld [vmem:[#allocation2 + $0x160] sm:$0xff]  ;;  %v5887_v11 = vpop.xlane.xlu1 %1738 }
  0xdd   :  { %v5873_v10 = vmul.f32 %v5563_v54, %v5710_v40  ;;  %v5875_v45 = vadd.f32 %v2068_v12, %v2067_v35  ;;  %946 = vmatpush.msra.mxu3 %v8397_v24  ;;  %658 = vmatmul.f32.vlgmr.msrb.gmra.mxu2 %v5684_v7  ;;  %v1948_v22 = vsub.f32 %v4795_v19, %v5797_v13  ;;  %v4797_v40 = vld [vmem:[#allocation2 + $0x168] sm:$0xff]  ;;  %v5885_v12 = vand.u32 4294901760, %v264_v55 }
  0xde   :  { %903 = vmatpush.msra.mxu2 %v8395_v21  ;;  %798 = vmatpush.msra.mxu0 %v8394_v38  ;;  %v5881_v41 = vadd.f32 %v2070_v2, %v2069_v36  ;;  %v1951_v21 = vsub.f32 %v4796_v17, %v5854_v43  ;;  %v1952_v35 = vsub.f32 %v4797_v40, %v5854_v43  ;;  %v8399_v2 = vand.u32 4294901760, %v5575_v9  ;;  %v4800_v43 = vld [vmem:[#allocation2 + $0x128] sm:$0xff] }
  0xdf   :  { %8396 = vst [vmem:[#allocation31_spill] sm:$0xff] %v5873_v10  ;;  %2203 = vadd.xlane.f32.xlu2 %v2202_v20  ;;  %v2065_v32 = vmul.f32 %v1937_v1, %v1937_v1  ;;  %v2066_v19 = vmul.f32 %v1938_v48, %v1938_v48  ;;  %v5890_v20 = vsub.f32 %v268_v31, %v5865_v34  ;;  %v5901_v40 = vand.u32 4294901760, %v260_v50  ;;  %v4798_v1 = vld [vmem:[#allocation2 + $0x170] sm:$0xff] }
  0xe0   :  { %2200 = vadd.xlane.f32.xlu1 %v2199_v63  ;;  %v5894_v36 = vmul.f32 %v5563_v54, %v5749_v8  ;;  %838 = vmatpush.msra.mxu1 %v8397_v24  ;;  %v5899_v38 = vadd.f32 %v2074_v52, %v2073_v62  ;;  %v2075_v17 = vmul.f32 %v1947_v6, %v1947_v6  ;;  %v256_v63 = vld [vmem:[#allocation7 + $0x190] sm:$0xff] }
  0xe1   :  { %2197 = vadd.xlane.f32.xlu0 %v2196_v53  ;;  %907 = vmatpush.msra.mxu2 %v8399_v2  ;;  %v5905_v53 = vmul.f32 %v5563_v54, %v5768_v14  ;;  %v2076_v8 = vmul.f32 %v1948_v22, %v1948_v22  ;;  %v1953_v48 = vsub.f32 %v4798_v1, %v5839_v39  ;;  %v8401_v22 = vand.u32 4294901760, %v5578_v33  ;;  %v4799_v2 = vld [vmem:[#allocation2 + $0x120] sm:$0xff] }
  0xe2   :  { %8398 = vst [vmem:[#allocation33_spill] sm:$0xff] %v5894_v36  ;;  %v5907_v31 = vpop.xlane.xlu2 %1750  ;;  %948 = vmatpush.msra.mxu3 %v5528_v46  ;;  %580 = vmatmul.f32.vlgmr.msrb.gmra.mxu0 %v5600_v44  ;;  %v2079_v52 = vmul.f32 %v1951_v21, %v1951_v21  ;;  %v2080_v14 = vmul.f32 %v1952_v35, %v1952_v35 }
  0xe3   :  { %8400 = vst [vmem:[#allocation32_spill] sm:$0xff] %v5905_v53  ;;  %759 = vmatmul.f32.vlgmr.msrb.gmra.mxu3 %v5600_v44  ;;  %801 = vmatpush.msra.mxu0 %v5575_v9  ;;  %v5917_v6 = vsub.f32 %v264_v55, %v5885_v12  ;;  %v2208_v24 = vadd.f32 %v2066_v19, %v2065_v32  ;;  %v252_v9 = vld [vmem:[#allocation7 + $0x170] sm:$0xff] }
  0xe4   :  { %v5912_v62 = vpop.xlane.xlu0 %1744  ;;  %840 = vmatpush.msra.mxu1 %v5528_v46  ;;  %911 = vmatpush.msra.mxu2 %v8401_v22  ;;  %v1943_v1 = vsub.f32 %v4799_v2, %v5823_v56  ;;  %v1944_v13 = vsub.f32 %v4800_v43, %v5823_v56  ;;  %v5927_v21 = vmul.f32 %v5563_v54, %v5763_v27  ;;  %v5931_v46 = vand.u32 4294901760, %v256_v63  ;;  %v4801_v55 = vld [vmem:[#allocation2 + $0x178] sm:$0xff]  ;;  %v4802_v27 = vld [vmem:[#allocation2 + $0x190] sm:$0xff] }
  0xe5   :  { %950 = vmatpush.msra.mxu3 %v5553_v37  ;;  %617 = vmatmul.f32.vlgmr.msrb.gmra.mxu1 %v5600_v44  ;;  %v5934_v32 = vsub.f32 %v260_v50, %v5901_v40  ;;  %v1954_v35 = vsub.f32 %v4801_v55, %v5839_v39  ;;  %v5939_v43 = vadd.f32 %v2076_v8, %v2075_v17  ;;  %v4803_v22 = vld [vmem:[#allocation2 + $0x198] sm:$0xff]  ;;  %v8404_v50 = vand.u32 4294901760, %v5598_v3 }
  0xe6   :  { %8402 = vst [vmem:[#allocation45_spill] sm:$0xff] %v5927_v21  ;;  %804 = vmatpush.msra.mxu0 %v5578_v33  ;;  %842 = vmatpush.msra.mxu1 %v5553_v37  ;;  %v1957_v19 = vsub.f32 %v4802_v27, %v5905_v53  ;;  %v1958_v2 = vsub.f32 %v4803_v22, %v5905_v53  ;;  %v8211_v33 = vand.u32 4294901760, %v5917_v6  ;;  %v5949_v37 = vand.u32 4294901760, %v252_v9  ;;  %v4806_v39 = vld [vmem:[#allocation2 + $0x158] sm:$0xff] }
  0xe7   :  { %8403 = vst [vmem:[#allocation46_spill] sm:$0xff] %v5931_v46  ;;  %2212 = vadd.xlane.f32.xlu2 %v5875_v45  ;;  %915 = vmatpush.msra.mxu2 %v8404_v50  ;;  %v5946_v56 = vadd.f32 %v2080_v14, %v2079_v52  ;;  %v2081_v55 = vmul.f32 %v1953_v48, %v1953_v48  ;;  %v8406_v27 = vand.u32 4294901760, %v5890_v20  ;;  %v5961_v14 = vand.u32 4294901760, %v248_v49 }
  0xe8   :  { %8405 = vst [vmem:[#allocation47_spill] sm:$0xff] %v5949_v37  ;;  %2209 = vadd.xlane.f32.xlu1 %v2208_v24  ;;  %v2071_v17 = vmul.f32 %v1943_v1, %v1943_v1  ;;  %v2072_v8 = vmul.f32 %v1944_v13, %v1944_v13  ;;  %952 = vmatpush.msra.mxu3 %v5558_v25  ;;  %v5967_v13 = vpop.xlane.xlu1 %1747 }
  0xe9   :  { %2206 = vadd.xlane.f32.xlu0 %v5850_v16  ;;  %v1006_v22 = vsub.f32 %v5890_v20, %v8406_v27  ;;  %807 = vmatpush.msra.mxu0 %v5598_v3  ;;  %v2082_v52 = vmul.f32 %v1954_v35, %v1954_v35  ;;  %v5959_v48 = vsub.f32 %v256_v63, %v5931_v46  ;;  %v8409_v3 = vand.u32 4294901760, %v5628_v15  ;;  %v244_v63 = vld [vmem:[#allocation7 + $0x130] sm:$0xff]  ;;  %v4804_v27 = vld [vmem:[#allocation2 + $0x1a0] sm:$0xff] }
  0xea   :  { %8407 = vst [vmem:[#allocation48_spill] sm:$0xff] %v5961_v14  ;;  %v5965_v16 = vmul.f32 %v5563_v54, %v5801_v5  ;;  %v5969_v24 = vpop.xlane.xlu2 %1759  ;;  %844 = vmatpush.msra.mxu1 %v5558_v25  ;;  %v5974_v1 = vmul.f32 %v1957_v19, %v1957_v19  ;;  %v5976_v35 = vmul.f32 %v1958_v2, %v1958_v2  ;;  %v4805_v2 = vld [vmem:[#allocation2 + $0x150] sm:$0xff] }
  0xeb   :  { %919 = vmatpush.msra.mxu2 %v8409_v3  ;;  %954 = vmatpush.msra.mxu3 %v5567_v60  ;;  %v1012_v5 = vsub.f32 %v5917_v6, %v8211_v33  ;;  %v5986_v25 = vsub.f32 %v252_v9, %v5949_v37  ;;  %v1959_v19 = vsub.f32 %v4804_v27, %v5894_v36  ;;  %v1007_v28 = vand.u32 4294901760, %v1006_v22  ;;  %v236_v27 = vld [vmem:[#allocation7 + $0xf0] sm:$0xff] }
  0xec   :  { %8408 = vst [vmem:[#allocation49_spill] sm:$0xff] %v5965_v16  ;;  %v5978_v50 = vpop.xlane.xlu0 %1753  ;;  %921 = vmatmul.f32.vlgmr.msra.gmra.mxu2 %v5600_v44  ;;  %v2217_v3 = vadd.f32 %v2072_v8, %v2071_v17  ;;  %810 = vmatpush.msra.mxu0 %v5628_v15  ;;  %v1949_v45 = vsub.f32 %v4805_v2, %v5873_v10  ;;  %v8410_v9 = vand.u32 4294901760, %v5934_v32  ;;  %v5999_v8 = vand.u32 4294901760, %v244_v63 }
  0xed   :  { %846 = vmatpush.msra.mxu1 %v5567_v60  ;;  %v1950_v53 = vsub.f32 %v4806_v39, %v5873_v10  ;;  %956 = vmatpush.msra.mxu3 %v5592_v42  ;;  %v6002_v60 = vsub.f32 %v248_v49, %v5961_v14  ;;  %v6006_v39 = vmul.f32 %v5563_v54, %v5828_v61  ;;  %v1013_v49 = vand.u32 4294901760, %v1012_v5  ;;  %v4807_v61 = vld [vmem:[#allocation2 + $0x1a8] sm:$0xff] }
  0xee   :  { %813 = vmatmul.f32.vlgmr.msra.gmra.mxu0 %v5625_v18  ;;  %v1018_v17 = vsub.f32 %v5934_v32, %v8410_v9  ;;  %8411 = vst [vmem:[#allocation50_spill] sm:$0xff] %v5999_v8  ;;  %v6010_v22 = vmul.f32 %v5563_v54, %v5808_v26  ;;  %958 = vmatmul.f32.vlgmr.msra.gmra.mxu3 %v5600_v44  ;;  %v6019_v33 = vand.u32 4294901760, %v240_v58  ;;  %v8415_v5 = vand.u32 4294901760, %v5959_v48  ;;  %v220_v44 = vld [vmem:[#allocation7 + $0x70] sm:$0xff]  ;;  %v4818_v18 = vld [vmem:[#allocation2 + $0x1e0] sm:$0xff] }
  0xef   :  { %8412 = vst [vmem:[#allocation51_spill] sm:$0xff] %v6002_v60  ;;  %848 = vmatpush.msra.mxu1 %v5592_v42  ;;  %v6014_v2 = vadd.f32 %v2082_v52, %v2081_v55  ;;  %2221 = vadd.xlane.f32.xlu2 %v5899_v38  ;;  %v1960_v15 = vsub.f32 %v4807_v61, %v5894_v36  ;;  %v6025_v55 = vand.u32 4294901760, %v236_v27  ;;  %v232_v38 = vld [vmem:[#allocation7 + $0xd0] sm:$0xff] }
  0xf0   :  { %8413 = vst [vmem:[#allocation52_spill] sm:$0xff] %v6006_v39  ;;  %852 = vmatmul.f32.vlgmr.msra.gmra.mxu1 %v5642_v59  ;;  %2218 = vadd.xlane.f32.xlu1 %v2217_v3  ;;  %v2077_v26 = vmul.f32 %v1949_v45, %v1949_v45  ;;  %v2078_v10 = vmul.f32 %v1950_v53, %v1950_v53  ;;  %v1019_v52 = vand.u32 4294901760, %v1018_v17  ;;  %v4808_v53 = vld [vmem:[#allocation2 + $0x180] sm:$0xff]  ;;  %v4809_v3 = vld [vmem:[#allocation2 + $0x188] sm:$0xff]  ;;  %v6054_v47 = vpop.xlane.xlu1 %1756 }
  0xf1   :  { %8414 = vst [vmem:[#allocation53_spill] sm:$0xff] %v6010_v22  ;;  %2215 = vadd.xlane.f32.xlu0 %v5881_v41  ;;  %v6023_v42 = vmul.f32 %v1959_v19, %v1959_v19  ;;  %963 = vmatpush.msrb.mxu0 %v5865_v34  ;;  %v1024_v9 = vsub.f32 %v5959_v48, %v8415_v5  ;;  %v228_v5 = vld [vmem:[#allocation7 + $0xb0] sm:$0xff] }
  0xf2   :  { %1008 = vmatpush.msrb.mxu1 %v1007_v28  ;;  %v6033_v41 = vsub.f32 %v244_v63, %v5999_v8  ;;  %v6035_v45 = vpop.xlane.xlu2 %1768  ;;  %v1955_v19 = vsub.f32 %v4808_v53, %v5927_v21  ;;  %v1956_v36 = vsub.f32 %v4809_v3, %v5927_v21  ;;  %1106 = vmatpush.msrb.mxu2 %v5890_v20  ;;  %v4810_v28 = vld [vmem:[#allocation2 + $0x1c0] sm:$0xff]  ;;  %v8416_v63 = vand.u32 4294901760, %v5986_v25 }
  0xf3   :  { %1159 = vmatpush.msrb.mxu3 %v5865_v34  ;;  %v1963_v17 = vsub.f32 %v4810_v28, %v6006_v39  ;;  %965 = vmatpush.msrb.mxu0 %v5885_v12  ;;  %v1964_v3 = vsub.f32 %v4811_v0, %v6006_v39  ;;  %v6050_v57 = vsub.f32 %v240_v58, %v6019_v33  ;;  %v6052_v21 = vand.u32 4294901760, %v232_v38 }
  0xf4   :  { %v6042_v61 = vpop.xlane.xlu0 %1762  ;;  %1014 = vmatpush.msrb.mxu1 %v1013_v49  ;;  %v1030_v53 = vsub.f32 %v5986_v25, %v8416_v63  ;;  %v2226_v28 = vadd.f32 %v2078_v10, %v2077_v26  ;;  %1109 = vmatpush.msrb.mxu2 %v5917_v6  ;;  %v2088_v23 = vmul.f32 %v1960_v15, %v1960_v15  ;;  %v224_v63 = vld [vmem:[#allocation7 + $0x90] sm:$0xff]  ;;  %v1025_v0 = vand.u32 4294901760, %v1024_v9 }
  0xf5   :  { %1161 = vmatpush.msrb.mxu3 %v5885_v12  ;;  %v6059_v49 = vsub.f32 %v236_v27, %v6025_v55  ;;  %967 = vmatpush.msrb.mxu0 %v5901_v40  ;;  %v8417_v58 = vand.u32 4294901760, %v6002_v60  ;;  %v6066_v10 = vand.u32 4294901760, %v228_v5  ;;  %v2083_v26 = vmul.f32 %v1955_v19, %v1955_v19  ;;  %v4812_v27 = vld [vmem:[#allocation2 + $0x1d0] sm:$0xff] }
  0xf6   :  { %1020 = vmatpush.msrb.mxu1 %v1019_v52  ;;  %v2084_v15 = vmul.f32 %v1956_v36, %v1956_v36  ;;  %1112 = vmatpush.msrb.mxu2 %v5934_v32  ;;  %v1965_v51 = vsub.f32 %v4812_v27, %v5965_v16  ;;  %v1031_v9 = vand.u32 4294901760, %v1030_v53  ;;  %v6077_v19 = vand.u32 4294901760, %v224_v63 }
  0xf7   :  { %v1036_v39 = vsub.f32 %v6002_v60, %v8417_v58  ;;  %1163 = vmatpush.msrb.mxu3 %v5901_v40  ;;  %2230 = vadd.xlane.f32.xlu2 %v5946_v56  ;;  %v6075_v58 = vsub.f32 %v232_v38, %v6052_v21  ;;  %v2238_v36 = vadd.f32 %v5976_v35, %v5974_v1  ;;  %v8418_v52 = vand.u32 4294901760, %v6033_v41 }
  0xf8   :  { %969 = vmatpush.msrb.mxu0 %v5931_v46  ;;  %2227 = vadd.xlane.f32.xlu1 %v2226_v28  ;;  %v6082_v27 = vmul.f32 %v1963_v17, %v1963_v17  ;;  %v1966_v53 = vsub.f32 %v4813_v4, %v5965_v16  ;;  %v6093_v28 = vand.u32 4294901760, %v220_v44  ;;  %v6098_v35 = vadd.f32 %v2088_v23, %v6023_v42 }
  0xf9   :  { %2224 = vadd.xlane.f32.xlu0 %v5939_v43  ;;  %1026 = vmatpush.msrb.mxu1 %v1025_v0  ;;  %v1037_v38 = vand.u32 4294901760, %v1036_v39  ;;  %v1042_v7 = vsub.f32 %v6033_v41, %v8418_v52  ;;  %v6091_v43 = vsub.f32 %v228_v5, %v6066_v10  ;;  %v2092_v17 = vmul.f32 %v1964_v3, %v1964_v3  ;;  %v216_v39 = vld [vmem:[#allocation7 + $0x50] sm:$0xff] }
  0xfa   :  { %971 = vmatpush.msrb.mxu0 %v5949_v37  ;;  %v6095_v1 = vpop.xlane.xlu2 %1777  ;;  %1115 = vmatpush.msrb.mxu2 %v5959_v48  ;;  %v2093_v4 = vmul.f32 %v1965_v51, %v1965_v51  ;;  %v2235_v52 = vadd.f32 %v2084_v15, %v2083_v26  ;;  %v8419_v5 = vand.u32 4294901760, %v6050_v57  ;;  %v6110_v42 = vsub.f32 %v224_v63, %v6077_v19  ;;  %v4814_v3 = vld [vmem:[#allocation2 + $0x1b0] sm:$0xff]  ;;  %v4815_v51 = vld [vmem:[#allocation2 + $0x1b8] sm:$0xff] }
  0xfb   :  { %1165 = vmatpush.msrb.mxu3 %v5931_v46  ;;  %1032 = vmatpush.msrb.mxu1 %v1031_v9  ;;  %v1961_v16 = vsub.f32 %v4814_v3, %v6010_v22  ;;  %v1962_v59 = vsub.f32 %v4815_v51, %v6010_v22  ;;  %v8420_v26 = vand.u32 4294901760, %v6059_v49  ;;  %v212_v9 = vld [vmem:[#allocation7 + $0x30] sm:$0xff]  ;;  %v1043_v63 = vand.u32 4294901760, %v1042_v7  ;;  %v6134_v22 = vpop.xlane.xlu1 %1765 }
  0xfc   :  { %v6102_v0 = vpop.xlane.xlu0 %1771  ;;  %973 = vmatpush.msrb.mxu0 %v5961_v14  ;;  %v1048_v56 = vsub.f32 %v6050_v57, %v8419_v5  ;;  %1118 = vmatpush.msrb.mxu2 %v5986_v25  ;;  %v6121_v23 = vand.u32 4294901760, %v216_v39  ;;  %v6124_v3 = vsub.f32 %v220_v44, %v6093_v28  ;;  %v6128_v51 = vmul.f32 %v5563_v54, %v5846_v29 }
  0xfd   :  { %v1054_v15 = vsub.f32 %v6059_v49, %v8420_v26  ;;  %1167 = vmatpush.msrb.mxu3 %v5949_v37  ;;  %1038 = vmatpush.msrb.mxu1 %v1037_v38  ;;  %v6132_v26 = vmul.f32 %v5563_v54, %v5887_v11  ;;  %v2094_v7 = vmul.f32 %v1966_v53, %v1966_v53  ;;  %v208_v38 = vld [vmem:[#allocation7 + $0x10] sm:$0xff]  ;;  %v8423_v5 = vand.u32 4294901760, %v6075_v58 }
  0xfe   :  { %975 = vmatpush.msrb.mxu0 %v5999_v8  ;;  %8421 = vst [vmem:[#allocation54_spill] sm:$0xff] %v6128_v51  ;;  %1121 = vmatpush.msrb.mxu2 %v6002_v60  ;;  %v1049_v44 = vand.u32 4294901760, %v1048_v56  ;;  %v6143_v11 = vand.u32 4294901760, %v212_v9  ;;  %v6147_v37 = vmul.f32 %v5563_v54, %v5856_v30  ;;  %v2089_v53 = vmul.f32 %v1961_v16, %v1961_v16 }
  0xff   :  { %8422 = vst [vmem:[#allocation55_spill] sm:$0xff] %v6132_v26  ;;  %1169 = vmatpush.msrb.mxu3 %v5961_v14  ;;  %2239 = vadd.xlane.f32.xlu2 %v2238_v36  ;;  %v1060_v29 = vsub.f32 %v6075_v58, %v8423_v5  ;;  %v2090_v36 = vmul.f32 %v1962_v59, %v1962_v59  ;;  %v1055_v14 = vand.u32 4294901760, %v1054_v15  ;;  %v8425_v56 = vand.u32 4294901760, %v6091_v43  ;;  %v4816_v59 = vld [vmem:[#allocation2 + $0x1f0] sm:$0xff] }
 0x100   :  { %977 = vmatpush.msrb.mxu0 %v6019_v33  ;;  %8424 = vst [vmem:[#allocation56_spill] sm:$0xff] %v6147_v37  ;;  %2236 = vadd.xlane.f32.xlu1 %v2235_v52  ;;  %v6156_v60 = vsub.f32 %v216_v39, %v6121_v23  ;;  %v6158_v30 = vand.u32 4294901760, %v208_v38  ;;  %v2247_v16 = vadd.f32 %v2092_v17, %v6082_v27  ;;  %v4817_v52 = vld [vmem:[#allocation2 + $0x1f8] sm:$0xff]  ;;  %v8427_v27 = vand.u32 4294901760, %v6110_v42 }
 0x101   :  { %2233 = vadd.xlane.f32.xlu0 %v6014_v2  ;;  %1044 = vmatpush.msrb.mxu1 %v1043_v63  ;;  %v1066_v5 = vsub.f32 %v6091_v43, %v8425_v56  ;;  %v1969_v2 = vsub.f32 %v4816_v59, %v6132_v26  ;;  %v1970_v15 = vsub.f32 %v4817_v52, %v6132_v26  ;;  %v1061_v39 = vand.u32 4294901760, %v1060_v29 }
 0x102   :  { %979 = vmatpush.msrb.mxu0 %v6025_v55  ;;  %v6160_v46 = vpop.xlane.xlu2 %1786  ;;  %1124 = vmatpush.msrb.mxu2 %v6033_v41  ;;  %v6170_v56 = vadd.f32 %v2094_v7, %v2093_v4  ;;  %v1072_v17 = vsub.f32 %v6110_v42, %v8427_v27  ;;  %v6176_v59 = vsub.f32 %v212_v9, %v6143_v11  ;;  %v8428_v7 = vand.u32 4294901760, %v6124_v3 }
 0x103   :  { %1171 = vmatpush.msrb.mxu3 %v5999_v8  ;;  %1050 = vmatpush.msrb.mxu1 %v1049_v44  ;;  %v2244_v52 = vadd.f32 %v2090_v36, %v2089_v53  ;;  %v1967_v26 = vsub.f32 %v4818_v18, %v6147_v37  ;;  %v4819_v8 = vld [vmem:[#allocation2 + $0x1e8] sm:$0xff]  ;;  %v1067_v4 = vand.u32 4294901760, %v1066_v5  ;;  %v6188_v29 = vsub.f32 %v208_v38, %v6158_v30  ;;  %v4820_v5 = vld [vmem:[#allocation2 + $0x200] sm:$0xff] }
 0x104   :  { %v6167_v63 = vpop.xlane.xlu0 %1780  ;;  %981 = vmatpush.msrb.mxu0 %v6052_v21  ;;  %1127 = vmatpush.msrb.mxu2 %v6050_v57  ;;  %v1078_v9 = vsub.f32 %v6124_v3, %v8428_v7  ;;  %v6192_v18 = vmul.f32 %v5563_v54, %v5967_v13  ;;  %v2098_v53 = vmul.f32 %v1970_v15, %v1970_v15  ;;  %v1073_v36 = vand.u32 4294901760, %v1072_v17  ;;  %v269_v13 = vld [vmem:[#allocation7 + $0x1f8] sm:$0xff]  ;;  %v6202_v7 = vpop.xlane.xlu1 %1774  ;;  %v4821_v44 = vld [vmem:[#allocation2 + $0x208] sm:$0xff] }
 0x105   :  { %8426 = vst [vmem:[#allocation57_spill] sm:$0xff] %v6167_v63  ;;  %v1968_v63 = vsub.f32 %v4819_v8, %v6147_v37  ;;  %1173 = vmatpush.msrb.mxu3 %v6019_v33  ;;  %1056 = vmatpush.msrb.mxu1 %v1055_v14  ;;  %v2097_v8 = vmul.f32 %v1969_v2, %v1969_v2  ;;  %v8432_v17 = vand.u32 4294901760, %v6156_v60 }
 0x106   :  { %983 = vmatpush.msrb.mxu0 %v6066_v10  ;;  %8429 = vst [vmem:[#allocation58_spill] sm:$0xff] %v6192_v18  ;;  %1130 = vmatpush.msrb.mxu2 %v6059_v49  ;;  %v6198_v14 = vmul.f32 %v5563_v54, %v5912_v62  ;;  %v1971_v27 = vsub.f32 %v4820_v5, %v6128_v51 }
 0x107   :  { %1175 = vmatpush.msrb.mxu3 %v6025_v55  ;;  %2248 = vadd.xlane.f32.xlu2 %v2247_v16  ;;  %v2095_v2 = vmul.f32 %v1967_v26, %v1967_v26  ;;  %v2096_v15 = vmul.f32 %v1968_v63, %v1968_v63  ;;  %v1972_v62 = vsub.f32 %v4821_v44, %v6128_v51  ;;  %v4822_v63 = vld [vmem:[#allocation2 + $0x220] sm:$0xff] }
 0x108   :  { %8430 = vst [vmem:[#allocation59_spill] sm:$0xff] %v6198_v14  ;;  %1062 = vmatpush.msrb.mxu1 %v1061_v39  ;;  %2245 = vadd.xlane.f32.xlu1 %v2244_v52  ;;  %v6208_v16 = vmul.f32 %v5563_v54, %v5907_v31  ;;  %v1079_v39 = vand.u32 4294901760, %v1078_v9  ;;  %v1084_v5 = vsub.f32 %v6156_v60, %v8432_v17  ;;  %v4823_v31 = vld [vmem:[#allocation2 + $0x228] sm:$0xff]  ;;  %v265_v9 = vld [vmem:[#allocation7 + $0x1d8] sm:$0xff]  ;;  %v4824_v17 = vld [vmem:[#allocation2 + $0x210] sm:$0xff] }
 0x109   :  { %2242 = vadd.xlane.f32.xlu0 %v6098_v35  ;;  %985 = vmatpush.msrb.mxu0 %v6077_v19  ;;  %v2256_v26 = vadd.f32 %v2098_v53, %v2097_v8  ;;  %v1975_v44 = vsub.f32 %v4822_v63, %v6192_v18  ;;  %v1976_v38 = vsub.f32 %v4823_v31, %v6192_v18  ;;  %v8435_v8 = vand.u32 4294901760, %v6176_v59  ;;  %v4825_v35 = vld [vmem:[#allocation2 + $0x218] sm:$0xff] }
 0x10a   :  { %8431 = vst [vmem:[#allocation60_spill] sm:$0xff] %v6208_v16  ;;  %1068 = vmatpush.msrb.mxu1 %v1067_v4  ;;  %v6215_v52 = vpop.xlane.xlu2 %1795  ;;  %1133 = vmatpush.msrb.mxu2 %v6075_v58  ;;  %v6221_v4 = vand.u32 4294901760, %v269_v13  ;;  %v1973_v63 = vsub.f32 %v4824_v17, %v6198_v14  ;;  %v1974_v31 = vsub.f32 %v4825_v35, %v6198_v14  ;;  %v8437_v17 = vand.u32 4294901760, %v6188_v29  ;;  %v257_v14 = vld [vmem:[#allocation7 + $0x198] sm:$0xff] }
 0x10b   :  { %8433 = vst [vmem:[#allocation61_spill] sm:$0xff] %v6215_v52  ;;  %1177 = vmatpush.msrb.mxu3 %v6052_v21  ;;  %987 = vmatpush.msrb.mxu0 %v6093_v28  ;;  %v1090_v53 = vsub.f32 %v6176_v59, %v8435_v8  ;;  %v2253_v37 = vadd.f32 %v2096_v15, %v2095_v2  ;;  %v1085_v8 = vand.u32 4294901760, %v1084_v5  ;;  %v6241_v35 = vand.u32 4294901760, %v265_v9 }
 0x10c   :  { %v6223_v51 = vpop.xlane.xlu0 %1789  ;;  %1074 = vmatpush.msrb.mxu1 %v1073_v36  ;;  %v2099_v18 = vmul.f32 %v1971_v27, %v1971_v27  ;;  %v2100_v52 = vmul.f32 %v1972_v62, %v1972_v62  ;;  %1136 = vmatpush.msrb.mxu2 %v6091_v43  ;;  %v6235_v36 = vmul.f32 %v5563_v54, %v5969_v24  ;;  %v261_v27 = vld [vmem:[#allocation7 + $0x1b8] sm:$0xff] }
 0x10d   :  { %8434 = vst [vmem:[#allocation62_spill] sm:$0xff] %v6223_v51  ;;  %1179 = vmatpush.msrb.mxu3 %v6066_v10  ;;  %989 = vmatpush.msrb.mxu0 %v6121_v23  ;;  %v1096_v51 = vsub.f32 %v6188_v29, %v8437_v17  ;;  %v2103_v2 = vmul.f32 %v1975_v44, %v1975_v44 }
 0x10e   :  { %8436 = vst [vmem:[#allocation63_spill] sm:$0xff] %v6235_v36  ;;  %1080 = vmatpush.msrb.mxu1 %v1079_v39  ;;  %v2104_v15 = vmul.f32 %v1976_v38, %v1976_v38  ;;  %1139 = vmatpush.msrb.mxu2 %v6110_v42  ;;  %v6246_v24 = vsub.f32 %v269_v13, %v6221_v4  ;;  %v1091_v39 = vand.u32 4294901760, %v1090_v53  ;;  %v6262_v13 = vand.u32 4294901760, %v261_v27 }
 0x10f   :  { %1181 = vmatpush.msrb.mxu3 %v6077_v19  ;;  %v6250_v62 = vmul.f32 %v5563_v54, %v6054_v47  ;;  %2257 = vadd.xlane.f32.xlu2 %v2256_v26  ;;  %v2101_v5 = vmul.f32 %v1973_v63, %v1973_v63  ;;  %v2102_v17 = vmul.f32 %v1974_v31, %v1974_v31  ;;  %v6285_v31 = vand.u32 4294901760, %v257_v14 }
 0x110   :  { %8438 = vst [vmem:[#allocation64_spill] sm:$0xff] %v6246_v24  ;;  %991 = vmatpush.msrb.mxu0 %v6143_v11  ;;  %v6255_v38 = vmul.f32 %v5563_v54, %v5978_v50  ;;  %v6259_v44 = vmul.f32 %v5563_v54, %v6035_v45  ;;  %2254 = vadd.xlane.f32.xlu1 %v2253_v37  ;;  %v1097_v50 = vand.u32 4294901760, %v1096_v51 }
 0x111   :  { %8439 = vst [vmem:[#allocation65_spill] sm:$0xff] %v6250_v62  ;;  %2251 = vadd.xlane.f32.xlu0 %v6170_v56  ;;  %v2259_v47 = vadd.f32 %v2100_v52, %v2099_v18  ;;  %v6266_v26 = vmul.f32 %v5563_v54, %v6134_v22  ;;  %v6270_v53 = vmul.f32 %v5563_v54, %v6042_v61  ;;  %v6276_v56 = vpop.xlane.xlu1 %1783  ;;  %v8446_v52 = vand.u32 4294901760, %v5890_v20  ;;  %v4826_v22 = vld [vmem:[#allocation2 + $0x230] sm:$0xff]  ;;  %v4827_v20 = vld [vmem:[#allocation2 + $0x238] sm:$0xff] }
 0x112   :  { %8440 = vst [vmem:[#allocation66_spill] sm:$0xff] %v6255_v38  ;;  %1086 = vmatpush.msrb.mxu1 %v1085_v8  ;;  %993 = vmatpush.msrb.mxu0 %v6158_v30  ;;  %v6274_v45 = vsub.f32 %v265_v9, %v6241_v35  ;;  %v6278_v37 = vpop.xlane.xlu2 %1804  ;;  %v2265_v18 = vadd.f32 %v2104_v15, %v2103_v2  ;;  %v253_v15 = vld [vmem:[#allocation7 + $0x178] sm:$0xff] }
 0x113   :  { %8441 = vst [vmem:[#allocation67_spill] sm:$0xff] %v6259_v44  ;;  %1142 = vmatpush.msrb.mxu2 %v6124_v3  ;;  %v1977_v61 = vsub.f32 %v4826_v22, %v6208_v16  ;;  %v6289_v51 = vmul.f32 %v5563_v54, %v6095_v1  ;;  %v2262_v8 = vadd.f32 %v2102_v17, %v2101_v5  ;;  %v4828_v22 = vld [vmem:[#allocation2 + $0x240] sm:$0xff]  ;;  %v4829_v1 = vld [vmem:[#allocation2 + $0x248] sm:$0xff]  ;;  %v4830_v17 = vld [vmem:[#allocation2 + $0x250] sm:$0xff] }
 0x114   :  { %8442 = vst [vmem:[#allocation68_spill] sm:$0xff] %v6266_v26  ;;  %1200 = vmatpush.msra.mxu0 %v8446_v52  ;;  %v6291_v9 = vpop.xlane.xlu0 %1798  ;;  %1092 = vmatpush.msrb.mxu1 %v1091_v39  ;;  %v1978_v2 = vsub.f32 %v4827_v20, %v6208_v16  ;;  %v8448_v52 = vand.u32 4294901760, %v5917_v6  ;;  %v1979_v63 = vsub.f32 %v4828_v22, %v6255_v38  ;;  %v4831_v20 = vld [vmem:[#allocation2 + $0x258] sm:$0xff]  ;;  %v4833_v16 = vld [vmem:[#allocation2 + $0x268] sm:$0xff] }
 0x115   :  { %8443 = vst [vmem:[#allocation69_spill] sm:$0xff] %v6270_v53  ;;  %1183 = vmatpush.msrb.mxu3 %v6093_v28  ;;  %1145 = vmatpush.msrb.mxu2 %v6156_v60  ;;  %v6301_v39 = vsub.f32 %v261_v27, %v6262_v13  ;;  %v6305_v5 = vmul.f32 %v5563_v54, %v6202_v7  ;;  %v8451_v7 = vand.u32 4294901760, %v5934_v32  ;;  %v8452_v27 = vand.u32 4294901760, %v6246_v24 }
 0x116   :  { %8444 = vst [vmem:[#allocation70_spill] sm:$0xff] %v6274_v45  ;;  %1204 = vmatpush.msra.mxu0 %v8448_v52  ;;  %1098 = vmatpush.msrb.mxu1 %v1097_v50  ;;  %v1981_v6 = vsub.f32 %v4830_v17, %v6250_v62  ;;  %v1982_v52 = vsub.f32 %v4831_v20, %v6250_v62  ;;  %v6321_v17 = vand.u32 4294901760, %v253_v15  ;;  %v249_v62 = vld [vmem:[#allocation7 + $0x158] sm:$0xff] }
 0x117   :  { %8445 = vst [vmem:[#allocation71_spill] sm:$0xff] %v6278_v37  ;;  %v1980_v37 = vsub.f32 %v4829_v1, %v6255_v38  ;;  %1185 = vmatpush.msrb.mxu3 %v6121_v23  ;;  %v6313_v1 = vmul.f32 %v5563_v54, %v6102_v0  ;;  %v1347_v50 = vsub.f32 %v6246_v24, %v8452_v27  ;;  %v4832_v0 = vld [vmem:[#allocation2 + $0x260] sm:$0xff] }
 0x118   :  { %8447 = vst [vmem:[#allocation72_spill] sm:$0xff] %v6289_v51  ;;  %1267 = vmatpush.msra.mxu1 %v5865_v34  ;;  %1208 = vmatpush.msra.mxu0 %v8451_v7  ;;  %v6324_v20 = vsub.f32 %v257_v14, %v6285_v31  ;;  %v2105_v22 = vmul.f32 %v1977_v61, %v1977_v61  ;;  %v8453_v14 = vand.u32 4294901760, %v5959_v48  ;;  %v245_v24 = vld [vmem:[#allocation7 + $0x138] sm:$0xff] }
 0x119   :  { %8449 = vst [vmem:[#allocation73_spill] sm:$0xff] %v6305_v5  ;;  %2266 = vadd.xlane.f32.xlu2 %v2265_v18  ;;  %v2106_v38 = vmul.f32 %v1978_v2, %v1978_v2  ;;  %1148 = vmatpush.msrb.mxu2 %v6176_v59  ;;  %v1983_v34 = vsub.f32 %v4832_v0, %v6235_v36  ;;  %v8454_v2 = vand.u32 4294901760, %v6274_v45 }
 0x11a   :  { %8450 = vst [vmem:[#allocation74_spill] sm:$0xff] %v6313_v1  ;;  %2260 = vadd.xlane.f32.xlu0 %v2259_v47  ;;  %2263 = vadd.xlane.f32.xlu1 %v2262_v8  ;;  %v2107_v32 = vmul.f32 %v1979_v63, %v1979_v63  ;;  %v2108_v7 = vmul.f32 %v1980_v37, %v1980_v37  ;;  %v6336_v47 = vpop.xlane.xlu2 %1813  ;;  %v6341_v63 = vand.u32 4294901760, %v249_v62  ;;  %v8458_v8 = vand.u32 4294901760, %v5986_v25 }
 0x11b   :  { %v1984_v27 = vsub.f32 %v4833_v16, %v6235_v36  ;;  %1269 = vmatpush.msra.mxu1 %v5885_v12  ;;  %1212 = vmatpush.msra.mxu0 %v8453_v14  ;;  %v2109_v18 = vmul.f32 %v1981_v6, %v1981_v6  ;;  %v2110_v61 = vmul.f32 %v1982_v52, %v1982_v52  ;;  %v1348_v16 = vand.u32 4294901760, %v1347_v50  ;;  %v4834_v6 = vld [vmem:[#allocation2 + $0x280] sm:$0xff]  ;;  %v4835_v14 = vld [vmem:[#allocation2 + $0x270] sm:$0xff]  ;;  %v6354_v36 = vpop.xlane.xlu1 %1792 }
 0x11c   :  { %v1353_v0 = vsub.f32 %v6274_v45, %v8454_v2  ;;  %8455 = vst [vmem:[#allocation75_spill] sm:$0xff] %v6336_v47  ;;  %1151 = vmatpush.msrb.mxu2 %v6188_v29  ;;  %1187 = vmatpush.msrb.mxu3 %v6143_v11  ;;  %v6344_v12 = vsub.f32 %v253_v15, %v6321_v17  ;;  %v6346_v48 = vpop.xlane.xlu0 %1807  ;;  %v4836_v2 = vld [vmem:[#allocation2 + $0x278] sm:$0xff]  ;;  %v4837_v45 = vld [vmem:[#allocation2 + $0x288] sm:$0xff] }
 0x11d   :  { %8457 = vst [vmem:[#allocation77_spill] sm:$0xff] %v6346_v48  ;;  %1271 = vmatpush.msra.mxu1 %v5901_v40  ;;  %1216 = vmatpush.msra.mxu0 %v8458_v8  ;;  %v1987_v52 = vsub.f32 %v4834_v6, %v6266_v26  ;;  %v1985_v50 = vsub.f32 %v4835_v14, %v6270_v53  ;;  %v8459_v40 = vand.u32 4294901760, %v6301_v39  ;;  %v8460_v6 = vld [vmem:[#allocation46_spill] sm:$0xff]  ;;  %v8461_v14 = vld [vmem:[#allocation51_spill] sm:$0xff] }
 0x11e   :  { %8456 = vst [vmem:[#allocation76_spill] sm:$0xff] %v6344_v12  ;;  %v1986_v37 = vsub.f32 %v4836_v2, %v6270_v53  ;;  %v2268_v15 = vadd.f32 %v2106_v38, %v2105_v22  ;;  %v2271_v47 = vadd.f32 %v2108_v7, %v2107_v32  ;;  %1304 = vmatpush.msra.mxu2 %v6221_v4  ;;  %v8462_v48 = vand.u32 4294901760, %v8461_v14  ;;  %v241_v22 = vld [vmem:[#allocation7 + $0x118] sm:$0xff] }
 0x11f   :  { %1189 = vmatpush.msrb.mxu3 %v6158_v30  ;;  %v1359_v25 = vsub.f32 %v6301_v39, %v8459_v40  ;;  %v2274_v8 = vadd.f32 %v2110_v61, %v2109_v18  ;;  %1273 = vmatpush.msra.mxu1 %v8460_v6  ;;  %v1354_v2 = vand.u32 4294901760, %v1353_v0  ;;  %v2111_v53 = vmul.f32 %v1983_v34, %v1983_v34  ;;  %v237_v0 = vld [vmem:[#allocation7 + $0xf8] sm:$0xff]  ;;  %v8464_v34 = vld [vmem:[#allocation47_spill] sm:$0xff] }
 0x120   :  { %1220 = vmatpush.msra.mxu0 %v8462_v48  ;;  %v1988_v38 = vsub.f32 %v4837_v45, %v6266_v26  ;;  %1306 = vmatpush.msra.mxu2 %v6241_v35  ;;  %v8463_v32 = vand.u32 4294901760, %v6324_v20  ;;  %v6370_v61 = vand.u32 4294901760, %v245_v24  ;;  %v6373_v40 = vsub.f32 %v249_v62, %v6341_v63  ;;  %v8467_v26 = vld [vmem:[#allocation48_spill] sm:$0xff] }
 0x121   :  { %1349 = vmatpush.msra.mxu3 %v1348_v16  ;;  %2275 = vadd.xlane.f32.xlu2 %v2274_v8  ;;  %v2112_v45 = vmul.f32 %v1984_v27, %v1984_v27  ;;  %v2113_v48 = vmul.f32 %v1985_v50, %v1985_v50  ;;  %v2114_v6 = vmul.f32 %v1986_v37, %v1986_v37  ;;  %v6380_v18 = vand.u32 4294901760, %v241_v22  ;;  %v4839_v37 = vld [vmem:[#allocation2 + $0x298] sm:$0xff] }
 0x122   :  { %v1365_v7 = vsub.f32 %v6324_v20, %v8463_v32  ;;  %1275 = vmatpush.msra.mxu1 %v8464_v34  ;;  %v6378_v16 = vmul.f32 %v5563_v54, %v6160_v46  ;;  %2269 = vadd.xlane.f32.xlu0 %v2268_v15  ;;  %v2115_v14 = vmul.f32 %v1987_v52, %v1987_v52  ;;  %v1360_v32 = vand.u32 4294901760, %v1359_v25  ;;  %v4838_v34 = vld [vmem:[#allocation2 + $0x290] sm:$0xff]  ;;  %v6389_v15 = vpop.xlane.xlu2 %1822 }
 0x123   :  { %2272 = vadd.xlane.f32.xlu1 %v2271_v47  ;;  %v8466_v62 = vand.u32 4294901760, %v6033_v41  ;;  %v2116_v8 = vmul.f32 %v1988_v38, %v1988_v38  ;;  %v1989_v27 = vsub.f32 %v4838_v34, %v6259_v44  ;;  %v1990_v50 = vsub.f32 %v4839_v37, %v6259_v44  ;;  %8468 = vst [vmem:[#allocation51_spill] sm:$0xff] %v6389_v15  ;;  %v233_v38 = vld [vmem:[#allocation7 + $0xd8] sm:$0xff] }
 0x124   :  { %8465 = vst [vmem:[#allocation46_spill] sm:$0xff] %v6378_v16  ;;  %1277 = vmatpush.msra.mxu1 %v8467_v26  ;;  %v6387_v46 = vand.u32 4294901760, %v237_v0  ;;  %1308 = vmatpush.msra.mxu2 %v6262_v13  ;;  %v1366_v47 = vand.u32 4294901760, %v1365_v7  ;;  %v8469_v41 = vand.u32 4294901760, %v6344_v12  ;;  %v6397_v25 = vsub.f32 %v245_v24, %v6370_v61  ;;  %v8472_v37 = vld [vmem:[#allocation50_spill] sm:$0xff] }
 0x125   :  { %1224 = vmatpush.msra.mxu0 %v8466_v62  ;;  %1355 = vmatpush.msra.mxu3 %v1354_v2  ;;  %v6399_v62 = vpop.xlane.xlu0 %1816  ;;  %v8471_v34 = vand.u32 4294901760, %v6050_v57  ;;  %v2280_v44 = vadd.f32 %v2114_v6, %v2113_v48  ;;  %v4840_v2 = vld [vmem:[#allocation2 + $0x2b0] sm:$0xff]  ;;  %v4841_v15 = vld [vmem:[#allocation2 + $0x2b8] sm:$0xff]  ;;  %v4842_v24 = vld [vmem:[#allocation2 + $0x2a0] sm:$0xff]  ;;  %v6410_v57 = vsub.f32 %v241_v22, %v6380_v18  ;;  %v2283_v48 = vadd.f32 %v2116_v8, %v2115_v14 }
 0x126   :  { %v1371_v52 = vsub.f32 %v6344_v12, %v8469_v41  ;;  %8470 = vst [vmem:[#allocation47_spill] sm:$0xff] %v6399_v62  ;;  %1279 = vmatpush.msra.mxu1 %v8472_v37  ;;  %v1993_v7 = vsub.f32 %v4840_v2, %v6305_v5  ;;  %v1994_v41 = vsub.f32 %v4841_v15, %v6305_v5  ;;  %v4843_v12 = vld [vmem:[#allocation2 + $0x2a8] sm:$0xff]  ;;  %v8473_v6 = vand.u32 4294901760, %v6059_v49  ;;  %v229_v37 = vld [vmem:[#allocation7 + $0xb8] sm:$0xff]  ;;  %v6420_v2 = vpop.xlane.xlu1 %1801 }
 0x127   :  { %1228 = vmatpush.msra.mxu0 %v8471_v34  ;;  %1310 = vmatpush.msra.mxu2 %v6285_v31  ;;  %v1991_v26 = vsub.f32 %v4842_v24, %v6313_v1  ;;  %v1992_v62 = vsub.f32 %v4843_v12, %v6313_v1  ;;  %v2277_v34 = vadd.f32 %v2112_v45, %v2111_v53  ;;  %v6415_v15 = vand.u32 4294901760, %v233_v38  ;;  %v225_v24 = vld [vmem:[#allocation7 + $0x98] sm:$0xff] }
 0x128   :  { %1361 = vmatpush.msra.mxu3 %v1360_v32  ;;  %1281 = vmatpush.msra.mxu1 %v6019_v33  ;;  %v6418_v32 = vsub.f32 %v237_v0, %v6387_v46  ;;  %v1372_v12 = vand.u32 4294901760, %v1371_v52  ;;  %v8474_v53 = vand.u32 4294901760, %v6373_v40  ;;  %v2117_v49 = vmul.f32 %v1989_v27, %v1989_v27 }
 0x129   :  { %1232 = vmatpush.msra.mxu0 %v8473_v6  ;;  %1312 = vmatpush.msra.mxu2 %v6321_v17  ;;  %v8256_v45 = vand.u32 4294901760, %v6397_v25  ;;  %v8475_v33 = vand.u32 4294901760, %v6075_v58  ;;  %v2118_v0 = vmul.f32 %v1990_v50, %v1990_v50  ;;  %v2121_v14 = vmul.f32 %v1993_v7, %v1993_v7 }
 0x12a   :  { %1367 = vmatpush.msra.mxu3 %v1366_v47  ;;  %v1377_v22 = vsub.f32 %v6373_v40, %v8474_v53  ;;  %2284 = vadd.xlane.f32.xlu2 %v2283_v48  ;;  %v2122_v8 = vmul.f32 %v1994_v41, %v1994_v41  ;;  %v2119_v6 = vmul.f32 %v1991_v26, %v1991_v26  ;;  %v8258_v52 = vand.u32 4294901760, %v6410_v57  ;;  %v8477_v48 = vld [vmem:[#allocation57_spill] sm:$0xff] }
 0x12b   :  { %1236 = vmatpush.msra.mxu0 %v8475_v33  ;;  %2278 = vadd.xlane.f32.xlu0 %v2277_v34  ;;  %v2120_v47 = vmul.f32 %v1992_v62, %v1992_v62  ;;  %v6430_v5 = vand.u32 4294901760, %v229_v37  ;;  %v6434_v27 = vmul.f32 %v5563_v54, %v6276_v56  ;;  %v6438_v58 = vmul.f32 %v5563_v54, %v8477_v48  ;;  %v221_v62 = vld [vmem:[#allocation7 + $0x78] sm:$0xff]  ;;  %v6451_v56 = vpop.xlane.xlu2 %1831 }
 0x12c   :  { %2281 = vadd.xlane.f32.xlu1 %v2280_v44  ;;  %1283 = vmatpush.msra.mxu1 %v6025_v55  ;;  %v8479_v50 = vand.u32 4294901760, %v6091_v43  ;;  %v6445_v26 = vsub.f32 %v233_v38, %v6415_v15  ;;  %v6449_v7 = vmul.f32 %v5563_v54, %v6354_v36  ;;  %8481 = vst [vmem:[#allocation78_spill] sm:$0xff] %v6451_v56  ;;  %v8482_v41 = vld [vmem:[#allocation37_spill] sm:$0xff]  ;;  %v1378_v34 = vand.u32 4294901760, %v1377_v22  ;;  %v4844_v33 = vld [vmem:[#allocation2 + $0x2c0] sm:$0xff] }
 0x12d   :  { %8476 = vst [vmem:[#allocation48_spill] sm:$0xff] %v6434_v27  ;;  %1154 = vmatmul.f32.vlgmr.msrb.gmra.mxu2 %v8482_v41  ;;  %1373 = vmatpush.msra.mxu3 %v1372_v12  ;;  %v1383_v55 = vsub.f32 %v6397_v25, %v8256_v45  ;;  %v6457_v43 = vand.u32 4294901760, %v225_v24  ;;  %v6459_v53 = vpop.xlane.xlu0 %1825  ;;  %v2286_v36 = vadd.f32 %v2118_v0, %v2117_v49  ;;  %v8483_v12 = vand.u32 4294901760, %v6110_v42  ;;  %v8484_v22 = vld [vmem:[#allocation39_spill] sm:$0xff]  ;;  %v8485_v49 = vld [vmem:[#allocation22_spill] sm:$0xff] }
 0x12e   :  { %8478 = vst [vmem:[#allocation50_spill] sm:$0xff] %v6438_v58  ;;  %1240 = vmatpush.msra.mxu0 %v8479_v50  ;;  %1285 = vmatpush.msra.mxu1 %v6052_v21  ;;  %v2292_v38 = vadd.f32 %v2122_v8, %v2121_v14  ;;  %v1995_v48 = vsub.f32 %v4844_v33, %v6289_v51  ;;  %v217_v50 = vld [vmem:[#allocation7 + $0x58] sm:$0xff]  ;;  %v6473_v1 = vand.u32 4294901760, %v221_v62  ;;  %v8486_v0 = vand.u32 4294901760, %v6418_v32  ;;  %v4845_v8 = vld [vmem:[#allocation2 + $0x2c8] sm:$0xff]  ;;  %v6496_v56 = vpop.xlane.xlu1 %1810 }
 0x12f   :  { %8480 = vst [vmem:[#allocation57_spill] sm:$0xff] %v6449_v7  ;;  %1314 = vmatpush.msra.mxu2 %v6341_v63  ;;  %1193 = vmatmul.f32.vlgmr.msrb.gmra.mxu3 %v8484_v22  ;;  %v2289_v45 = vadd.f32 %v2120_v47, %v2119_v6  ;;  %v1389_v44 = vsub.f32 %v6410_v57, %v8258_v52  ;;  %v4846_v47 = vld [vmem:[#allocation2 + $0x2d0] sm:$0xff]  ;;  %v213_v33 = vld [vmem:[#allocation7 + $0x38] sm:$0xff]  ;;  %v8487_v14 = vand.u32 4294901760, %v6124_v3  ;;  %v4849_v41 = vld [vmem:[#allocation2 + $0x2e8] sm:$0xff] }
 0x130   :  { %1244 = vmatpush.msra.mxu0 %v8483_v12  ;;  %v6471_v21 = vsub.f32 %v229_v37, %v6430_v5  ;;  %1287 = vmatpush.msra.mxu1 %v6066_v10  ;;  %v6480_v42 = vsub.f32 %v6418_v32, %v8486_v0  ;;  %v1996_v6 = vsub.f32 %v4845_v8, %v6289_v51  ;;  %v1384_v10 = vand.u32 4294901760, %v1383_v55  ;;  %v4847_v12 = vld [vmem:[#allocation2 + $0x2d8] sm:$0xff]  ;;  %v4848_v51 = vld [vmem:[#allocation2 + $0x2e0] sm:$0xff] }
 0x131   :  { %999 = vmatmul.f32.vlgmr.msrb.gmra.mxu0 %v8485_v49  ;;  %v1997_v37 = vsub.f32 %v4846_v47, %v6438_v58  ;;  %1316 = vmatpush.msra.mxu2 %v6370_v61  ;;  %v1998_v52 = vsub.f32 %v4847_v12, %v6438_v58  ;;  %v6488_v22 = vsub.f32 %v225_v24, %v6457_v43  ;;  %v6490_v0 = vand.u32 4294901760, %v217_v50  ;;  %v209_v55 = vld [vmem:[#allocation7 + $0x18] sm:$0xff]  ;;  %v4852_v49 = vld [vmem:[#allocation2 + $0x310] sm:$0xff] }
 0x132   :  { %1379 = vmatpush.msra.mxu3 %v1378_v34  ;;  %2293 = vadd.xlane.f32.xlu2 %v2292_v38  ;;  %v2123_v8 = vmul.f32 %v1995_v48, %v1995_v48  ;;  %v1999_v47 = vsub.f32 %v4848_v51, %v6434_v27  ;;  %v2000_v34 = vsub.f32 %v4849_v41, %v6434_v27  ;;  %v1390_v24 = vand.u32 4294901760, %v1389_v44  ;;  %v8489_v44 = vld [vmem:[#allocation36_spill] sm:$0xff] }
 0x133   :  { %1248 = vmatpush.msra.mxu0 %v8487_v14  ;;  %2287 = vadd.xlane.f32.xlu0 %v2286_v36  ;;  %v6500_v38 = vsub.f32 %v221_v62, %v6473_v1  ;;  %v6502_v3 = vand.u32 4294901760, %v213_v33  ;;  %v1396_v51 = vand.u32 4294901760, %v6480_v42  ;;  %v8488_v41 = vand.u32 4294901760, %v6445_v26  ;;  %v6511_v14 = vpop.xlane.xlu2 %2167  ;;  %v8491_v42 = vld [vmem:[#allocation62_spill] sm:$0xff] }
 0x134   :  { %2290 = vadd.xlane.f32.xlu1 %v2289_v45  ;;  %1289 = vmatpush.msra.mxu1 %v6077_v19  ;;  %v2124_v36 = vmul.f32 %v1996_v6, %v1996_v6  ;;  %v2125_v45 = vmul.f32 %v1997_v37, %v1997_v37  ;;  %8490 = vst [vmem:[#allocation36_spill] sm:$0xff] %v6511_v14  ;;  %v6517_v27 = vand.u32 4294901760, %v209_v55  ;;  %v8493_v6 = vand.u32 4294901760, %v6156_v60 }
 0x135   :  { %1318 = vmatpush.msra.mxu2 %v6380_v18  ;;  %v1401_v48 = vsub.f32 %v6445_v26, %v8488_v41  ;;  %1100 = vmatmul.f32.vlgmr.msrb.gmra.mxu1 %v8489_v44  ;;  %v2126_v62 = vmul.f32 %v1998_v52, %v1998_v52  ;;  %v6515_v19 = vsub.f32 %v217_v50, %v6490_v0  ;;  %v6526_v37 = vpop.xlane.xlu0 %1834  ;;  %v8494_v50 = vand.u32 4294901760, %v6471_v21 }
 0x136   :  { %1385 = vmatpush.msra.mxu3 %v1384_v10  ;;  %v6521_v58 = vmul.f32 %v5563_v54, %v8491_v42  ;;  %1252 = vmatpush.msra.mxu0 %v8493_v6  ;;  %v2127_v10 = vmul.f32 %v1999_v47, %v1999_v47  ;;  %v2128_v52 = vmul.f32 %v2000_v34, %v2000_v34  ;;  %v4850_v42 = vld [vmem:[#allocation2 + $0x2f0] sm:$0xff] }
 0x137   :  { %1291 = vmatpush.msra.mxu1 %v6093_v28  ;;  %1320 = vmatpush.msra.mxu2 %v6387_v46  ;;  %v1407_v41 = vsub.f32 %v6471_v21, %v8494_v50  ;;  %v2001_v14 = vsub.f32 %v4850_v42, %v6378_v16  ;;  %v6535_v60 = vsub.f32 %v213_v33, %v6502_v3  ;;  %v8495_v28 = vand.u32 4294901760, %v6176_v59 }
 0x138   :  { %8492 = vst [vmem:[#allocation62_spill] sm:$0xff] %v6521_v58  ;;  %1391 = vmatpush.msra.mxu3 %v1390_v24  ;;  %v1402_v47 = vand.u32 4294901760, %v1401_v48  ;;  %v2295_v34 = vadd.f32 %v2124_v36, %v2123_v8  ;;  %v4851_v24 = vld [vmem:[#allocation2 + $0x2f8] sm:$0xff]  ;;  %v2005_v50 = vsub.f32 %v4852_v49, %v6449_v7  ;;  %v2298_v42 = vadd.f32 %v2126_v62, %v2125_v45  ;;  %v4853_v49 = vld [vmem:[#allocation2 + $0x300] sm:$0xff] }
 0x139   :  { %1256 = vmatpush.msra.mxu0 %v8495_v28  ;;  %1293 = vmatpush.msra.mxu1 %v6121_v23  ;;  %v2002_v6 = vsub.f32 %v4851_v24, %v6378_v16  ;;  %v8496_v33 = vand.u32 4294901760, %v6488_v22  ;;  %v8262_v59 = vand.u32 4294901760, %v6515_v19  ;;  %v6548_v23 = vsub.f32 %v209_v55, %v6517_v27  ;;  %v4860_v16 = vld [vmem:[#allocation2 + $0x340] sm:$0xff] }
 0x13a   :  { %1322 = vmatpush.msra.mxu2 %v6415_v15  ;;  %1397 = vmatpush.msra.mxu3 %v1396_v51  ;;  %v8497_v8 = vand.u32 4294901760, %v6188_v29  ;;  %v2301_v48 = vadd.f32 %v2128_v52, %v2127_v10  ;;  %v2003_v36 = vsub.f32 %v4853_v49, %v6521_v58  ;;  %v4854_v51 = vld [vmem:[#allocation2 + $0x308] sm:$0xff]  ;;  %v1408_v62 = vand.u32 4294901760, %v1407_v41  ;;  %v4855_v29 = vld [vmem:[#allocation2 + $0x318] sm:$0xff]  ;;  %v6570_v49 = vpop.xlane.xlu1 %1819 }
 0x13b   :  { %v1413_v12 = vsub.f32 %v6488_v22, %v8496_v33  ;;  %1295 = vmatpush.msra.mxu1 %v6143_v11  ;;  %v2004_v45 = vsub.f32 %v4854_v51, %v6521_v58  ;;  %v8498_v55 = vand.u32 4294901760, %v6500_v38  ;;  %v2006_v24 = vsub.f32 %v4855_v29, %v6449_v7  ;;  %v8499_v10 = vld [vmem:[#allocation61_spill] sm:$0xff]  ;;  %2296 = vadd.xlane.f32.xlu0 %v2295_v34  ;;  %v6572_v51 = vpop.xlane.xlu2 %2176 }
 0x13c   :  { %1260 = vmatpush.msra.mxu0 %v8497_v8  ;;  %1324 = vmatpush.msra.mxu2 %v6430_v5  ;;  %v8263_v11 = vand.u32 4294901760, %v6535_v60  ;;  %v6564_v52 = vmul.f32 %v5563_v54, %v8499_v10  ;;  %v2129_v33 = vmul.f32 %v2001_v14, %v2001_v14  ;;  %v2130_v8 = vmul.f32 %v2002_v6, %v2002_v6 }
 0x13d   :  { %1262 = vmatmul.f32.vlgmr.msra.gmra.mxu0 %v8489_v44  ;;  %v1419_v28 = vsub.f32 %v6500_v38, %v8498_v55  ;;  %1403 = vmatpush.msra.mxu3 %v1402_v47  ;;  %v6568_v41 = vmul.f32 %v5563_v54, %v6420_v2  ;;  %v1414_v55 = vand.u32 4294901760, %v1413_v12  ;;  %v1425_v29 = vsub.f32 %v6515_v19, %v8262_v59  ;;  %v6584_v2 = vpop.xlane.xlu0 %2170 }
 0x13e   :  { %8500 = vst [vmem:[#allocation61_spill] sm:$0xff] %v6564_v52  ;;  %2302 = vadd.xlane.f32.xlu2 %v2301_v48  ;;  %2299 = vadd.xlane.f32.xlu1 %v2298_v42  ;;  %v8264_v47 = vand.u32 4294901760, %v6548_v23  ;;  %v6580_v14 = vmul.f32 %v5563_v54, %v6291_v9  ;;  %v2131_v34 = vmul.f32 %v2003_v36, %v2003_v36 }
 0x13f   :  { %8501 = vst [vmem:[#allocation79_spill] sm:$0xff] %v6568_v41  ;;  %1297 = vmatpush.msra.mxu1 %v6158_v30  ;;  %1326 = vmatpush.msra.mxu2 %v6457_v43  ;;  %v2132_v6 = vmul.f32 %v2004_v45, %v2004_v45  ;;  %v1420_v12 = vand.u32 4294901760, %v1419_v28  ;;  %v2133_v42 = vmul.f32 %v2005_v50, %v2005_v50  ;;  %v8504_v30 = vld [vmem:[#allocation64_spill] sm:$0xff]  ;;  %v1426_v59 = vand.u32 4294901760, %v1425_v29  ;;  %v4856_v45 = vld [vmem:[#allocation2 + $0x320] sm:$0xff]  ;;  %v4859_v29 = vld [vmem:[#allocation2 + $0x338] sm:$0xff] }
 0x140   :  { %8502 = vst [vmem:[#allocation80_spill] sm:$0xff] %v6580_v14  ;;  %1299 = vmatmul.f32.vlgmr.msra.gmra.mxu1 %v8489_v44  ;;  %1409 = vmatpush.msra.mxu3 %v1408_v62  ;;  %v2134_v48 = vmul.f32 %v2006_v24, %v2006_v24  ;;  %v1431_v10 = vsub.f32 %v6535_v60, %v8263_v11  ;;  %v4857_v62 = vld [vmem:[#allocation2 + $0x328] sm:$0xff] }
 0x141   :  { %8503 = vst [vmem:[#allocation81_spill] sm:$0xff] %v6584_v2  ;;  %1328 = vmatpush.msra.mxu2 %v6473_v1  ;;  %v2304_v9 = vadd.f32 %v2130_v8, %v2129_v33  ;;  %1447 = vmatpush.msrb.mxu0 %v8504_v30  ;;  %v1437_v36 = vsub.f32 %v6548_v23, %v8264_v47  ;;  %v8505_v33 = vld [vmem:[#allocation70_spill] sm:$0xff]  ;;  %v4858_v8 = vld [vmem:[#allocation2 + $0x330] sm:$0xff]  ;;  %v4861_v2 = vld [vmem:[#allocation2 + $0x348] sm:$0xff] }
 0x142   :  { %1415 = vmatpush.msra.mxu3 %v1414_v55  ;;  %1500 = vmatpush.msrb.mxu1 %v6221_v4  ;;  %v2007_v50 = vsub.f32 %v4856_v45, %v6564_v52  ;;  %v2008_v28 = vsub.f32 %v4857_v62, %v6564_v52  ;;  %v2307_v24 = vadd.f32 %v2132_v6, %v2131_v34  ;;  %v1432_v58 = vand.u32 4294901760, %v1431_v10  ;;  %v8506_v34 = vld [vmem:[#allocation71_spill] sm:$0xff] }
 0x143   :  { %1330 = vmatpush.msra.mxu2 %v6490_v0  ;;  %1450 = vmatpush.msrb.mxu0 %v8505_v33  ;;  %v2009_v55 = vsub.f32 %v4858_v8, %v6580_v14  ;;  %v2010_v11 = vsub.f32 %v4859_v29, %v6580_v14  ;;  %v2310_v47 = vadd.f32 %v2134_v48, %v2133_v42  ;;  %v1438_v42 = vand.u32 4294901760, %v1437_v36 }
 0x144   :  { %1421 = vmatpush.msra.mxu3 %v1420_v12  ;;  %v2011_v45 = vsub.f32 %v4860_v16, %v6568_v41  ;;  %v2012_v62 = vsub.f32 %v4861_v2, %v6568_v41  ;;  %1502 = vmatpush.msrb.mxu1 %v6241_v35  ;;  %v6608_v6 = vmul.f32 %v5563_v54, %v8506_v34  ;;  %v6610_v12 = vpop.xlane.xlu2 %2185  ;;  %v8509_v16 = vld [vmem:[#allocation77_spill] sm:$0xff]  ;;  %v8513_v36 = vand.u32 4294901760, %v8504_v30 }
 0x145   :  { %1332 = vmatpush.msra.mxu2 %v6502_v3  ;;  %2305 = vadd.xlane.f32.xlu0 %v2304_v9  ;;  %8508 = vst [vmem:[#allocation70_spill] sm:$0xff] %v6610_v12  ;;  %v2135_v48 = vmul.f32 %v2007_v50, %v2007_v50  ;;  %v2136_v10 = vmul.f32 %v2008_v28, %v2008_v28  ;;  %v6617_v2 = vpop.xlane.xlu0 %2179  ;;  %v4863_v34 = vld [vmem:[#allocation2 + $0x358] sm:$0xff] }
 0x146   :  { %8507 = vst [vmem:[#allocation64_spill] sm:$0xff] %v6608_v6  ;;  %1427 = vmatpush.msra.mxu3 %v1426_v59  ;;  %2311 = vadd.xlane.f32.xlu2 %v2310_v47  ;;  %v6614_v8 = vmul.f32 %v5563_v54, %v8509_v16  ;;  %v2137_v9 = vmul.f32 %v2009_v55, %v2009_v55  ;;  %v6623_v47 = vpop.xlane.xlu1 %1828  ;;  %v4862_v55 = vld [vmem:[#allocation2 + $0x350] sm:$0xff]  ;;  %v4865_v16 = vld [vmem:[#allocation2 + $0x368] sm:$0xff] }
 0x147   :  { %2308 = vadd.xlane.f32.xlu1 %v2307_v24  ;;  %1334 = vmatpush.msra.mxu2 %v6517_v27  ;;  %8511 = vst [vmem:[#allocation77_spill] sm:$0xff] %v6617_v2  ;;  %v2138_v29 = vmul.f32 %v2010_v11, %v2010_v11  ;;  %v6621_v59 = vmul.f32 %v5563_v54, %v6496_v56  ;;  %v8514_v24 = vand.u32 4294901760, %v8505_v33  ;;  %v8515_v33 = vand.u32 4294901760, %v6301_v39 }
 0x148   :  { %8510 = vst [vmem:[#allocation71_spill] sm:$0xff] %v6614_v8  ;;  %1433 = vmatpush.msra.mxu3 %v1432_v58  ;;  %v2139_v50 = vmul.f32 %v2011_v45, %v2011_v45  ;;  %v2140_v28 = vmul.f32 %v2012_v62, %v2012_v62  ;;  %1453 = vmatpush.msrb.mxu0 %v6301_v39  ;;  %v4864_v45 = vld [vmem:[#allocation2 + $0x360] sm:$0xff]  ;;  %v8518_v39 = vand.u32 4294901760, %v6324_v20 }
 0x149   :  { %8512 = vst [vmem:[#allocation82_spill] sm:$0xff] %v6621_v59  ;;  %1541 = vmatpush.msrb.mxu2 %v8513_v36  ;;  %1504 = vmatpush.msrb.mxu1 %v6262_v13  ;;  %v2313_v11 = vadd.f32 %v2136_v10, %v2135_v48  ;;  %v2013_v56 = vsub.f32 %v4862_v55, %v6608_v6  ;;  %v4866_v10 = vld [vmem:[#allocation2 + $0x370] sm:$0xff] }
 0x14a   :  { %1439 = vmatpush.msra.mxu3 %v1438_v42  ;;  %v2014_v58 = vsub.f32 %v4863_v34, %v6608_v6  ;;  %v2316_v30 = vadd.f32 %v2138_v29, %v2137_v9  ;;  %1456 = vmatpush.msrb.mxu0 %v6324_v20  ;;  %v2015_v62 = vsub.f32 %v4864_v45, %v6614_v8  ;;  %v8516_v9 = vld [vmem:[#allocation75_spill] sm:$0xff]  ;;  %v8523_v20 = vld [vmem:[#allocation76_spill] sm:$0xff] }
 0x14b   :  { %1545 = vmatpush.msrb.mxu2 %v8514_v24  ;;  %v2016_v42 = vsub.f32 %v4865_v16, %v6614_v8  ;;  %v2319_v48 = vadd.f32 %v2140_v28, %v2139_v50  ;;  %1506 = vmatpush.msrb.mxu1 %v6285_v31  ;;  %v2017_v36 = vsub.f32 %v4866_v10, %v6621_v59  ;;  %v4867_v24 = vld [vmem:[#allocation2 + $0x378] sm:$0xff]  ;;  %v8520_v34 = vld [vmem:[#allocation47_spill] sm:$0xff] }
 0x14c   :  { %1608 = vmatpush.msrb.mxu3 %v6221_v4  ;;  %v2018_v4 = vsub.f32 %v4867_v24, %v6621_v59  ;;  %v6645_v29 = vmul.f32 %v5563_v54, %v8516_v9  ;;  %v6649_v50 = vpop.xlane.xlu2 %2194  ;;  %v2141_v28 = vmul.f32 %v2013_v56, %v2013_v56  ;;  %v2142_v55 = vmul.f32 %v2014_v58, %v2014_v58  ;;  %v4869_v10 = vld [vmem:[#allocation2 + $0x388] sm:$0xff]  ;;  %v4871_v9 = vld [vmem:[#allocation2 + $0x398] sm:$0xff] }
 0x14d   :  { %1549 = vmatpush.msrb.mxu2 %v8515_v33  ;;  %2314 = vadd.xlane.f32.xlu0 %v2313_v11  ;;  %8519 = vst [vmem:[#allocation83_spill] sm:$0xff] %v6649_v50  ;;  %v6653_v45 = vmul.f32 %v5563_v54, %v8520_v34  ;;  %v2143_v11 = vmul.f32 %v2015_v62, %v2015_v62  ;;  %v4868_v62 = vld [vmem:[#allocation2 + $0x380] sm:$0xff] }
 0x14e   :  { %1610 = vmatpush.msrb.mxu3 %v6241_v35  ;;  %8517 = vst [vmem:[#allocation75_spill] sm:$0xff] %v6645_v29  ;;  %2320 = vadd.xlane.f32.xlu2 %v2319_v48  ;;  %v6656_v35 = vpop.xlane.xlu0 %2188  ;;  %v2144_v16 = vmul.f32 %v2016_v42, %v2016_v42  ;;  %v6660_v33 = vmul.f32 %v5563_v54, %v6570_v49  ;;  %v8524_v48 = vand.u32 4294901760, %v8523_v20 }
 0x14f   :  { %1553 = vmatpush.msrb.mxu2 %v8518_v39  ;;  %8521 = vst [vmem:[#allocation47_spill] sm:$0xff] %v6653_v45  ;;  %2317 = vadd.xlane.f32.xlu1 %v2316_v30  ;;  %v2145_v56 = vmul.f32 %v2017_v36, %v2017_v36  ;;  %v2146_v58 = vmul.f32 %v2018_v4, %v2018_v4  ;;  %v8526_v30 = vand.u32 4294901760, %v6373_v40 }
 0x150   :  { %1612 = vmatpush.msrb.mxu3 %v6262_v13  ;;  %8522 = vst [vmem:[#allocation84_spill] sm:$0xff] %v6660_v33  ;;  %1459 = vmatpush.msrb.mxu0 %v8523_v20  ;;  %v6667_v13 = vpop.xlane.xlu1 %2164  ;;  %v2322_v49 = vadd.f32 %v2142_v55, %v2141_v28  ;;  %v2019_v42 = vsub.f32 %v4868_v62, %v6645_v29  ;;  %v4872_v55 = vld [vmem:[#allocation2 + $0x3a0] sm:$0xff]  ;;  %v4873_v20 = vld [vmem:[#allocation2 + $0x3a8] sm:$0xff] }
 0x151   :  { %1557 = vmatpush.msrb.mxu2 %v8524_v48  ;;  %1508 = vmatpush.msrb.mxu1 %v6321_v17  ;;  %8525 = vst [vmem:[#allocation76_spill] sm:$0xff] %v6667_v13  ;;  %v2020_v24 = vsub.f32 %v4869_v10, %v6645_v29  ;;  %v2325_v36 = vadd.f32 %v2144_v16, %v2143_v11  ;;  %v8528_v11 = vand.u32 4294901760, %v6410_v57  ;;  %v8531_v10 = vand.u32 4294901760, %v6418_v32 }
 0x152   :  { %1614 = vmatpush.msrb.mxu3 %v6285_v31  ;;  %1462 = vmatpush.msrb.mxu0 %v6373_v40  ;;  %v4870_v31 = vld [vmem:[#allocation2 + $0x390] sm:$0xff]  ;;  %v2022_v39 = vsub.f32 %v4871_v9, %v6653_v45  ;;  %v8527_v40 = vand.u32 4294901760, %v6397_v25  ;;  %v2328_v28 = vadd.f32 %v2146_v58, %v2145_v56  ;;  %v2023_v34 = vsub.f32 %v4872_v55, %v6660_v33  ;;  %v6724_v55 = vld [vmem:[#allocation8] sm:$0xf] }
 0x153   :  { %1561 = vmatpush.msrb.mxu2 %v8526_v30  ;;  %1510 = vmatpush.msrb.mxu1 %v6341_v63  ;;  %v2021_v4 = vsub.f32 %v4870_v31, %v6653_v45  ;;  %v6695_v62 = vmul.f32 %v5563_v54, %v6459_v53  ;;  %v8535_v53 = vand.u32 4294901760, %v6445_v26  ;;  %v6713_v31 = vpop.f32.mrf.mxu2  ;;  %v8537_v9 = vand.u32 4294901760, %v6471_v21 }
 0x154   :  { %1616 = vmatpush.msrb.mxu3 %v6321_v17  ;;  %1465 = vmatpush.msrb.mxu0 %v6397_v25  ;;  %v2024_v17 = vsub.f32 %v4873_v20, %v6660_v33  ;;  %v6687_v16 = vpop.xlane.xlu2 %2203  ;;  %v2147_v25 = vmul.f32 %v2019_v42, %v2019_v42  ;;  %v2150_v58 = vmul.f32 %v2022_v39, %v2022_v39  ;;  %v4877_v20 = vld [vmem:[#allocation2 + $0x3b8] sm:$0xff] }
 0x155   :  { %1565 = vmatpush.msrb.mxu2 %v8527_v40  ;;  %2323 = vadd.xlane.f32.xlu0 %v2322_v49  ;;  %8529 = vst [vmem:[#allocation85_spill] sm:$0xff] %v6687_v16  ;;  %v2149_v56 = vmul.f32 %v2021_v4, %v2021_v4  ;;  %v2151_v30 = vmul.f32 %v2023_v34, %v2023_v34  ;;  %v4875_v40 = vld [vmem:[#allocation2 + $0x3c8] sm:$0xff]  ;;  %v6726_v34 = vpop.f32.mrf.mxu1 }
 0x156   :  { %1618 = vmatpush.msrb.mxu3 %v6341_v63  ;;  %2329 = vadd.xlane.f32.xlu2 %v2328_v28  ;;  %v6689_v48 = vpop.xlane.xlu0 %2197  ;;  %v2148_v63 = vmul.f32 %v2020_v24, %v2020_v24  ;;  %v2152_v49 = vmul.f32 %v2024_v17, %v2024_v17  ;;  %8530 = vst [vmem:[#allocation86_spill] sm:$0xff] %v6695_v62 }
 0x157   :  { %1569 = vmatpush.msrb.mxu2 %v8528_v11  ;;  %2326 = vadd.xlane.f32.xlu1 %v2325_v36  ;;  %v8532_v36 = vld [vmem:[#allocation51_spill] sm:$0xff]  ;;  %v2334_v24 = vadd.f32 %v2150_v58, %v2149_v56  ;;  %v2028_v28 = vsub.f32 %v4875_v40, %v6695_v62  ;;  %v4879_v58 = vld [vmem:[#allocation2 + $0x3d8] sm:$0xff] }
 0x158   :  { %1620 = vmatpush.msrb.mxu3 %v6370_v61  ;;  %1468 = vmatpush.msrb.mxu0 %v6410_v57  ;;  %v6702_v42 = vmul.f32 %v5563_v54, %v8532_v36  ;;  %v6708_v57 = vmul.f32 %v5563_v54, %v6623_v47  ;;  %v6715_v4 = vpop.xlane.xlu1 %2173  ;;  %v4874_v47 = vld [vmem:[#allocation2 + $0x3c0] sm:$0xff] }
 0x159   :  { %1512 = vmatpush.msrb.mxu1 %v6370_v61  ;;  %1573 = vmatpush.msrb.mxu2 %v8531_v10  ;;  %v318_v61 = vpop.f32.mrf.mxu0  ;;  %8536 = vst [vmem:[#allocation88_spill] sm:$0xff] %v6715_v4  ;;  %v2027_v39 = vsub.f32 %v4874_v47, %v6695_v62  ;;  %v6739_v10 = vpop.f32.mrf.mxu3  ;;  %v8540_v36 = vld [vmem:[#allocation22_spill] sm:$0xff] }
 0x15a   :  { %1622 = vmatpush.msrb.mxu3 %v6380_v18  ;;  %8533 = vst [vmem:[#allocation51_spill] sm:$0xff] %v6702_v42  ;;  %1471 = vmatpush.msrb.mxu0 %v6418_v32  ;;  %v2337_v32 = vadd.f32 %v2152_v49, %v2151_v30  ;;  %v2026_v17 = vsub.f32 %v4877_v20, %v6702_v42  ;;  %v8538_v30 = vand.u32 4294901760, %v6488_v22  ;;  %v272_v49 = vperm.slane %v6724_v55, 0  ;;  %v4880_v20 = vld [vmem:[#allocation2 + $0x3f0] sm:$0xff] }
 0x15b   :  { %1514 = vmatpush.msrb.mxu1 %v6380_v18  ;;  %8534 = vst [vmem:[#allocation87_spill] sm:$0xff] %v6708_v57  ;;  %1577 = vmatpush.msrb.mxu2 %v8535_v53  ;;  %v2331_v18 = vadd.f32 %v2148_v63, %v2147_v25  ;;  %v4878_v25 = vld [vmem:[#allocation2 + $0x3d0] sm:$0xff]  ;;  %v2030_v63 = vsub.f32 %v4879_v58, %v6708_v57 }
 0x15c   :  { %1624 = vmatpush.msrb.mxu3 %v6387_v46  ;;  %1474 = vmatpush.msrb.mxu0 %v6445_v26  ;;  %v2029_v56 = vsub.f32 %v4878_v25, %v6708_v57  ;;  %v6747_v53 = vpop.xlane.xlu2 %2212  ;;  %v2154_v47 = vmul.f32 %v2026_v17, %v2026_v17  ;;  %v4881_v25 = vld [vmem:[#allocation2 + $0x3f8] sm:$0xff] }
 0x15d   :  { %1516 = vmatpush.msrb.mxu1 %v6387_v46  ;;  %1581 = vmatpush.msrb.mxu2 %v8537_v9  ;;  %v4876_v46 = vld [vmem:[#allocation2 + $0x3b0] sm:$0xff]  ;;  %8541 = vst [vmem:[#allocation22_spill] sm:$0xff] %v6747_v53 }
 0x15e   :  { %1626 = vmatpush.msrb.mxu3 %v6415_v15  ;;  %2332 = vadd.xlane.f32.xlu0 %v2331_v18  ;;  %v2025_v26 = vsub.f32 %v4876_v46, %v6702_v42  ;;  %v6731_v11 = vpop.xlane.xlu0 %2206  ;;  %v2156_v18 = vmul.f32 %v2028_v28, %v2028_v28  ;;  %v2157_v40 = vmul.f32 %v2029_v56, %v2029_v56 }
 0x15f   :  { %2338 = vadd.xlane.f32.xlu2 %v2337_v32  ;;  %2335 = vadd.xlane.f32.xlu1 %v2334_v24  ;;  %v2155_v24 = vmul.f32 %v2027_v39, %v2027_v39  ;;  %v2158_v46 = vmul.f32 %v2030_v63, %v2030_v63  ;;  %v319_v39 = vadd.f32 %v318_v61, %v272_v49  ;;  %v4882_v61 = vld [vmem:[#allocation2 + $0x3e0] sm:$0xff] }
 0x160   :  { %1477 = vmatpush.msrb.mxu0 %v6471_v21  ;;  %1518 = vmatpush.msrb.mxu1 %v6415_v15  ;;  %v6743_v21 = vmul.f32 %v5563_v54, %v6526_v37  ;;  %v8542_v15 = vld [vmem:[#allocation78_spill] sm:$0xff]  ;;  %v2153_v9 = vmul.f32 %v2025_v26, %v2025_v26  ;;  %v8544_v37 = vand.u32 4294901760, %v6500_v38  ;;  %v659_v58 = vpop.f32.mrf.mxu2  ;;  %v6768_v63 = vpop.xlane.xlu1 %2182 }
 0x161   :  { %1585 = vmatpush.msrb.mxu2 %v8538_v30  ;;  %1628 = vmatpush.msrb.mxu3 %v6430_v5  ;;  %v6751_v32 = vmul.f32 %v5563_v54, %v8542_v15  ;;  %v6760_v28 = vpop.f32.mrf.mxu0  ;;  %v2343_v26 = vadd.f32 %v2156_v18, %v2155_v24  ;;  %8546 = vst [vmem:[#allocation90_spill] sm:$0xff] %v6768_v63  ;;  %v4883_v30 = vld [vmem:[#allocation2 + $0x3e8] sm:$0xff] }
 0x162   :  { %8539 = vst [vmem:[#allocation89_spill] sm:$0xff] %v6743_v21  ;;  %1340 = vmatmul.f32.vlgmr.msra.gmra.mxu2 %v8540_v36  ;;  %1480 = vmatpush.msrb.mxu0 %v6488_v22  ;;  %v273_v22 = vperm.slane %v6724_v55, 1  ;;  %v2033_v17 = vsub.f32 %v4880_v20, %v6743_v21  ;;  %v2034_v56 = vsub.f32 %v4881_v25, %v6743_v21  ;;  %v8547_v36 = vand.u32 4294901760, %v6535_v60  ;;  %v618_v15 = vpop.f32.mrf.mxu1 }
 0x163   :  { %8543 = vst [vmem:[#allocation78_spill] sm:$0xff] %v6751_v32  ;;  %1520 = vmatpush.msrb.mxu1 %v6430_v5  ;;  %1589 = vmatpush.msrb.mxu2 %v8544_v37  ;;  %v8545_v5 = vand.u32 4294901760, %v6515_v19  ;;  %v2032_v49 = vsub.f32 %v4883_v30, %v6751_v32  ;;  %v2346_v24 = vadd.f32 %v2158_v46, %v2157_v40  ;;  %v2420_v37 = vlaneseq }
 0x164   :  { %1630 = vmatpush.msrb.mxu3 %v6457_v43  ;;  %1483 = vmatpush.msrb.mxu0 %v6500_v38  ;;  %v2340_v38 = vadd.f32 %v2154_v47, %v2153_v9  ;;  %v420_v9 = vadd.f32 %v6726_v34, %v319_v39  ;;  %v2161_v47 = vmul.f32 %v2033_v17, %v2033_v17  ;;  %v8548_v20 = vand.u32 4294901760, %v6548_v23  ;;  %v6786_v25 = vpop.xlane.xlu2 %2221  ;;  %v8549_v39 = vld [vmem:[#allocation37_spill] sm:$0xff] }
 0x165   :  { %1441 = vmatmul.f32.vlgmr.msra.gmra.mxu3 %v8489_v44  ;;  %1522 = vmatpush.msrb.mxu1 %v6457_v43  ;;  %v2031_v43 = vsub.f32 %v4882_v61, %v6751_v32  ;;  %v2160_v40 = vmul.f32 %v2032_v49, %v2032_v49  ;;  %v274_v21 = vperm.slane %v6724_v55, 2 }
 0x166   :  { %1593 = vmatpush.msrb.mxu2 %v8545_v5  ;;  %1632 = vmatpush.msrb.mxu3 %v6473_v1  ;;  %v6777_v18 = vpop.xlane.xlu0 %2215  ;;  %v2162_v5 = vmul.f32 %v2034_v56, %v2034_v56  ;;  %v760_v46 = vpop.f32.mrf.mxu3 }
 0x167   :  { %1486 = vmatpush.msrb.mxu0 %v6515_v19  ;;  %1524 = vmatpush.msrb.mxu1 %v6473_v1  ;;  %v660_v19 = vadd.f32 %v659_v58, %v273_v22  ;;  %v2159_v1 = vmul.f32 %v2031_v43, %v2031_v43  ;;  %v6788_v22 = vshrl.u32 %v2420_v37, 7  ;;  %v8550_v58 = vld [vmem:[#allocation39_spill] sm:$0xff] }
 0x168   :  { %1597 = vmatpush.msrb.mxu2 %v8547_v36  ;;  %1634 = vmatpush.msrb.mxu3 %v6490_v0 }
 0x169   :  { %2341 = vadd.xlane.f32.xlu0 %v2340_v38  ;;  %2347 = vadd.xlane.f32.xlu2 %v2346_v24  ;;  %v761_v34 = vadd.f32 %v760_v46, %v660_v19  ;;  %v6798_v56 = vadd.s32 16, %v6788_v22  ;;  %v6841_v46 = vadd.s32 40, %v6788_v22  ;;  %v6904_v59 = vadd.s32 72, %v6788_v22 }
 0x16a   :  { %2344 = vadd.xlane.f32.xlu1 %v2343_v26  ;;  %1489 = vmatpush.msrb.mxu0 %v6535_v60  ;;  %v2352_v60 = vadd.f32 %v2162_v5, %v2161_v47  ;;  %v2349_v26 = vadd.f32 %v2160_v40, %v2159_v1 }
 0x16b   :  { %1526 = vmatpush.msrb.mxu1 %v6490_v0  ;;  %1601 = vmatpush.msrb.mxu2 %v8548_v20  ;;  %v474_v0 = vadd.f32 %v6713_v31, %v420_v9  ;;  %v814_v17 = vpop.f32.mrf.mxu0 }
 0x16c   :  { %1636 = vmatpush.msrb.mxu3 %v6502_v3  ;;  %1603 = vmatmul.f32.vlgmr.msrb.gmra.mxu2 %v8489_v44  ;;  %v815_v31 = vadd.f32 %v814_v17, %v761_v34  ;;  %v6811_v43 = vpop.xlane.xlu2 %2230  ;;  %v6863_v17 = vadd.s32 80, %v6788_v22 }
 0x16d   :  { %1492 = vmatpush.msrb.mxu0 %v6548_v23  ;;  %1528 = vmatpush.msrb.mxu1 %v6502_v3  ;;  %v6804_v3 = vpop.xlane.xlu1 %2191  ;;  %v513_v38 = vadd.f32 %v6739_v10, %v474_v0  ;;  %8551 = vst [vmem:[#allocation37_spill] sm:$0xff] %v6811_v43 }
 0x16e   :  { %1638 = vmatpush.msrb.mxu3 %v6517_v27  ;;  %1495 = vmatmul.f32.vlgmr.msrb.gmra.mxu0 %v8549_v39  ;;  %v6801_v23 = vpop.xlane.xlu0 %2224  ;;  %v6858_v39 = vadd.s32 32, %v6788_v22 }
 0x16f   :  { %1640 = vmatmul.f32.vlgmr.msrb.gmra.mxu3 %v8489_v44  ;;  %1530 = vmatpush.msrb.mxu1 %v6517_v27  ;;  %v853_v44 = vpop.f32.mrf.mxu1  ;;  %v582_v27 = vadd.f32 %v6760_v28, %v513_v38  ;;  %v922_v30 = vpop.f32.mrf.mxu2  ;;  %v6873_v38 = vadd.s32 56, %v6788_v22 }
 0x170   :  { %4506 = vset.pattern.permute.xlu2 %v6788_v22  ;;  %1534 = vmatmul.f32.vlgmr.msrb.gmra.mxu1 %v8550_v58  ;;  %v854_v61 = vadd.f32 %v853_v44, %v815_v31 }
 0x171   :  { %2350 = vadd.xlane.f32.xlu0 %v2349_v26  ;;  %4507 = vset.pattern.permute.xlu1 %v6798_v56  ;;  %v6815_v24 = vadd.f32 %v618_v15, %v582_v27  ;;  %v959_v37 = vpop.f32.mrf.mxu3  ;;  %v6836_v15 = vadd.s32 24, %v6788_v22 }
 0x172   :  { %2353 = vadd.xlane.f32.xlu1 %v2352_v60  ;;  %4545 = vset.pattern.permute.xlu0 %v6788_v22  ;;  %v923_v36 = vadd.f32 %v922_v30, %v854_v61  ;;  %v6881_v61 = vadd.s32 48, %v6788_v22 }
 0x173   :  { %v6822_v9 = vperm.slane %v6815_v24, 0 }
 0x174   :  { %v6819_v10 = vadd.f32 %v959_v37, %v923_v36  ;;  %v6824_v47 = vpop.xlane.xlu2 %2239  ;;  %v6888_v36 = vadd.s32 120, %v6788_v22 }
 0x175   :  { %v6817_v19 = vpop.xlane.xlu1 %2200  ;;  %8553 = vst [vmem:[#allocation91_spill] sm:$0xff] %v6824_v47 }
 0x176   :  { %v6813_v49 = vpop.xlane.xlu0 %2233  ;;  %8552 = vst [vmem:[#allocation39_spill] sm:$0xff] %v6817_v19  ;;  %v6829_v28 = vperm.slane %v6819_v10, 1 }
 0x17c   :  { %v6843_v20 = vpop.xlane.xlu2 %2248 }
 0x17d   :  { %v6832_v1 = vpop.xlane.xlu1 %2209  ;;  %8555 = vst [vmem:[#allocation93_spill] sm:$0xff] %v6843_v20  ;;  %v6918_v20 = vadd.s32 96, %v6788_v22 }
 0x17e   :  { %v6826_v5 = vpop.xlane.xlu0 %2242  ;;  %8554 = vst [vmem:[#allocation92_spill] sm:$0xff] %v6832_v1 }
 0x181   :  { %2424 = vperm.xlu2 %4506, %v6822_v9  }
 0x184   :  { %v6854_v60 = vpop.xlane.xlu2 %2257 }
 0x185   :  { %2715 = vperm.xlu0 %4545, %v6829_v28   ;;  %v6848_v34 = vpop.xlane.xlu1 %2218  ;;  %8557 = vst [vmem:[#allocation95_spill] sm:$0xff] %v6854_v60 }
 0x186   :  { %v6838_v40 = vpop.xlane.xlu0 %2251  ;;  %8556 = vst [vmem:[#allocation94_spill] sm:$0xff] %v6848_v34 }
 0x189   :  { %4508 = vset.pattern.permute.xlu2 %v6836_v15 }
 0x18b   :  { %2436 = vperm.xlu1 %4507, %v6822_v9  }
 0x18c   :  { %v6870_v31 = vpop.xlane.xlu2 %2266 }
 0x18d   :  { %4550 = vset.pattern.permute.xlu0 %v6841_v46  ;;  %v6860_v26 = vpop.xlane.xlu1 %2227 }
 0x18e   :  { %v6852_v0 = vpop.xlane.xlu0 %2260  ;;  %8558 = vst [vmem:[#allocation96_spill] sm:$0xff] %v6860_v26 }
 0x191   :  { %2442 = vperm.xlu2 %4508, %v6822_v9  }
 0x193   :  { %4510 = vset.pattern.permute.xlu1 %v6841_v46 }
 0x194   :  { %v6885_v30 = vpop.xlane.xlu2 %2275 }
 0x195   :  { %2745 = vperm.xlu0 %4550, %v6829_v28   ;;  %v6876_v44 = vpop.xlane.xlu1 %2236  ;;  %8559 = vst [vmem:[#allocation97_spill] sm:$0xff] %v6885_v30 }
 0x196   :  { %v6867_v58 = vpop.xlane.xlu0 %2269 }
 0x199   :  { %4509 = vset.pattern.permute.xlu2 %v6858_v39 }
 0x19b   :  { %2454 = vperm.xlu1 %4510, %v6822_v9  }
 0x19d   :  { %4555 = vset.pattern.permute.xlu0 %v6863_v17  ;;  %v6892_v37 = vpop.xlane.xlu1 %2245  ;;  %v6898_v33 = vpop.xlane.xlu2 %2284 }
 0x19e   :  { %v6883_v27 = vpop.xlane.xlu0 %2278  ;;  %8560 = vst [vmem:[#allocation98_spill] sm:$0xff] %v6892_v37  ;;  %v6960_v37 = vadd.s32 8, %v6788_v22 }
 0x19f   :  { %8561 = vst [vmem:[#allocation99_spill] sm:$0xff] %v6898_v33 }
 0x1a1   :  { %2448 = vperm.xlu2 %4509, %v6822_v9  }
 0x1a3   :  { %4512 = vset.pattern.permute.xlu1 %v6873_v38 }
 0x1a5   :  { %2775 = vperm.xlu0 %4555, %v6829_v28   ;;  %v6906_v14 = vpop.xlane.xlu1 %2254 }
 0x1a6   :  { %v6896_v32 = vpop.xlane.xlu0 %2287  ;;  %8562 = vst [vmem:[#allocation100_spill] sm:$0xff] %v6906_v14 }
 0x1a9   :  { %4511 = vset.pattern.permute.xlu2 %v6881_v61 }
 0x1ab   :  { %2466 = vperm.xlu1 %4512, %v6822_v9  }
 0x1ad   :  { %4560 = vset.pattern.permute.xlu0 %v6888_v36 }
 0x1ae   :  { %v1000_v57 = vpop.f32.mrf.mxu0  ;;  %v6909_v60 = vpop.xlane.xlu0 %2296 }
 0x1af   :  { %v1001_v62 = vadd.f32 %v1000_v57, %v274_v21  ;;  %v6912_v57 = vpop.xlane.xlu2 %2293 }
 0x1b0   :  { %v1155_v45 = vpop.f32.mrf.mxu2  ;;  %8563 = vst [vmem:[#allocation101_spill] sm:$0xff] %v6912_v57  ;;  %v6950_v57 = vadd.s32 112, %v6788_v22 }
 0x1b1   :  { %2460 = vperm.xlu2 %4511, %v6822_v9  }
 0x1b2   :  { %v1101_v29 = vpop.f32.mrf.mxu1  ;;  %v1194_v41 = vpop.f32.mrf.mxu3 }
 0x1b3   :  { %4514 = vset.pattern.permute.xlu1 %v6863_v17  ;;  %v1102_v6 = vadd.f32 %v1101_v29, %v1001_v62 }
 0x1b5   :  { %2805 = vperm.xlu0 %4560, %v6829_v28   ;;  %v1156_v52 = vadd.f32 %v1155_v45, %v1102_v6  ;;  %v6920_v6 = vpop.xlane.xlu1 %2263 }
 0x1b6   :  { %8564 = vst [vmem:[#allocation102_spill] sm:$0xff] %v6920_v6 }
 0x1b7   :  { %v1195_v33 = vadd.f32 %v1194_v41, %v1156_v52  ;;  %v6930_v45 = vpop.xlane.xlu2 %2302 }
 0x1b8   :  { %v6927_v41 = vpop.xlane.xlu0 %2305  ;;  %8565 = vst [vmem:[#allocation103_spill] sm:$0xff] %v6930_v45 }
 0x1b9   :  { %4513 = vset.pattern.permute.xlu2 %v6904_v59 }
 0x1ba   :  { %v1263_v30 = vpop.f32.mrf.mxu0 }
 0x1bb   :  { %2484 = vperm.xlu1 %4514, %v6822_v9   ;;  %v1264_v21 = vadd.f32 %v1263_v30, %v1195_v33  ;;  %v6933_v33 = vadd.s32 88, %v6788_v22 }
 0x1bd   :  { %4565 = vset.pattern.permute.xlu0 %v6858_v39  ;;  %v1300_v29 = vpop.f32.mrf.mxu1  ;;  %v6936_v30 = vpop.xlane.xlu1 %2272 }
 0x1be   :  { %v6915_v62 = vadd.f32 %v1300_v29, %v1264_v21  ;;  %8566 = vst [vmem:[#allocation104_spill] sm:$0xff] %v6936_v30 }
 0x1bf   :  { %v6942_v29 = vpop.xlane.xlu2 %2311 }
 0x1c0   :  { %v6923_v52 = vperm.slane %v6915_v62, 0  ;;  %v6940_v21 = vpop.xlane.xlu0 %2314 }
 0x1c1   :  { %2478 = vperm.xlu2 %4513, %v6822_v9  }
 0x1c3   :  { %4516 = vset.pattern.permute.xlu1 %v6918_v20 }
 0x1c5   :  { %3604 = vperm.xlu0 %4565, %v6923_v52   ;;  %v6946_v45 = vpop.xlane.xlu1 %2281 }
 0x1c7   :  { %v6952_v6 = vpop.xlane.xlu2 %2320 }
 0x1c8   :  { %v2324_v30 = vpop.xlane.xlu0 %2323  ;;  %8567 = vst [vmem:[#allocation105_spill] sm:$0xff] %v6952_v6  ;;  %v275_v6 = vperm.slane %v6724_v55, 3 }
 0x1c9   :  { %4515 = vset.pattern.permute.xlu2 %v6933_v33  ;;  %v2408_v47 = vmul.f32 %v2324_v30, %v5563_v54 }
 0x1cb   :  { %2496 = vperm.xlu1 %4516, %v6822_v9   ;;  %v2860_v34 = vadd.f32 1e-05, %v2408_v47 }
 0x1cd   :  { %4570 = vset.pattern.permute.xlu0 %v6904_v59  ;;  %v6957_v14 = vpop.xlane.xlu1 %2290  ;;  %4628 = vrsqrt.f32 %v2860_v34  ;;  %vm3407_vm2 = vweird.f32 %v2860_v34 }
 0x1ce   :  { %8568 = vst [vmem:[#allocation106_spill] sm:$0xff] %v6957_v14  ;;  %v6972_v14 = vperm.slane %v6819_v10, 0 }
 0x1cf   :  { %v6968_v43 = vpop.xlane.xlu2 %2329 }
 0x1d0   :  { %8570 = vst [vmem:[#allocation108_spill] sm:$0xff] %v6968_v43 }
 0x1d1   :  { %2490 = vperm.xlu2 %4515, %v6822_v9   ;;  %v6964_v26 = vpop.xlane.xlu0 %2332 }
 0x1d2   :  { %8569 = vst [vmem:[#allocation107_spill] sm:$0xff] %v6964_v26 }
 0x1d3   :  { %4518 = vset.pattern.permute.xlu1 %v6888_v36 }
 0x1d5   :  { %3634 = vperm.xlu0 %4570, %v6923_v52   ;;  %v6974_v30 = vpop.xlane.xlu1 %2299 }
 0x1d6   :  { %8571 = vst [vmem:[#allocation109_spill] sm:$0xff] %v6974_v30 }
 0x1d7   :  { %v6981_v47 = vpop.xlane.xlu2 %2338 }
 0x1d8   :  { %8573 = vst [vmem:[#allocation111_spill] sm:$0xff] %v6981_v47 }
 0x1d9   :  { %4517 = vset.pattern.permute.xlu2 %v6950_v57 }
 0x1db   :  { %2514 = vperm.xlu1 %4518, %v6822_v9  }
 0x1dc   :  { %v6978_v50 = vpop.xlane.xlu0 %2341 }
 0x1dd   :  { %4575 = vset.pattern.permute.xlu0 %v6950_v57  ;;  %8572 = vst [vmem:[#allocation110_spill] sm:$0xff] %v6978_v50 }
 0x1e1   :  { %2508 = vperm.xlu2 %4517, %v6822_v9  }
 0x1e3   :  { %4520 = vset.pattern.permute.xlu1 %v6960_v37 }
 0x1e4   :  { %v6992_v47 = vpop.xlane.xlu0 %2350 }
 0x1e5   :  { %3664 = vperm.xlu0 %4575, %v6923_v52   ;;  %v1341_v53 = vpop.f32.mrf.mxu2  ;;  %8576 = vst [vmem:[#allocation114_spill] sm:$0xff] %v6992_v47 }
 0x1e6   :  { %v1342_v16 = vadd.f32 %v1341_v53, %v275_v6  ;;  %v4629_v53 = vpop.eup %4628 }
 0x1e7   :  { %vm3408_vm1 = vweird.f32 %v4629_v53 }
 0x1e8   :  { %v1442_v1 = vpop.f32.mrf.mxu3  ;;  %vm3409_vm3 = vmor %vm3407_vm2, %vm3408_vm1 }
 0x1e9   :  { %v1443_v19 = vadd.f32 %v1442_v1, %v1342_v16  ;;  %4519 = vset.pattern.permute.xlu2 %v6788_v22  ;;  %v6984_v16 = vpop.xlane.xlu1 %2308  ;;  %v3402_v1 = vmul.f32 %v4629_v53, %v2860_v34  ;;  %v2359_v34 = vmul.f32 %v6572_v51, %v5563_v54 }
 0x1ea   :  { %8574 = vst [vmem:[#allocation112_spill] sm:$0xff] %v6984_v16 }
 0x1eb   :  { %2527 = vperm.xlu1 %4520, %v6972_v14   ;;  %v1496_v55 = vpop.f32.mrf.mxu0 }
 0x1ec   :  { %v1497_v43 = vadd.f32 %v1496_v55, %v1443_v19  ;;  %v3403_v55 = vmul.f32 %v4629_v53, %v3402_v1 }
 0x1ed   :  { %4580 = vset.pattern.permute.xlu0 %v6836_v15  ;;  %v1535_v10 = vpop.f32.mrf.mxu1 }
 0x1ee   :  { %v1536_v63 = vadd.f32 %v1535_v10, %v1497_v43  ;;  %v6995_v43 = vpop.xlane.xlu2 %2347 }
 0x1ef   :  { %v1604_v6 = vpop.f32.mrf.mxu2  ;;  %8577 = vst [vmem:[#allocation115_spill] sm:$0xff] %v6995_v43 }
 0x1f0   :  { %v1605_v12 = vadd.f32 %v1604_v6, %v1536_v63  ;;  %v3404_v63 = vmul.f32 0.5, %v3403_v55  ;;  %v2366_v55 = vmul.f32 %v6689_v48, %v5563_v54  ;;  %v2811_v48 = vadd.f32 1e-05, %v2359_v34 }
 0x1f1   :  { %2521 = vperm.xlu2 %4519, %v6972_v14   ;;  %v2364_v34 = vmul.f32 %v6804_v3, %v5563_v54 }
 0x1f2   :  { %v1641_v30 = vpop.f32.mrf.mxu3  ;;  %v3405_v6 = vsub.f32 1.5, %v3404_v63  ;;  %vm2917_vm8 = vweird.f32 %v2811_v48 }
 0x1f3   :  { %v6986_v4 = vadd.f32 %v1641_v30, %v1605_v12  ;;  %4522 = vset.pattern.permute.xlu1 %v6858_v39  ;;  %v7000_v12 = vadd.s32 64, %v6788_v22  ;;  %v7002_v30 = vpop.xlane.xlu1 %2317  ;;  %v7042_v42 = vadd.f32 1e-05, %v2364_v34 }
 0x1f4   :  { %8578 = vst [vmem:[#allocation116_spill] sm:$0xff] %v7002_v30  ;;  %v3406_v43 = vmul.f32 %v4629_v53, %v3405_v6 }
 0x1f5   :  { %v6990_v19 = vperm.slane %v6986_v4, 0  ;;  %vm2967_vm11 = vweird.f32 %v7042_v42 }
 0x1f6   :  { %v7007_v1 = vpop.permute.xlu2 %2424 }
 0x1f7   :  { %8575 = vst [vmem:[#allocation113_spill] sm:$0xff] %v6990_v19  ;;  %3695 = vperm.xlu0 %4580, %v6990_v19   ;;  %v7004_v10 = vpop.permute.xlu0 %2715 }
 0x1f8   :  { %8579 = vst [vmem:[#allocation117_spill] sm:$0xff] %v7004_v10  ;;  %v3410_v10 = vsel %vm3409_vm3, %v4629_v53, %v3406_v43  ;;  %v7030_v53 = vadd.s32 104, %v6788_v22 }
 0x1f9   :  { %4521 = vset.pattern.permute.xlu2 %v6836_v15  ;;  %8580 = vst [vmem:[#allocation118_spill] sm:$0xff] %v7007_v1  ;;  %v2818_v1 = vadd.f32 1e-05, %v2366_v55 }
 0x1fa   :  { %8584 = vst [vmem:[#allocation122_spill] sm:$0xff] %v7030_v53 }
 0x1fb   :  { %2545 = vperm.xlu1 %4522, %v6972_v14   ;;  %v7013_v16 = vpop.xlane.xlu1 %2326  ;;  %4630 = vrsqrt.f32 %v2818_v1  ;;  %vm2987_vm5 = vweird.f32 %v2818_v1 }
 0x1fc   :  { %4632 = vrsqrt.f32 %v2811_v48 }
 0x1fd   :  { %4634 = vrsqrt.f32 %v7042_v42 }
 0x1fe   :  { %v7022_v6 = vpop.permute.xlu2 %2442 }
 0x1ff   :  { %4581 = vset.pattern.permute.xlu0 %v7000_v12  ;;  %8582 = vst [vmem:[#allocation120_spill] sm:$0xff] %v7022_v6 }
 0x201   :  { %2539 = vperm.xlu2 %4521, %v6972_v14  }
 0x203   :  { %4524 = vset.pattern.permute.xlu1 %v6881_v61  ;;  %v7025_v2 = vpop.xlane.xlu1 %2335 }
 0x204   :  { %8583 = vst [vmem:[#allocation121_spill] sm:$0xff] %v7025_v2 }
 0x206   :  { %v2449_v43 = vpop.permute.xlu2 %2448 }
 0x207   :  { %2472 = vperm.xlu0 %4581, %v6822_v9   ;;  %v2746_v30 = vpop.permute.xlu0 %2745 }
 0x208   :  { %v7016_v63 = vmul.f32 %v3410_v10, %v2746_v30  ;;  %v4631_v30 = vpop.eup %4630 }
 0x209   :  { %4523 = vset.pattern.permute.xlu2 %v6841_v46  ;;  %v2982_v51 = vmul.f32 %v4631_v30, %v2818_v1  ;;  %v4633_v10 = vpop.eup %4632  ;;  %vm2988_vm4 = vweird.f32 %v4631_v30 }
 0x20a   :  { %8581 = vst [vmem:[#allocation119_spill] sm:$0xff] %v7016_v63  ;;  %v2912_v6 = vmul.f32 %v4633_v10, %v2811_v48  ;;  %vm2989_vm6 = vmor %vm2987_vm5, %vm2988_vm4  ;;  %vm2918_vm7 = vweird.f32 %v4633_v10  ;;  %v8592_v48 = vld [vmem:[#allocation40_spill] sm:$0xff] }
 0x20b   :  { %2557 = vperm.xlu1 %4524, %v6972_v14   ;;  %v7034_v55 = vpop.xlane.xlu1 %2344  ;;  %v2983_v63 = vmul.f32 %v4631_v30, %v2982_v51  ;;  %vm2919_vm9 = vmor %vm2917_vm8, %vm2918_vm7 }
 0x20c   :  { %8585 = vst [vmem:[#allocation123_spill] sm:$0xff] %v7034_v55  ;;  %v2913_v13 = vmul.f32 %v4633_v10, %v2912_v6  ;;  %v4635_v6 = vpop.eup %4634 }
 0x20d   :  { %v2984_v47 = vmul.f32 0.5, %v2983_v63  ;;  %vm2968_vm10 = vweird.f32 %v4635_v6 }
 0x20e   :  { %v7039_v2 = vpop.permute.xlu2 %2460  ;;  %v2914_v3 = vmul.f32 0.5, %v2913_v13  ;;  %vm2969_vm12 = vmor %vm2967_vm11, %vm2968_vm10 }
 0x20f   :  { %3725 = vperm.xlu0 %4581, %v6990_v19   ;;  %8586 = vst [vmem:[#allocation124_spill] sm:$0xff] %v7039_v2  ;;  %v2985_v8 = vsub.f32 1.5, %v2984_v47  ;;  %v2369_v47 = vmul.f32 %v6731_v11, %v5563_v54 }
 0x210   :  { %v2915_v63 = vsub.f32 1.5, %v2914_v3 }
 0x211   :  { %2551 = vperm.xlu2 %4523, %v6972_v14   ;;  %v2986_v34 = vmul.f32 %v4631_v30, %v2985_v8  ;;  %v7066_v1 = vadd.f32 1e-05, %v2369_v47  ;;  %v2372_v47 = vmul.f32 %v6777_v18, %v5563_v54 }
 0x213   :  { %4526 = vset.pattern.permute.xlu1 %v6904_v59  ;;  %v7049_v51 = vpop.xlane.xlu1 %2353  ;;  %v2990_v50 = vsel %vm2989_vm6, %v4631_v30, %v2986_v34  ;;  %4636 = vrsqrt.f32 %v7066_v1  ;;  %vm3017_vm14 = vweird.f32 %v7066_v1 }
 0x214   :  { %8587 = vst [vmem:[#allocation125_spill] sm:$0xff] %v7049_v51  ;;  %v2962_v51 = vmul.f32 %v4635_v6, %v7042_v42  ;;  %v8595_v42 = vld [vmem:[#allocation27_spill] sm:$0xff] }
 0x216   :  { %v2963_v26 = vmul.f32 %v4635_v6, %v2962_v51  ;;  %v4884_v51 = vld [vmem:[#allocation2 + $0x40] sm:$0xff] }
 0x217   :  { %4586 = vset.pattern.permute.xlu0 %v7030_v53  ;;  %v7051_v2 = vpop.permute.xlu0 %2775 }
 0x218   :  { %8588 = vst [vmem:[#allocation126_spill] sm:$0xff] %v7051_v2  ;;  %v2916_v2 = vmul.f32 %v4633_v10, %v2915_v63 }
 0x219   :  { %4525 = vset.pattern.permute.xlu2 %v7000_v12 }
 0x21a   :  { %v2920_v11 = vsel %vm2919_vm9, %v4633_v10, %v2916_v2 }
 0x21b   :  { %2575 = vperm.xlu1 %4526, %v6972_v14   ;;  %v7047_v55 = vpop.permute.xlu2 %2478  ;;  %v3515_v7 = vmul.f32 %v2920_v11, %v2449_v43  ;;  %v4885_v43 = vld [vmem:[#allocation2 + $0x48] sm:$0xff] }
 0x21d   :  { %v3967_v34 = vmul.f32 %v3515_v7, %v8592_v48  ;;  %v4099_v2 = vmul.f32 %v4884_v51, %v3515_v7  ;;  %v4100_v10 = vmul.f32 %v4885_v43, %v3515_v7  ;;  %v7082_v48 = vadd.f32 1e-05, %v2372_v47 }
 0x21e   :  { %v2375_v43 = vmul.f32 %v6801_v23, %v5563_v54 }
 0x21f   :  { %2502 = vperm.xlu0 %4586, %v6822_v9   ;;  %4638 = vrsqrt.f32 %v7082_v48  ;;  %vm3047_vm1 = vweird.f32 %v7082_v48 }
 0x220   :  { %v7115_v23 = vadd.f32 1e-05, %v2375_v43 }
 0x221   :  { %2569 = vperm.xlu2 %4525, %v6972_v14  }
 0x222   :  { %vm3077_vm7 = vweird.f32 %v7115_v23 }
 0x223   :  { %4528 = vset.pattern.permute.xlu1 %v6933_v33 }
 0x227   :  { %3755 = vperm.xlu0 %4586, %v6990_v19   ;;  %v7059_v19 = vpop.permute.xlu1 %2436  ;;  %v7063_v3 = vpop.permute.xlu0 %2805 }
 0x228   :  { %8589 = vst [vmem:[#allocation127_spill] sm:$0xff] %v7059_v19 }
 0x229   :  { %4527 = vset.pattern.permute.xlu2 %v6863_v17  ;;  %8591 = vst [vmem:[#allocation129_spill] sm:$0xff] %v7063_v3  ;;  %v4637_v3 = vpop.eup %4636 }
 0x22a   :  { %v3012_v18 = vmul.f32 %v4637_v3, %v7066_v1  ;;  %vm3018_vm13 = vweird.f32 %v4637_v3 }
 0x22b   :  { %2587 = vperm.xlu1 %4528, %v6972_v14   ;;  %v2491_v13 = vpop.permute.xlu2 %2490  ;;  %vm3019_vm15 = vmor %vm3017_vm14, %vm3018_vm13 }
 0x22c   :  { %v7061_v8 = vmul.f32 %v2990_v50, %v2491_v13  ;;  %v2964_v50 = vmul.f32 0.5, %v2963_v26  ;;  %v7079_v26 = vperm.slane %v6915_v62, 1  ;;  %v3013_v62 = vmul.f32 %v4637_v3, %v3012_v18 }
 0x22e   :  { %8590 = vst [vmem:[#allocation128_spill] sm:$0xff] %v7061_v8  ;;  %v2965_v11 = vsub.f32 1.5, %v2964_v50  ;;  %v2374_v50 = vmul.f32 %v6786_v25, %v5563_v54  ;;  %v7099_v25 = vpop.eup %4638 }
 0x22f   :  { %4591 = vset.pattern.permute.xlu0 %v6798_v56  ;;  %v7071_v30 = vpop.permute.xlu1 %2454  ;;  %vm3048_vm0 = vweird.f32 %v7099_v25 }
 0x230   :  { %v2966_v51 = vmul.f32 %v4635_v6, %v2965_v11  ;;  %vm3049_vm2 = vmor %vm3047_vm1, %vm3048_vm0 }
 0x231   :  { %2581 = vperm.xlu2 %4527, %v6972_v14  }
 0x233   :  { %4530 = vset.pattern.permute.xlu1 %v6950_v57 }
 0x237   :  { %2533 = vperm.xlu0 %4591, %v6972_v14   ;;  %v3605_v63 = vpop.permute.xlu0 %3604  ;;  %v7085_v7 = vpop.permute.xlu1 %2466 }
 0x238   :  { %v4031_v13 = vsub.f32 %v3605_v63, %v3967_v34  ;;  %8593 = vst [vmem:[#allocation40_spill] sm:$0xff] %v7085_v7  ;;  %v2970_v34 = vsel %vm2969_vm12, %v4635_v6, %v2966_v51  ;;  %v3042_v51 = vmul.f32 %v7099_v25, %v7082_v48 }
 0x239   :  { %4529 = vset.pattern.permute.xlu2 %v7030_v53  ;;  %v3520_v63 = vmul.f32 %v2970_v34, %v7047_v55  ;;  %v4886_v55 = vld [vmem:[#allocation2 + $0x90] sm:$0xff] }
 0x23a   :  { %v4227_v8 = vadd.f32 %v4099_v2, %v4031_v13  ;;  %v4228_v19 = vadd.f32 %v4100_v10, %v4031_v13  ;;  %v4887_v13 = vld [vmem:[#allocation2 + $0x98] sm:$0xff] }
 0x23b   :  { %2605 = vperm.xlu1 %4530, %v6972_v14   ;;  %v3972_v2 = vmul.f32 %v3520_v63, %v8595_v42  ;;  %v4109_v10 = vmul.f32 %v4886_v55, %v3520_v63  ;;  %v4110_v11 = vmul.f32 %v4887_v13, %v3520_v63  ;;  %v3043_v63 = vmul.f32 %v7099_v25, %v3042_v51 }
 0x23c   :  { %4355 = vst [vmem:[#allocation10 + $0x40] sm:$0xff] %v4227_v8  ;;  %v7092_v8 = vadd.f32 1e-05, %v2374_v50  ;;  %v7109_v50 = vperm.slane %v6815_v24, 1 }
 0x23d   :  { %4356 = vst [vmem:[#allocation10 + $0x48] sm:$0xff] %v4228_v19  ;;  %v3014_v19 = vmul.f32 0.5, %v3013_v62  ;;  %v3044_v43 = vmul.f32 0.5, %v3043_v63 }
 0x23e   :  { %4640 = vrsqrt.f32 %v7092_v8  ;;  %vm3067_vm4 = vweird.f32 %v7092_v8 }
 0x23f   :  { %3786 = vperm.xlu0 %4591, %v7079_v26   ;;  %v7097_v47 = vpop.permute.xlu1 %2484  ;;  %v3015_v62 = vsub.f32 1.5, %v3014_v19  ;;  %v2509_v19 = vpop.permute.xlu2 %2508  ;;  %4642 = vrsqrt.f32 %v7115_v23  ;;  %v3045_v1 = vsub.f32 1.5, %v3044_v43 }
 0x240   :  { %8594 = vst [vmem:[#allocation130_spill] sm:$0xff] %v7097_v47 }
 0x241   :  { %2599 = vperm.xlu2 %4529, %v6972_v14  }
 0x243   :  { %4532 = vset.pattern.permute.xlu1 %v6788_v22 }
 0x244   :  { %v7113_v47 = vpop.eup %4640 }
 0x245   :  { %v3062_v24 = vmul.f32 %v7113_v47, %v7092_v8  ;;  %v7132_v51 = vpop.eup %4642  ;;  %vm3068_vm3 = vweird.f32 %v7113_v47 }
 0x246   :  { %v3072_v43 = vmul.f32 %v7132_v51, %v7115_v23  ;;  %vm3069_vm5 = vmor %vm3067_vm4, %vm3068_vm3  ;;  %vm3078_vm6 = vweird.f32 %v7132_v51 }
 0x247   :  { %4596 = vset.pattern.permute.xlu0 %v6873_v38  ;;  %v3635_v6 = vpop.permute.xlu0 %3634  ;;  %v3063_v13 = vmul.f32 %v7113_v47, %v3062_v24  ;;  %v4888_v24 = vld [vmem:[#allocation2 + $0xe0] sm:$0xff]  ;;  %vm3079_vm8 = vmor %vm3077_vm7, %vm3078_vm6 }
 0x248   :  { %v4036_v18 = vsub.f32 %v3635_v6, %v3972_v2  ;;  %v3016_v2 = vmul.f32 %v4637_v3, %v3015_v62  ;;  %v7118_v6 = vpop.permute.xlu1 %2496  ;;  %v8598_v62 = vld [vmem:[#allocation18_spill] sm:$0xff] }
 0x249   :  { %4531 = vset.pattern.permute.xlu2 %v6888_v36  ;;  %8596 = vst [vmem:[#allocation27_spill] sm:$0xff] %v7118_v6  ;;  %v3064_v63 = vmul.f32 0.5, %v3063_v13 }
 0x24a   :  { %v4237_v34 = vadd.f32 %v4109_v10, %v4036_v18  ;;  %v4238_v42 = vadd.f32 %v4110_v11, %v4036_v18  ;;  %v3020_v55 = vsel %vm3019_vm15, %v4637_v3, %v3016_v2  ;;  %v2363_v11 = vmul.f32 %v6656_v35, %v5563_v54 }
 0x24b   :  { %2618 = vperm.xlu1 %4532, %v7109_v50   ;;  %v3525_v10 = vmul.f32 %v3020_v55, %v2509_v19  ;;  %v2379_v3 = vmul.f32 %v6876_v44, %v5563_v54  ;;  %v4889_v55 = vld [vmem:[#allocation2 + $0xe8] sm:$0xff] }
 0x24c   :  { %4365 = vst [vmem:[#allocation10 + $0x90] sm:$0xff] %v4237_v34  ;;  %v7138_v2 = vadd.f32 1e-05, %v2363_v11  ;;  %v3065_v11 = vsub.f32 1.5, %v3064_v63 }
 0x24d   :  { %4366 = vst [vmem:[#allocation10 + $0x98] sm:$0xff] %v4238_v42  ;;  %v3977_v34 = vmul.f32 %v3525_v10, %v8598_v62  ;;  %v4119_v19 = vmul.f32 %v4888_v24, %v3525_v10  ;;  %v4120_v35 = vmul.f32 %v4889_v55, %v3525_v10  ;;  %v3046_v62 = vmul.f32 %v7099_v25, %v3045_v1 }
 0x24e   :  { %v7147_v13 = vadd.f32 1e-05, %v2379_v3  ;;  %4644 = vrsqrt.f32 %v7138_v2  ;;  %v3073_v10 = vmul.f32 %v7132_v51, %v3072_v43  ;;  %v3066_v3 = vmul.f32 %v7113_v47, %v3065_v11  ;;  %v8599_v43 = vld [vmem:[#allocation28_spill] sm:$0xff] }
 0x24f   :  { %2563 = vperm.xlu0 %4596, %v6972_v14   ;;  %vm2957_vm10 = vweird.f32 %v7138_v2 }
 0x250   :  { %v7130_v18 = vpop.permute.xlu1 %2514  ;;  %4646 = vrsqrt.f32 %v7147_v13  ;;  %v3074_v48 = vmul.f32 0.5, %v3073_v10  ;;  %v4890_v10 = vld [vmem:[#allocation2 + $0x130] sm:$0xff]  ;;  %vm3117_vm13 = vweird.f32 %v7147_v13 }
 0x251   :  { %2611 = vperm.xlu2 %4531, %v6972_v14   ;;  %8597 = vst [vmem:[#allocation131_spill] sm:$0xff] %v7130_v18  ;;  %v7142_v18 = vpop.permute.xlu2 %2521 }
 0x252   :  { %v3075_v55 = vsub.f32 1.5, %v3074_v48 }
 0x253   :  { %4534 = vset.pattern.permute.xlu1 %v6836_v15 }
 0x254   :  { %v4645_v63 = vpop.eup %4644 }
 0x255   :  { %vm2958_vm9 = vweird.f32 %v4645_v63 }
 0x256   :  { %v4647_v24 = vpop.eup %4646  ;;  %vm2959_vm11 = vmor %vm2957_vm10, %vm2958_vm9 }
 0x257   :  { %3816 = vperm.xlu0 %4596, %v7079_v26   ;;  %v3665_v42 = vpop.permute.xlu0 %3664  ;;  %v3112_v8 = vmul.f32 %v4647_v24, %v7147_v13  ;;  %vm3118_vm12 = vweird.f32 %v4647_v24 }
 0x258   :  { %v4041_v6 = vsub.f32 %v3665_v42, %v3977_v34  ;;  %v3050_v34 = vsel %vm3049_vm2, %v7099_v25, %v3046_v62  ;;  %vm3119_vm14 = vmor %vm3117_vm13, %vm3118_vm12 }
 0x259   :  { %4533 = vset.pattern.permute.xlu2 %v6798_v56 }
 0x25a   :  { %v4247_v44 = vadd.f32 %v4119_v19, %v4041_v6  ;;  %v4248_v7 = vadd.f32 %v4120_v35, %v4041_v6  ;;  %v2952_v19 = vmul.f32 %v4645_v63, %v7138_v2  ;;  %v2381_v35 = vmul.f32 %v6826_v5, %v5563_v54 }
 0x25b   :  { %2636 = vperm.xlu1 %4534, %v7109_v50   ;;  %v2540_v42 = vpop.permute.xlu2 %2539 }
 0x25c   :  { %4375 = vst [vmem:[#allocation10 + $0xe0] sm:$0xff] %v4247_v44  ;;  %v2953_v44 = vmul.f32 %v4645_v63, %v2952_v19  ;;  %v7173_v5 = vadd.f32 1e-05, %v2381_v35 }
 0x25d   :  { %4376 = vst [vmem:[#allocation10 + $0xe8] sm:$0xff] %v4248_v7  ;;  %v2528_v1 = vpop.permute.xlu1 %2527  ;;  %v3070_v7 = vsel %vm3069_vm5, %v7113_v47, %v3066_v3  ;;  %v3076_v47 = vmul.f32 %v7132_v51, %v3075_v55 }
 0x25e   :  { %v7154_v6 = vmul.f32 %v3050_v34, %v2528_v1  ;;  %v3530_v25 = vmul.f32 %v3070_v7, %v2540_v42  ;;  %v4891_v34 = vld [vmem:[#allocation2 + $0x138] sm:$0xff]  ;;  %v2954_v19 = vmul.f32 0.5, %v2953_v44  ;;  %4648 = vrsqrt.f32 %v7173_v5 }
 0x25f   :  { %4601 = vset.pattern.permute.xlu0 %v6918_v20  ;;  %vm3137_vm0 = vweird.f32 %v7173_v5 }
 0x260   :  { %v3982_v62 = vmul.f32 %v3530_v25, %v8599_v43  ;;  %v4129_v1 = vmul.f32 %v4890_v10, %v3530_v25  ;;  %v4130_v3 = vmul.f32 %v4891_v34, %v3530_v25  ;;  %v3080_v43 = vsel %vm3079_vm8, %v7132_v51, %v3076_v47 }
 0x261   :  { %2630 = vperm.xlu2 %4533, %v7109_v50   ;;  %v2955_v35 = vsub.f32 1.5, %v2954_v19  ;;  %v2384_v51 = vmul.f32 %v6838_v40, %v5563_v54 }
 0x263   :  { %4536 = vset.pattern.permute.xlu1 %v6841_v46  ;;  %v2956_v44 = vmul.f32 %v4645_v63, %v2955_v35  ;;  %v4893_v35 = vld [vmem:[#allocation2 + $0x188] sm:$0xff] }
 0x267   :  { %2593 = vperm.xlu0 %4601, %v6972_v14   ;;  %v3113_v14 = vmul.f32 %v4647_v24, %v3112_v8 }
 0x269   :  { %v3696_v11 = vpop.permute.xlu0 %3695  ;;  %4535 = vset.pattern.permute.xlu2 %v6858_v39  ;;  %v3114_v25 = vmul.f32 0.5, %v3113_v14 }
 0x26a   :  { %v4046_v48 = vsub.f32 %v3696_v11, %v3982_v62  ;;  %v4649_v62 = vpop.eup %4648 }
 0x26b   :  { %2648 = vperm.xlu1 %4536, %v7109_v50   ;;  %v7184_v23 = vpop.permute.xlu2 %2551  ;;  %v3115_v8 = vsub.f32 1.5, %v3114_v25  ;;  %v3132_v11 = vmul.f32 %v4649_v62, %v7173_v5  ;;  %vm3138_vm15 = vweird.f32 %v4649_v62 }
 0x26c   :  { %v4257_v42 = vadd.f32 %v4129_v1, %v4046_v48  ;;  %v4258_v7 = vadd.f32 %v4130_v3, %v4046_v48  ;;  %v2960_v1 = vsel %vm2959_vm11, %v4645_v63, %v2956_v44  ;;  %v2836_v48 = vadd.f32 1e-05, %v2384_v51  ;;  %vm3139_vm1 = vmor %vm3137_vm0, %vm3138_vm15 }
 0x26d   :  { %v2546_v55 = vpop.permute.xlu1 %2545  ;;  %v3116_v47 = vmul.f32 %v4647_v24, %v3115_v8  ;;  %v3133_v40 = vmul.f32 %v4649_v62, %v3132_v11 }
 0x26e   :  { %4385 = vst [vmem:[#allocation10 + $0x130] sm:$0xff] %v4257_v42  ;;  %v7178_v10 = vmul.f32 %v3080_v43, %v2546_v55  ;;  %4650 = vrsqrt.f32 %v2836_v48  ;;  %v4892_v43 = vld [vmem:[#allocation2 + $0x180] sm:$0xff]  ;;  %vm3167_vm3 = vweird.f32 %v2836_v48 }
 0x26f   :  { %4386 = vst [vmem:[#allocation10 + $0x138] sm:$0xff] %v4258_v7  ;;  %3846 = vperm.xlu0 %4601, %v7079_v26   ;;  %v3120_v2 = vsel %vm3119_vm14, %v4647_v24, %v3116_v47  ;;  %v8600_v7 = vld [vmem:[#allocation45_spill] sm:$0xff]  ;;  %v3134_v19 = vmul.f32 0.5, %v3133_v40 }
 0x271   :  { %2642 = vperm.xlu2 %4535, %v7109_v50   ;;  %v3135_v24 = vsub.f32 1.5, %v3134_v19 }
 0x273   :  { %4538 = vset.pattern.permute.xlu1 %v7000_v12  ;;  %v3136_v47 = vmul.f32 %v4649_v62, %v3135_v24  ;;  %v4895_v24 = vld [vmem:[#allocation2 + $0x1d8] sm:$0xff] }
 0x274   :  { %v4651_v11 = vpop.eup %4650 }
 0x275   :  { %vm3168_vm2 = vweird.f32 %v4651_v11 }
 0x276   :  { %vm3169_vm4 = vmor %vm3167_vm3, %vm3168_vm2 }
 0x277   :  { %4606 = vset.pattern.permute.xlu0 %v6960_v37 }
 0x279   :  { %v2473_v34 = vpop.permute.xlu0 %2472  ;;  %4537 = vset.pattern.permute.xlu2 %v6873_v38 }
 0x27a   :  { %v7191_v3 = vmul.f32 %v2960_v1, %v2473_v34  ;;  %v7204_v1 = vperm.slane %v6986_v4, 1  ;;  %v2389_v4 = vmul.f32 %v6870_v31, %v5563_v54 }
 0x27b   :  { %2666 = vperm.xlu1 %4538, %v7109_v50   ;;  %v2570_v14 = vpop.permute.xlu2 %2569 }
 0x27c   :  { %v3535_v42 = vmul.f32 %v3120_v2, %v2570_v14  ;;  %8601 = vst [vmem:[#allocation18_spill] sm:$0xff] %v7204_v1  ;;  %v3140_v14 = vsel %vm3139_vm1, %v4649_v62, %v3136_v47  ;;  %v2387_v62 = vmul.f32 %v6852_v0, %v5563_v54  ;;  %v7220_v19 = vadd.f32 1e-05, %v2389_v4 }
 0x27e   :  { %v3987_v63 = vmul.f32 %v3535_v42, %v8600_v7  ;;  %v4139_v25 = vmul.f32 %v4892_v43, %v3535_v42  ;;  %v4140_v8 = vmul.f32 %v4893_v35, %v3535_v42  ;;  %v7225_v43 = vadd.f32 1e-05, %v2387_v62  ;;  %v7227_v35 = vpop.permute.xlu1 %2557 }
 0x27f   :  { %2430 = vperm.xlu0 %4606, %v6822_v9   ;;  %v3162_v9 = vmul.f32 %v4651_v11, %v2836_v48  ;;  %4652 = vrsqrt.f32 %v7220_v19  ;;  %v8602_v48 = vld [vmem:[#allocation49_spill] sm:$0xff]  ;;  %vm3217_vm7 = vweird.f32 %v7220_v19 }
 0x280   :  { %4654 = vrsqrt.f32 %v7225_v43  ;;  %vm3197_vm9 = vweird.f32 %v7225_v43 }
 0x281   :  { %v3726_v55 = vpop.permute.xlu0 %3725  ;;  %2660 = vperm.xlu2 %4537, %v7109_v50   ;;  %v3163_v34 = vmul.f32 %v4651_v11, %v3162_v9 }
 0x282   :  { %v4051_v13 = vsub.f32 %v3726_v55, %v3987_v63  ;;  %v2378_v55 = vmul.f32 %v6813_v49, %v5563_v54 }
 0x283   :  { %4540 = vset.pattern.permute.xlu1 %v6863_v17  ;;  %v3164_v42 = vmul.f32 0.5, %v3163_v34 }
 0x284   :  { %v4267_v44 = vadd.f32 %v4139_v25, %v4051_v13  ;;  %v4268_v51 = vadd.f32 %v4140_v8, %v4051_v13 }
 0x285   :  { %v3165_v7 = vsub.f32 1.5, %v3164_v42 }
 0x286   :  { %4395 = vst [vmem:[#allocation10 + $0x180] sm:$0xff] %v4267_v44  ;;  %v7232_v44 = vadd.f32 1e-05, %v2378_v55 }
 0x287   :  { %4396 = vst [vmem:[#allocation10 + $0x188] sm:$0xff] %v4268_v51  ;;  %2624 = vperm.xlu0 %4606, %v7109_v50   ;;  %v3166_v63 = vmul.f32 %v4651_v11, %v3165_v7  ;;  %v4894_v51 = vld [vmem:[#allocation2 + $0x1d0] sm:$0xff]  ;;  %v2390_v7 = vmul.f32 %v6867_v58, %v5563_v54 }
 0x288   :  { %4656 = vrsqrt.f32 %v7232_v44  ;;  %vm3107_vm12 = vweird.f32 %v7232_v44 }
 0x289   :  { %4539 = vset.pattern.permute.xlu2 %v6904_v59  ;;  %v3170_v25 = vsel %vm3169_vm4, %v4651_v11, %v3166_v63  ;;  %v7246_v55 = vadd.f32 1e-05, %v2390_v7  ;;  %v2394_v7 = vmul.f32 %v6946_v45, %v5563_v54 }
 0x28b   :  { %2678 = vperm.xlu1 %4540, %v7109_v50   ;;  %v2582_v40 = vpop.permute.xlu2 %2581  ;;  %4658 = vrsqrt.f32 %v7246_v55  ;;  %vm3227_vm15 = vweird.f32 %v7246_v55 }
 0x28c   :  { %v7207_v2 = vmul.f32 %v3140_v14, %v2582_v40  ;;  %v4653_v40 = vpop.eup %4652 }
 0x28d   :  { %v7238_v14 = vpop.permute.xlu1 %2575  ;;  %v4655_v42 = vpop.eup %4654  ;;  %v3212_v4 = vmul.f32 %v4653_v40, %v7220_v19  ;;  %vm3218_vm5 = vweird.f32 %v4653_v40  ;;  %v8605_v19 = vld [vmem:[#allocation58_spill] sm:$0xff] }
 0x28e   :  { %v3192_v62 = vmul.f32 %v4655_v42, %v7225_v43  ;;  %v4657_v63 = vpop.eup %4656  ;;  %vm3198_vm6 = vweird.f32 %v4655_v42  ;;  %vm3219_vm8 = vmor %vm3217_vm7, %vm3218_vm5 }
 0x28f   :  { %3877 = vperm.xlu0 %4606, %v7204_v1   ;;  %vm3199_vm10 = vmor %vm3197_vm9, %vm3198_vm6  ;;  %vm3108_vm11 = vweird.f32 %v4657_v63 }
 0x290   :  { %vm3109_vm13 = vmor %vm3107_vm12, %vm3108_vm11 }
 0x291   :  { %2672 = vperm.xlu2 %4539, %v7109_v50   ;;  %v7212_v5 = vpop.permute.xlu0 %2502 }
 0x293   :  { %4542 = vset.pattern.permute.xlu1 %v7030_v53 }
 0x297   :  { %4611 = vset.pattern.permute.xlu0 %v6881_v61 }
 0x299   :  { %4541 = vset.pattern.permute.xlu2 %v6918_v20  ;;  %v3756_v8 = vpop.permute.xlu0 %3755 }
 0x29b   :  { %2696 = vperm.xlu1 %4542, %v7109_v50   ;;  %v2600_v31 = vpop.permute.xlu2 %2599 }
 0x29c   :  { %v3540_v0 = vmul.f32 %v3170_v25, %v2600_v31  ;;  %v3213_v31 = vmul.f32 %v4653_v40, %v3212_v4  ;;  %v3102_v25 = vmul.f32 %v4657_v63, %v7232_v44 }
 0x29e   :  { %v3992_v13 = vmul.f32 %v3540_v0, %v8602_v48  ;;  %v4149_v49 = vmul.f32 %v4894_v51, %v3540_v0  ;;  %v4150_v9 = vmul.f32 %v4895_v24, %v3540_v0  ;;  %v3193_v0 = vmul.f32 %v4655_v42, %v3192_v62 }
 0x29f   :  { %2654 = vperm.xlu0 %4611, %v7109_v50   ;;  %v3214_v48 = vmul.f32 0.5, %v3213_v31 }
 0x2a0   :  { %v4056_v47 = vsub.f32 %v3756_v8, %v3992_v13  ;;  %v7250_v8 = vpop.permute.xlu1 %2587  ;;  %v3103_v13 = vmul.f32 %v4657_v63, %v3102_v25  ;;  %v3194_v51 = vmul.f32 0.5, %v3193_v0 }
 0x2a1   :  { %2690 = vperm.xlu2 %4541, %v7109_v50   ;;  %v3215_v24 = vsub.f32 1.5, %v3214_v48  ;;  %v7271_v48 = vadd.f32 1e-05, %v2394_v7 }
 0x2a2   :  { %v4277_v11 = vadd.f32 %v4149_v49, %v4056_v47  ;;  %v4278_v34 = vadd.f32 %v4150_v9, %v4056_v47  ;;  %v7260_v9 = vpop.eup %4658  ;;  %v3104_v47 = vmul.f32 0.5, %v3103_v13 }
 0x2a3   :  { %4544 = vset.pattern.permute.xlu1 %v6888_v36  ;;  %v3222_v62 = vmul.f32 %v7260_v9, %v7246_v55  ;;  %v3216_v31 = vmul.f32 %v4653_v40, %v3215_v24  ;;  %4660 = vrsqrt.f32 %v7271_v48  ;;  %vm3228_vm14 = vweird.f32 %v7260_v9 }
 0x2a4   :  { %4405 = vst [vmem:[#allocation10 + $0x1d0] sm:$0xff] %v4277_v11  ;;  %v3105_v0 = vsub.f32 1.5, %v3104_v47  ;;  %vm3229_vm0 = vmor %vm3227_vm15, %vm3228_vm14  ;;  %v2399_v55 = vmul.f32 %v6909_v60, %v5563_v54  ;;  %vm3267_vm2 = vweird.f32 %v7271_v48 }
 0x2a5   :  { %4406 = vst [vmem:[#allocation10 + $0x1d8] sm:$0xff] %v4278_v34  ;;  %v3195_v34 = vsub.f32 1.5, %v3194_v51  ;;  %v3223_v45 = vmul.f32 %v7260_v9, %v3222_v62  ;;  %v4896_v62 = vld [vmem:[#allocation2 + $0x220] sm:$0xff] }
 0x2a6   :  { %v3106_v47 = vmul.f32 %v4657_v63, %v3105_v0 }
 0x2a7   :  { %3907 = vperm.xlu0 %4611, %v7204_v1   ;;  %v3196_v25 = vmul.f32 %v4655_v42, %v3195_v34  ;;  %v3224_v43 = vmul.f32 0.5, %v3223_v45 }
 0x2a9   :  { %4543 = vset.pattern.permute.xlu2 %v6950_v57  ;;  %v7253_v58 = vpop.permute.xlu0 %2533  ;;  %v3200_v34 = vsel %vm3199_vm10, %v4655_v42, %v3196_v25  ;;  %v3110_v42 = vsel %vm3109_vm13, %v4657_v63, %v3106_v47  ;;  %v4661_v44 = vpop.eup %4660 }
 0x2aa   :  { %v3262_v63 = vmul.f32 %v4661_v44, %v7271_v48  ;;  %vm3268_vm1 = vweird.f32 %v4661_v44 }
 0x2ab   :  { %2708 = vperm.xlu1 %4544, %v7109_v50   ;;  %v7258_v49 = vpop.permute.xlu2 %2611  ;;  %vm3269_vm3 = vmor %vm3267_vm2, %vm3268_vm1 }
 0x2ac   :  { %8603 = vst [vmem:[#allocation28_spill] sm:$0xff] %v7258_v49  ;;  %v3263_v47 = vmul.f32 %v4661_v44, %v3262_v63  ;;  %v8608_v63 = vld [vmem:[#allocation69_spill] sm:$0xff] }
 0x2ad   :  { %v7262_v11 = vpop.permute.xlu1 %2605 }
 0x2af   :  { %4616 = vset.pattern.permute.xlu0 %v6933_v33 }
 0x2b1   :  { %2702 = vperm.xlu2 %4543, %v7109_v50   ;;  %v3787_v4 = vpop.permute.xlu0 %3786 }
 0x2b3   :  { %4547 = vset.pattern.permute.xlu1 %v6798_v56 }
 0x2b7   :  { %2684 = vperm.xlu0 %4616, %v7109_v50   ;;  %v3220_v50 = vsel %vm3219_vm8, %v4653_v40, %v3216_v31 }
 0x2b9   :  { %4546 = vset.pattern.permute.xlu2 %v6960_v37 }
 0x2bb   :  { %2727 = vperm.xlu1 %4547, %v6829_v28   ;;  %v2631_v13 = vpop.permute.xlu2 %2630 }
 0x2bc   :  { %v3545_v51 = vmul.f32 %v3220_v50, %v2631_v13  ;;  %v4897_v50 = vld [vmem:[#allocation2 + $0x228] sm:$0xff] }
 0x2bd   :  { %v2619_v24 = vpop.permute.xlu1 %2618 }
 0x2be   :  { %v7276_v49 = vmul.f32 %v3200_v34, %v2619_v24  ;;  %v3997_v7 = vmul.f32 %v3545_v51, %v8605_v19  ;;  %v4159_v31 = vmul.f32 %v4896_v62, %v3545_v51  ;;  %v4160_v13 = vmul.f32 %v4897_v50, %v3545_v51 }
 0x2bf   :  { %3937 = vperm.xlu0 %4616, %v7204_v1   ;;  %v3225_v19 = vsub.f32 1.5, %v3224_v43 }
 0x2c0   :  { %8604 = vst [vmem:[#allocation45_spill] sm:$0xff] %v7276_v49  ;;  %v4061_v40 = vsub.f32 %v3787_v4, %v3997_v7  ;;  %v2396_v4 = vmul.f32 %v6896_v32, %v5563_v54 }
 0x2c1   :  { %v2564_v25 = vpop.permute.xlu0 %2563  ;;  %2721 = vperm.xlu2 %4546, %v6829_v28   ;;  %v3226_v45 = vmul.f32 %v7260_v9, %v3225_v19 }
 0x2c2   :  { %v7282_v0 = vmul.f32 %v3110_v42, %v2564_v25  ;;  %v4287_v24 = vadd.f32 %v4159_v31, %v4061_v40  ;;  %v4288_v34 = vadd.f32 %v4160_v13, %v4061_v40  ;;  %v2848_v51 = vadd.f32 1e-05, %v2396_v4 }
 0x2c3   :  { %4549 = vset.pattern.permute.xlu1 %v6858_v39  ;;  %v3230_v32 = vsel %vm3229_vm0, %v7260_v9, %v3226_v45  ;;  %v3264_v40 = vmul.f32 0.5, %v3263_v47  ;;  %v2851_v9 = vadd.f32 1e-05, %v2399_v55 }
 0x2c4   :  { %4415 = vst [vmem:[#allocation10 + $0x220] sm:$0xff] %v4287_v24  ;;  %4662 = vrsqrt.f32 %v2848_v51  ;;  %vm3287_vm5 = vweird.f32 %v2848_v51 }
 0x2c5   :  { %4416 = vst [vmem:[#allocation10 + $0x228] sm:$0xff] %v4288_v34  ;;  %v3265_v31 = vsub.f32 1.5, %v3264_v40  ;;  %4664 = vrsqrt.f32 %v2851_v9  ;;  %v4899_v40 = vld [vmem:[#allocation2 + $0x278] sm:$0xff]  ;;  %vm3317_vm8 = vweird.f32 %v2851_v9 }
 0x2c7   :  { %4625 = vset.pattern.permute.xlu0 %v6888_v36  ;;  %v3266_v42 = vmul.f32 %v4661_v44, %v3265_v31 }
 0x2c9   :  { %4548 = vset.pattern.permute.xlu2 %v6836_v15  ;;  %v3817_v25 = vpop.permute.xlu0 %3816  ;;  %v3270_v19 = vsel %vm3269_vm3, %v4661_v44, %v3266_v42 }
 0x2ca   :  { %v4663_v50 = vpop.eup %4662 }
 0x2cb   :  { %2739 = vperm.xlu1 %4549, %v6829_v28   ;;  %v7300_v62 = vpop.permute.xlu2 %2642  ;;  %v3282_v13 = vmul.f32 %v4663_v50, %v2848_v51  ;;  %v4665_v44 = vpop.eup %4664  ;;  %vm3288_vm4 = vweird.f32 %v4663_v50 }
 0x2cc   :  { %8607 = vst [vmem:[#allocation58_spill] sm:$0xff] %v7300_v62  ;;  %v3312_v42 = vmul.f32 %v4665_v44, %v2851_v9  ;;  %vm3289_vm6 = vmor %vm3287_vm5, %vm3288_vm4  ;;  %vm3318_vm7 = vweird.f32 %v4665_v44 }
 0x2cd   :  { %v2637_v7 = vpop.permute.xlu1 %2636  ;;  %v3283_v24 = vmul.f32 %v4663_v50, %v3282_v13  ;;  %vm3319_vm9 = vmor %vm3317_vm8, %vm3318_vm7 }
 0x2ce   :  { %v7296_v43 = vmul.f32 %v3230_v32, %v2637_v7  ;;  %v4898_v7 = vld [vmem:[#allocation2 + $0x270] sm:$0xff] }
 0x2cf   :  { %v3284_v60 = vmul.f32 0.5, %v3283_v24  ;;  %v2393_v24 = vmul.f32 %v6883_v27, %v5563_v54  ;;  %v2402_v27 = vmul.f32 %v6927_v41, %v5563_v54 }
 0x2d0   :  { %8606 = vst [vmem:[#allocation49_spill] sm:$0xff] %v7296_v43 }
 0x2d1   :  { %2733 = vperm.xlu2 %4548, %v6829_v28   ;;  %v3285_v13 = vsub.f32 1.5, %v3284_v60  ;;  %v2845_v60 = vadd.f32 1e-05, %v2393_v24  ;;  %v8612_v24 = vld [vmem:[#allocation72_spill] sm:$0xff] }
 0x2d3   :  { %4552 = vset.pattern.permute.xlu1 %v6873_v38  ;;  %4666 = vrsqrt.f32 %v2845_v60  ;;  %vm3257_vm11 = vweird.f32 %v2845_v60 }
 0x2d9   :  { %4551 = vset.pattern.permute.xlu2 %v6881_v61  ;;  %v7309_v48 = vpop.permute.xlu0 %2593 }
 0x2db   :  { %2757 = vperm.xlu1 %4552, %v6829_v28   ;;  %v2661_v34 = vpop.permute.xlu2 %2660 }
 0x2dc   :  { %v3550_v4 = vmul.f32 %v3270_v19, %v2661_v34  ;;  %v3286_v34 = vmul.f32 %v4663_v50, %v3285_v13  ;;  %v3313_v19 = vmul.f32 %v4665_v44, %v3312_v42 }
 0x2de   :  { %v4002_v45 = vmul.f32 %v3550_v4, %v8608_v63  ;;  %v4169_v32 = vmul.f32 %v4898_v7, %v3550_v4  ;;  %v4170_v31 = vmul.f32 %v4899_v40, %v3550_v4  ;;  %v3290_v63 = vsel %vm3289_vm6, %v4663_v50, %v3286_v34  ;;  %v4667_v50 = vpop.eup %4666 }
 0x2df   :  { %v2404_v7 = vmul.f32 %v6942_v29, %v5563_v54  ;;  %v3252_v42 = vmul.f32 %v4667_v50, %v2845_v60  ;;  %v7332_v29 = vpop.permute.xlu1 %2648  ;;  %vm3258_vm10 = vweird.f32 %v4667_v50 }
 0x2e0   :  { %v4066_v47 = vsub.f32 %v3817_v25, %v4002_v45  ;;  %8610 = vst [vmem:[#allocation132_spill] sm:$0xff] %v7332_v29  ;;  %vm3259_vm12 = vmor %vm3257_vm11, %vm3258_vm10 }
 0x2e1   :  { %2751 = vperm.xlu2 %4551, %v6829_v28   ;;  %v3847_v25 = vpop.permute.xlu0 %3846  ;;  %v7327_v40 = vadd.f32 1e-05, %v2404_v7  ;;  %v3253_v9 = vmul.f32 %v4667_v50, %v3252_v42  ;;  %v2405_v42 = vmul.f32 %v6940_v21, %v5563_v54 }
 0x2e2   :  { %v4297_v55 = vadd.f32 %v4169_v32, %v4066_v47  ;;  %v4298_v62 = vadd.f32 %v4170_v31, %v4066_v47  ;;  %v7330_v31 = vadd.f32 1e-05, %v2402_v27 }
 0x2e3   :  { %4554 = vset.pattern.permute.xlu1 %v6904_v59  ;;  %4668 = vrsqrt.f32 %v7327_v40  ;;  %vm3367_vm15 = vweird.f32 %v7327_v40 }
 0x2e4   :  { %4425 = vst [vmem:[#allocation10 + $0x270] sm:$0xff] %v4297_v55  ;;  %4670 = vrsqrt.f32 %v7330_v31  ;;  %vm3347_vm1 = vweird.f32 %v7330_v31 }
 0x2e5   :  { %4426 = vst [vmem:[#allocation10 + $0x278] sm:$0xff] %v4298_v62  ;;  %v3314_v62 = vmul.f32 0.5, %v3313_v19 }
 0x2e7   :  { %v3315_v51 = vsub.f32 1.5, %v3314_v62 }
 0x2e9   :  { %4553 = vset.pattern.permute.xlu2 %v7000_v12  ;;  %v3316_v32 = vmul.f32 %v4665_v44, %v3315_v51  ;;  %v4901_v51 = vld [vmem:[#allocation2 + $0x2c8] sm:$0xff] }
 0x2eb   :  { %2769 = vperm.xlu1 %4554, %v6829_v28   ;;  %v2673_v4 = vpop.permute.xlu2 %2672  ;;  %v3320_v13 = vsel %vm3319_vm9, %v4665_v44, %v3316_v32  ;;  %v4669_v32 = vpop.eup %4668 }
 0x2ec   :  { %v7316_v45 = vmul.f32 %v3290_v63, %v2673_v4  ;;  %v4900_v63 = vld [vmem:[#allocation2 + $0x2c0] sm:$0xff]  ;;  %vm3368_vm13 = vweird.f32 %v4669_v32 }
 0x2ed   :  { %vm3369_vm0 = vmor %vm3367_vm15, %vm3368_vm13 }
 0x2ee   :  { %8609 = vst [vmem:[#allocation69_spill] sm:$0xff] %v7316_v45 }
 0x2f1   :  { %2763 = vperm.xlu2 %4553, %v6829_v28   ;;  %v7320_v47 = vpop.permute.xlu0 %2430 }
 0x2f3   :  { %4557 = vset.pattern.permute.xlu1 %v6918_v20 }
 0x2f9   :  { %4556 = vset.pattern.permute.xlu2 %v6933_v33  ;;  %v7335_v41 = vpop.permute.xlu0 %2624 }
 0x2fa   :  { %8611 = vst [vmem:[#allocation133_spill] sm:$0xff] %v7335_v41 }
 0x2fb   :  { %2787 = vperm.xlu1 %4557, %v6829_v28   ;;  %v2691_v55 = vpop.permute.xlu2 %2690 }
 0x2fc   :  { %v3555_v34 = vmul.f32 %v3320_v13, %v2691_v55  ;;  %v3254_v55 = vmul.f32 0.5, %v3253_v9  ;;  %v7341_v13 = vpop.permute.xlu1 %2666  ;;  %v7349_v9 = vadd.f32 1e-05, %v2405_v42 }
 0x2fd   :  { %8613 = vst [vmem:[#allocation72_spill] sm:$0xff] %v7341_v13  ;;  %v4903_v13 = vld [vmem:[#allocation2 + $0x318] sm:$0xff] }
 0x2fe   :  { %v4007_v19 = vmul.f32 %v3555_v34, %v8612_v24  ;;  %v4179_v62 = vmul.f32 %v4900_v63, %v3555_v34  ;;  %v4180_v7 = vmul.f32 %v4901_v51, %v3555_v34  ;;  %v4671_v24 = vpop.eup %4670  ;;  %4672 = vrsqrt.f32 %v7349_v9 }
 0x2ff   :  { %v3342_v34 = vmul.f32 %v4671_v24, %v7330_v31  ;;  %vm3348_vm14 = vweird.f32 %v4671_v24  ;;  %vm3377_vm4 = vweird.f32 %v7349_v9 }
 0x300   :  { %v4071_v4 = vsub.f32 %v3847_v25, %v4007_v19  ;;  %v3362_v25 = vmul.f32 %v4669_v32, %v7327_v40  ;;  %v3255_v19 = vsub.f32 1.5, %v3254_v55  ;;  %vm3349_vm2 = vmor %vm3347_vm1, %vm3348_vm14 }
 0x301   :  { %2781 = vperm.xlu2 %4556, %v6829_v28   ;;  %v3878_v45 = vpop.permute.xlu0 %3877  ;;  %v3343_v63 = vmul.f32 %v4671_v24, %v3342_v34 }
 0x302   :  { %v4307_v44 = vadd.f32 %v4179_v62, %v4071_v4  ;;  %v4308_v27 = vadd.f32 %v4180_v7, %v4071_v4  ;;  %v3363_v4 = vmul.f32 %v4669_v32, %v3362_v25  ;;  %v3256_v51 = vmul.f32 %v4667_v50, %v3255_v19 }
 0x303   :  { %4559 = vset.pattern.permute.xlu1 %v6950_v57  ;;  %v3344_v7 = vmul.f32 0.5, %v3343_v63 }
 0x304   :  { %4435 = vst [vmem:[#allocation10 + $0x2c0] sm:$0xff] %v4307_v44  ;;  %v7351_v62 = vpop.permute.xlu1 %2678  ;;  %v3364_v21 = vmul.f32 0.5, %v3363_v4  ;;  %v3260_v44 = vsel %vm3259_vm12, %v4667_v50, %v3256_v51  ;;  %v4673_v60 = vpop.eup %4672 }
 0x305   :  { %4436 = vst [vmem:[#allocation10 + $0x2c8] sm:$0xff] %v4308_v27  ;;  %v3345_v19 = vsub.f32 1.5, %v3344_v7  ;;  %v3372_v50 = vmul.f32 %v4673_v60, %v7349_v9  ;;  %vm3378_vm3 = vweird.f32 %v4673_v60 }
 0x306   :  { %8614 = vst [vmem:[#allocation134_spill] sm:$0xff] %v7351_v62  ;;  %v3365_v42 = vsub.f32 1.5, %v3364_v21  ;;  %v2409_v62 = vmul.f32 %v7013_v16, %v5563_v54  ;;  %vm3379_vm5 = vmor %vm3377_vm4, %vm3378_vm3 }
 0x307   :  { %v3346_v63 = vmul.f32 %v4671_v24, %v3345_v19  ;;  %v3373_v16 = vmul.f32 %v4673_v60, %v3372_v50  ;;  %v8619_v19 = vld [vmem:[#allocation57_spill] sm:$0xff]  ;;  %v8620_v50 = vld [vmem:[#allocation107_spill] sm:$0xff] }
 0x308   :  { %v3366_v4 = vmul.f32 %v4669_v32, %v3365_v42 }
 0x309   :  { %4558 = vset.pattern.permute.xlu2 %v7030_v53 }
 0x30a   :  { %v3370_v51 = vsel %vm3369_vm0, %v4669_v32, %v3366_v4 }
 0x30b   :  { %2799 = vperm.xlu1 %4559, %v6829_v28   ;;  %v7358_v25 = vpop.permute.xlu2 %2702 }
 0x30c   :  { %8616 = vst [vmem:[#allocation136_spill] sm:$0xff] %v7358_v25 }
 0x30d   :  { %v7360_v34 = vpop.permute.xlu1 %2696 }
 0x30e   :  { %8617 = vst [vmem:[#allocation137_spill] sm:$0xff] %v7360_v34  ;;  %v3374_v34 = vmul.f32 0.5, %v3373_v16 }
 0x311   :  { %v2655_v27 = vpop.permute.xlu0 %2654  ;;  %2793 = vperm.xlu2 %4558, %v6829_v28   ;;  %v2861_v28 = vadd.f32 1e-05, %v2409_v62  ;;  %v4902_v62 = vld [vmem:[#allocation2 + $0x310] sm:$0xff] }
 0x312   :  { %v7354_v55 = vmul.f32 %v3260_v44, %v2655_v27  ;;  %v3350_v27 = vsel %vm3349_vm2, %v4671_v24, %v3346_v63  ;;  %v3375_v24 = vsub.f32 1.5, %v3374_v34  ;;  %v2411_v63 = vmul.f32 %v8620_v50, %v5563_v54  ;;  %v8624_v50 = vld [vmem:[#allocation71_spill] sm:$0xff] }
 0x313   :  { %4562 = vset.pattern.permute.xlu1 %v6960_v37  ;;  %4674 = vrsqrt.f32 %v2861_v28  ;;  %vm3417_vm7 = vweird.f32 %v2861_v28 }
 0x314   :  { %8615 = vst [vmem:[#allocation135_spill] sm:$0xff] %v7354_v55 }
 0x319   :  { %4561 = vset.pattern.permute.xlu2 %v6788_v22  ;;  %v4675_v4 = vpop.eup %4674 }
 0x31a   :  { %vm3418_vm6 = vweird.f32 %v4675_v4 }
 0x31b   :  { %3586 = vperm.xlu1 %4562, %v6923_v52   ;;  %v2722_v21 = vpop.permute.xlu2 %2721  ;;  %vm3419_vm8 = vmor %vm3417_vm7, %vm3418_vm6 }
 0x31c   :  { %v3560_v7 = vmul.f32 %v3370_v51, %v2722_v21  ;;  %v3412_v51 = vmul.f32 %v4675_v4, %v2861_v28  ;;  %v3376_v21 = vmul.f32 %v4673_v60, %v3375_v24 }
 0x31d   :  { %v2709_v44 = vpop.permute.xlu1 %2708 }
 0x31e   :  { %v7369_v42 = vmul.f32 %v3350_v27, %v2709_v44  ;;  %v4012_v25 = vmul.f32 %v3560_v7, %v8619_v19  ;;  %v4189_v55 = vmul.f32 %v4902_v62, %v3560_v7  ;;  %v4190_v29 = vmul.f32 %v4903_v13, %v3560_v7  ;;  %v8623_v27 = vld [vmem:[#allocation110_spill] sm:$0xff] }
 0x31f   :  { %v2414_v19 = vmul.f32 %v8623_v27, %v5563_v54 }
 0x320   :  { %8618 = vst [vmem:[#allocation138_spill] sm:$0xff] %v7369_v42  ;;  %v4076_v40 = vsub.f32 %v3878_v45, %v4012_v25  ;;  %v2863_v45 = vadd.f32 1e-05, %v2411_v63 }
 0x321   :  { %3580 = vperm.xlu2 %4561, %v6923_v52  }
 0x322   :  { %v4317_v31 = vadd.f32 %v4189_v55, %v4076_v40  ;;  %v4318_v32 = vadd.f32 %v4190_v29, %v4076_v40  ;;  %v3413_v29 = vmul.f32 %v4675_v4, %v3412_v51  ;;  %v3380_v55 = vsel %vm3379_vm5, %v4673_v60, %v3376_v21  ;;  %v3908_v21 = vpop.permute.xlu0 %3907 }
 0x323   :  { %4564 = vset.pattern.permute.xlu1 %v6836_v15  ;;  %4676 = vrsqrt.f32 %v2863_v45  ;;  %v2866_v60 = vadd.f32 1e-05, %v2414_v19  ;;  %vm3437_vm10 = vweird.f32 %v2863_v45 }
 0x324   :  { %4445 = vst [vmem:[#allocation10 + $0x310] sm:$0xff] %v4317_v31  ;;  %v3414_v34 = vmul.f32 0.5, %v3413_v29 }
 0x325   :  { %4446 = vst [vmem:[#allocation10 + $0x318] sm:$0xff] %v4318_v32  ;;  %4678 = vrsqrt.f32 %v2866_v60  ;;  %vm3467_vm13 = vweird.f32 %v2866_v60 }
 0x326   :  { %v3415_v7 = vsub.f32 1.5, %v3414_v34  ;;  %v4905_v34 = vld [vmem:[#allocation2 + $0x368] sm:$0xff] }
 0x328   :  { %v3416_v40 = vmul.f32 %v4675_v4, %v3415_v7 }
 0x329   :  { %4563 = vset.pattern.permute.xlu2 %v6798_v56  ;;  %v4677_v44 = vpop.eup %4676 }
 0x32a   :  { %v3432_v9 = vmul.f32 %v4677_v44, %v2863_v45  ;;  %v3420_v32 = vsel %vm3419_vm8, %v4675_v4, %v3416_v40  ;;  %vm3438_vm9 = vweird.f32 %v4677_v44  ;;  %v8628_v45 = vld [vmem:[#allocation114_spill] sm:$0xff] }
 0x32b   :  { %3598 = vperm.xlu1 %4564, %v6923_v52   ;;  %v7383_v16 = vpop.permute.xlu2 %2733  ;;  %vm3439_vm11 = vmor %vm3437_vm10, %vm3438_vm9 }
 0x32c   :  { %8622 = vst [vmem:[#allocation107_spill] sm:$0xff] %v7383_v16  ;;  %v3433_v62 = vmul.f32 %v4677_v44, %v3432_v9  ;;  %v4679_v9 = vpop.eup %4678 }
 0x32d   :  { %v2728_v13 = vpop.permute.xlu1 %2727  ;;  %v3462_v4 = vmul.f32 %v4679_v9, %v2866_v60  ;;  %vm3468_vm12 = vweird.f32 %v4679_v9  ;;  %v4906_v60 = vld [vmem:[#allocation2 + $0x3b0] sm:$0xff] }
 0x32e   :  { %v7379_v25 = vmul.f32 %v3380_v55, %v2728_v13  ;;  %v3434_v51 = vmul.f32 0.5, %v3433_v62  ;;  %v4904_v13 = vld [vmem:[#allocation2 + $0x360] sm:$0xff]  ;;  %vm3469_vm14 = vmor %vm3467_vm13, %vm3468_vm12 }
 0x32f   :  { %v3463_v62 = vmul.f32 %v4679_v9, %v3462_v4 }
 0x330   :  { %8621 = vst [vmem:[#allocation57_spill] sm:$0xff] %v7379_v25  ;;  %v3435_v19 = vsub.f32 1.5, %v3434_v51  ;;  %v8639_v25 = vld [vmem:[#allocation118_spill] sm:$0xff] }
 0x331   :  { %3592 = vperm.xlu2 %4563, %v6923_v52  }
 0x332   :  { %v3436_v40 = vmul.f32 %v4677_v44, %v3435_v19 }
 0x333   :  { %4567 = vset.pattern.permute.xlu1 %v6881_v61 }
 0x339   :  { %4566 = vset.pattern.permute.xlu2 %v6841_v46 }
 0x33b   :  { %3616 = vperm.xlu1 %4567, %v6923_v52   ;;  %v2752_v31 = vpop.permute.xlu2 %2751 }
 0x33c   :  { %v3565_v24 = vmul.f32 %v3420_v32, %v2752_v31  ;;  %v3440_v32 = vsel %vm3439_vm11, %v4677_v44, %v3436_v40 }
 0x33e   :  { %v4017_v63 = vmul.f32 %v3565_v24, %v8624_v50  ;;  %v4199_v55 = vmul.f32 %v4904_v13, %v3565_v24  ;;  %v4200_v7 = vmul.f32 %v4905_v34, %v3565_v24  ;;  %v3464_v50 = vmul.f32 0.5, %v3463_v62  ;;  %v7400_v13 = vpop.permute.xlu0 %2684  ;;  %v8630_v62 = vld [vmem:[#allocation51_spill] sm:$0xff] }
 0x33f   :  { %8627 = vst [vmem:[#allocation71_spill] sm:$0xff] %v7400_v13 }
 0x340   :  { %v4081_v29 = vsub.f32 %v3908_v21, %v4017_v63  ;;  %v8626_v63 = vld [vmem:[#allocation76_spill] sm:$0xff]  ;;  %v3465_v21 = vsub.f32 1.5, %v3464_v50 }
 0x341   :  { %3610 = vperm.xlu2 %4566, %v6923_v52   ;;  %v2355_v51 = vmul.f32 %v8626_v63, %v5563_v54 }
 0x342   :  { %v4327_v28 = vadd.f32 %v4199_v55, %v4081_v29  ;;  %v4328_v27 = vadd.f32 %v4200_v7, %v4081_v29  ;;  %v2417_v55 = vmul.f32 %v8628_v45, %v5563_v54  ;;  %v3466_v34 = vmul.f32 %v4679_v9, %v3465_v21 }
 0x343   :  { %4569 = vset.pattern.permute.xlu1 %v7000_v12  ;;  %v2807_v29 = vadd.f32 1e-05, %v2355_v51  ;;  %v4907_v51 = vld [vmem:[#allocation2 + $0x3b8] sm:$0xff] }
 0x344   :  { %4455 = vst [vmem:[#allocation10 + $0x360] sm:$0xff] %v4327_v28  ;;  %v7406_v44 = vadd.f32 1e-05, %v2417_v55  ;;  %v3470_v28 = vsel %vm3469_vm14, %v4679_v9, %v3466_v34  ;;  %v8632_v9 = vld [vmem:[#allocation36_spill] sm:$0xff] }
 0x345   :  { %4456 = vst [vmem:[#allocation10 + $0x368] sm:$0xff] %v4328_v27  ;;  %4680 = vrsqrt.f32 %v2807_v29  ;;  %v7408_v27 = vpop.permute.xlu1 %2739  ;;  %v2356_v34 = vmul.f32 %v8632_v9, %v5563_v54  ;;  %vm2877_vm0 = vweird.f32 %v2807_v29 }
 0x346   :  { %8629 = vst [vmem:[#allocation76_spill] sm:$0xff] %v7408_v27  ;;  %v3938_v4 = vpop.permute.xlu0 %3937  ;;  %4682 = vrsqrt.f32 %v7406_v44  ;;  %vm3497_vm3 = vweird.f32 %v7406_v44 }
 0x347   :  { %v7422_v16 = vadd.f32 1e-05, %v2356_v34  ;;  %v8636_v34 = vld [vmem:[#allocation88_spill] sm:$0xff] }
 0x349   :  { %4568 = vset.pattern.permute.xlu2 %v6873_v38  ;;  %vm2887_vm6 = vweird.f32 %v7422_v16 }
 0x34b   :  { %3628 = vperm.xlu1 %4569, %v6923_v52   ;;  %v2764_v31 = vpop.permute.xlu2 %2763  ;;  %v4681_v40 = vpop.eup %4680 }
 0x34c   :  { %v7394_v24 = vmul.f32 %v3440_v32, %v2764_v31  ;;  %v8631_v32 = vld [vmem:[#allocation81_spill] sm:$0xff]  ;;  %v2872_v55 = vmul.f32 %v4681_v40, %v2807_v29  ;;  %vm2878_vm15 = vweird.f32 %v4681_v40 }
 0x34d   :  { %v2357_v50 = vmul.f32 %v8631_v32, %v5563_v54  ;;  %v4683_v32 = vpop.eup %4682  ;;  %vm2879_vm1 = vmor %vm2877_vm0, %vm2878_vm15 }
 0x34e   :  { %8625 = vst [vmem:[#allocation110_spill] sm:$0xff] %v7394_v24  ;;  %v7420_v24 = vpop.permute.xlu1 %2757  ;;  %vm3498_vm2 = vweird.f32 %v4683_v32 }
 0x34f   :  { %8633 = vst [vmem:[#allocation114_spill] sm:$0xff] %v7420_v24  ;;  %vm3499_vm4 = vmor %vm3497_vm3, %vm3498_vm2 }
 0x351   :  { %3622 = vperm.xlu2 %4568, %v6923_v52  }
 0x353   :  { %4572 = vset.pattern.permute.xlu1 %v6933_v33 }
 0x359   :  { %4571 = vset.pattern.permute.xlu2 %v6863_v17 }
 0x35b   :  { %3646 = vperm.xlu1 %4572, %v6923_v52   ;;  %v2782_v7 = vpop.permute.xlu2 %2781 }
 0x35c   :  { %v3570_v19 = vmul.f32 %v3470_v28, %v2782_v7 }
 0x35e   :  { %v4022_v31 = vmul.f32 %v3570_v19, %v8630_v62  ;;  %v4209_v63 = vmul.f32 %v4906_v60, %v3570_v19  ;;  %v4210_v21 = vmul.f32 %v4907_v51, %v3570_v19  ;;  %v7418_v62 = vadd.f32 1e-05, %v2357_v50  ;;  %v7429_v50 = vpop.permute.xlu1 %2769 }
 0x35f   :  { %v2873_v60 = vmul.f32 %v4681_v40, %v2872_v55  ;;  %v3492_v19 = vmul.f32 %v4683_v32, %v7406_v44  ;;  %8634 = vst [vmem:[#allocation51_spill] sm:$0xff] %v7429_v50  ;;  %v8643_v44 = vld [vmem:[#allocation70_spill] sm:$0xff] }
 0x360   :  { %v4086_v45 = vsub.f32 %v3938_v4, %v4022_v31  ;;  %4684 = vrsqrt.f32 %v7418_v62  ;;  %vm2897_vm8 = vweird.f32 %v7418_v62 }
 0x361   :  { %3640 = vperm.xlu2 %4571, %v6923_v52   ;;  %v2874_v4 = vmul.f32 0.5, %v2873_v60  ;;  %4686 = vrsqrt.f32 %v7422_v16  ;;  %v3493_v31 = vmul.f32 %v4683_v32, %v3492_v19 }
 0x362   :  { %v4337_v7 = vadd.f32 %v4209_v63, %v4086_v45  ;;  %v4338_v28 = vadd.f32 %v4210_v21, %v4086_v45  ;;  %v8635_v45 = vld [vmem:[#allocation77_spill] sm:$0xff] }
 0x363   :  { %4574 = vset.pattern.permute.xlu1 %v7030_v53  ;;  %v2875_v63 = vsub.f32 1.5, %v2874_v4  ;;  %v2360_v55 = vmul.f32 %v8635_v45, %v5563_v54  ;;  %v3494_v9 = vmul.f32 0.5, %v3493_v31  ;;  %v2362_v53 = vmul.f32 %v8643_v44, %v5563_v54  ;;  %v4910_v44 = vld [vmem:[#allocation2 + $0x20] sm:$0xff] }
 0x364   :  { %4465 = vst [vmem:[#allocation10 + $0x3b0] sm:$0xff] %v4337_v7  ;;  %v2358_v7 = vmul.f32 %v8636_v34, %v5563_v54 }
 0x365   :  { %4466 = vst [vmem:[#allocation10 + $0x3b8] sm:$0xff] %v4338_v28  ;;  %v2876_v60 = vmul.f32 %v4681_v40, %v2875_v63  ;;  %v7447_v45 = vadd.f32 1e-05, %v2360_v55  ;;  %v3495_v34 = vsub.f32 1.5, %v3494_v9  ;;  %v8640_v9 = vld [vmem:[#allocation113_spill] sm:$0xff] }
 0x366   :  { %v7431_v51 = vpop.eup %4684  ;;  %v7451_v50 = vadd.f32 1e-05, %v2358_v7  ;;  %v8641_v7 = vld [vmem:[#allocation35_spill] sm:$0xff] }
 0x367   :  { %v7433_v21 = vpop.eup %4686  ;;  %v2892_v28 = vmul.f32 %v7431_v51, %v7418_v62  ;;  %v2880_v24 = vsel %vm2879_vm1, %v4681_v40, %v2876_v60  ;;  %4688 = vrsqrt.f32 %v7447_v45  ;;  %v3496_v29 = vmul.f32 %v4683_v32, %v3495_v34 }
 0x368   :  { %v2882_v19 = vmul.f32 %v7433_v21, %v7422_v16  ;;  %v3511_v42 = vmul.f32 %v2880_v24, %v8639_v25  ;;  %4690 = vrsqrt.f32 %v7451_v50  ;;  %v4909_v24 = vld [vmem:[#allocation2 + $0x8] sm:$0xff]  ;;  %vm2898_vm5 = vweird.f32 %v7431_v51 }
 0x369   :  { %4573 = vset.pattern.permute.xlu2 %v6918_v20  ;;  %v2893_v63 = vmul.f32 %v7431_v51, %v2892_v28  ;;  %v4908_v28 = vld [vmem:[#allocation2] sm:$0xff]  ;;  %v3500_v13 = vsel %vm3499_vm4, %v4683_v32, %v3496_v29  ;;  %vm2888_vm7 = vweird.f32 %v7433_v21  ;;  %vm2899_vm9 = vmor %vm2897_vm8, %vm2898_vm5  ;;  %vm2927_vm13 = vweird.f32 %v7447_v45 }
 0x36a   :  { %v2883_v27 = vmul.f32 %v7433_v21, %v2882_v19  ;;  %v4091_v25 = vmul.f32 %v4908_v28, %v3511_v42  ;;  %v4092_v60 = vmul.f32 %v4909_v24, %v3511_v42  ;;  %v8644_v28 = vld [vmem:[#allocation90_spill] sm:$0xff]  ;;  %vm2889_vm10 = vmor %vm2887_vm6, %vm2888_vm7  ;;  %vm2907_vm14 = vweird.f32 %v7451_v50 }
 0x36b   :  { %3658 = vperm.xlu1 %4574, %v6923_v52   ;;  %v7445_v4 = vpop.permute.xlu2 %2793  ;;  %v2894_v55 = vmul.f32 0.5, %v2893_v63 }
 0x36c   :  { %8637 = vst [vmem:[#allocation81_spill] sm:$0xff] %v7445_v4  ;;  %v2884_v4 = vmul.f32 0.5, %v2883_v27 }
 0x36d   :  { %v7449_v31 = vpop.permute.xlu1 %2787  ;;  %v2895_v43 = vsub.f32 1.5, %v2894_v55  ;;  %v7464_v41 = vpop.eup %4688  ;;  %v8645_v55 = vld [vmem:[#allocation127_spill] sm:$0xff] }
 0x36e   :  { %8638 = vst [vmem:[#allocation36_spill] sm:$0xff] %v7449_v31  ;;  %v3963_v31 = vmul.f32 %v3511_v42, %v8641_v7  ;;  %v2885_v27 = vsub.f32 1.5, %v2884_v4  ;;  %v7466_v7 = vpop.eup %4690  ;;  %v2361_v42 = vmul.f32 %v8644_v28, %v5563_v54  ;;  %v2922_v32 = vmul.f32 %v7464_v41, %v7447_v45  ;;  %v4911_v28 = vld [vmem:[#allocation2 + $0x28] sm:$0xff] }
 0x36f   :  { %v2902_v4 = vmul.f32 %v7466_v7, %v7451_v50  ;;  %vm2928_vm11 = vweird.f32 %v7464_v41  ;;  %vm2908_vm12 = vweird.f32 %v7466_v7 }
 0x370   :  { %vm2929_vm15 = vmor %vm2927_vm13, %vm2928_vm11 }
 0x371   :  { %3652 = vperm.xlu2 %4573, %v6923_v52   ;;  %v2903_v29 = vmul.f32 %v7466_v7, %v2902_v4  ;;  %v4912_v4 = vld [vmem:[#allocation2 + $0x10] sm:$0xff]  ;;  %vm2909_vm0 = vmor %vm2907_vm14, %vm2908_vm12 }
 0x373   :  { %4577 = vset.pattern.permute.xlu1 %v6788_v22  ;;  %v2904_v62 = vmul.f32 0.5, %v2903_v29 }
 0x379   :  { %4576 = vset.pattern.permute.xlu2 %v6888_v36 }
 0x37b   :  { %3677 = vperm.xlu1 %4577, %v8640_v9   ;;  %v3581_v40 = vpop.permute.xlu2 %3580 }
 0x37c   :  { %v4027_v19 = vsub.f32 %v3581_v40, %v3963_v31  ;;  %v2886_v31 = vmul.f32 %v7433_v21, %v2885_v27 }
 0x37d   :  { %v2800_v34 = vpop.permute.xlu1 %2799 }
 0x37e   :  { %v7462_v63 = vmul.f32 %v3500_v13, %v2800_v34  ;;  %v4219_v49 = vadd.f32 %v4091_v25, %v4027_v19  ;;  %v4220_v1 = vadd.f32 %v4092_v60, %v4027_v19  ;;  %v2896_v13 = vmul.f32 %v7431_v51, %v2895_v43  ;;  %v8647_v19 = vld [vmem:[#allocation34_spill] sm:$0xff] }
 0x37f   :  { %v7486_v43 = vadd.f32 1e-05, %v2361_v42  ;;  %v2890_v40 = vsel %vm2889_vm10, %v7433_v21, %v2886_v31 }
 0x380   :  { %8642 = vst [vmem:[#allocation77_spill] sm:$0xff] %v7462_v63  ;;  %v3512_v25 = vmul.f32 %v2890_v40, %v7320_v47 }
 0x381   :  { %4347 = vst [vmem:[#allocation10] sm:$0xff] %v4219_v49  ;;  %3670 = vperm.xlu2 %4576, %v6923_v52   ;;  %v7484_v49 = vadd.f32 1e-05, %v2362_v53  ;;  %v2923_v52 = vmul.f32 %v7464_v41, %v2922_v32  ;;  %vm2937_vm4 = vweird.f32 %v7486_v43 }
 0x382   :  { %4348 = vst [vmem:[#allocation10 + $0x8] sm:$0xff] %v4220_v1  ;;  %v2900_v1 = vsel %vm2899_vm9, %v7431_v51, %v2896_v13  ;;  %v8646_v51 = vld [vmem:[#allocation38_spill] sm:$0xff]  ;;  %v3964_v34 = vmul.f32 %v3512_v25, %v8647_v19  ;;  %v4093_v31 = vmul.f32 %v4912_v4, %v3512_v25  ;;  %v8650_v4 = vld [vmem:[#allocation15_spill] sm:$0xff] }
 0x383   :  { %4579 = vset.pattern.permute.xlu1 %v6798_v56  ;;  %v3513_v16 = vmul.f32 %v2900_v1, %v8645_v55  ;;  %4692 = vrsqrt.f32 %v7484_v49  ;;  %v2924_v53 = vmul.f32 0.5, %v2923_v52  ;;  %v4913_v52 = vld [vmem:[#allocation2 + $0x18] sm:$0xff]  ;;  %v2905_v55 = vsub.f32 1.5, %v2904_v62 }
 0x384   :  { %4694 = vrsqrt.f32 %v7486_v43  ;;  %v4094_v1 = vmul.f32 %v4913_v52, %v3512_v25  ;;  %vm2947_vm3 = vweird.f32 %v7484_v49 }
 0x385   :  { %v3965_v24 = vmul.f32 %v3513_v16, %v8646_v51  ;;  %v4095_v21 = vmul.f32 %v4910_v44, %v3513_v16  ;;  %v4096_v47 = vmul.f32 %v4911_v28, %v3513_v16  ;;  %v2925_v32 = vsub.f32 1.5, %v2924_v53 }
 0x386   :  { %v2906_v62 = vmul.f32 %v7466_v7, %v2905_v55 }
 0x387   :  { %v2926_v53 = vmul.f32 %v7464_v41, %v2925_v32  ;;  %v8649_v32 = vld [vmem:[#allocation120_spill] sm:$0xff] }
 0x389   :  { %4578 = vset.pattern.permute.xlu2 %v6960_v37  ;;  %v7500_v29 = vpop.eup %4692 }
 0x38a   :  { %v7502_v63 = vpop.eup %4694  ;;  %v2942_v16 = vmul.f32 %v7500_v29, %v7484_v49  ;;  %vm2948_vm1 = vweird.f32 %v7500_v29 }
 0x38b   :  { %3689 = vperm.xlu1 %4579, %v8640_v9   ;;  %v3593_v60 = vpop.permute.xlu2 %3592  ;;  %v2932_v25 = vmul.f32 %v7502_v63, %v7486_v43  ;;  %vm2938_vm2 = vweird.f32 %v7502_v63  ;;  %vm2949_vm5 = vmor %vm2947_vm3, %vm2948_vm1  ;;  %v8655_v43 = vld [vmem:[#allocation42_spill] sm:$0xff] }
 0x38c   :  { %v4029_v27 = vsub.f32 %v3593_v60, %v3965_v24  ;;  %v8648_v60 = vld [vmem:[#allocation83_spill] sm:$0xff]  ;;  %vm2939_vm6 = vmor %vm2937_vm4, %vm2938_vm2 }
 0x38d   :  { %v3587_v42 = vpop.permute.xlu1 %3586  ;;  %v2365_v44 = vmul.f32 %v8648_v60, %v5563_v54  ;;  %v2933_v28 = vmul.f32 %v7502_v63, %v2932_v25  ;;  %v4916_v60 = vld [vmem:[#allocation2 + $0x30] sm:$0xff] }
 0x38e   :  { %v4028_v13 = vsub.f32 %v3587_v42, %v3964_v34  ;;  %v4223_v40 = vadd.f32 %v4095_v21, %v4029_v27  ;;  %v4224_v51 = vadd.f32 %v4096_v47, %v4029_v27  ;;  %v2943_v27 = vmul.f32 %v7500_v29, %v2942_v16  ;;  %v4917_v16 = vld [vmem:[#allocation2 + $0x38] sm:$0xff] }
 0x38f   :  { %v7517_v34 = vadd.f32 1e-05, %v2365_v44  ;;  %v2930_v21 = vsel %vm2929_vm15, %v7464_v41, %v2926_v53  ;;  %v2910_v47 = vsel %vm2909_vm0, %v7466_v7, %v2906_v62  ;;  %v2934_v50 = vmul.f32 0.5, %v2933_v28  ;;  %v8651_v41 = vld [vmem:[#allocation41_spill] sm:$0xff] }
 0x390   :  { %v4221_v19 = vadd.f32 %v4093_v31, %v4028_v13  ;;  %v4222_v24 = vadd.f32 %v4094_v1, %v4028_v13  ;;  %4351 = vst [vmem:[#allocation10 + $0x20] sm:$0xff] %v4223_v40  ;;  %v3516_v42 = vmul.f32 %v2930_v21, %v7071_v30  ;;  %v3514_v13 = vmul.f32 %v2910_v47, %v8649_v32  ;;  %v4914_v40 = vld [vmem:[#allocation2 + $0x50] sm:$0xff] }
 0x391   :  { %4352 = vst [vmem:[#allocation10 + $0x28] sm:$0xff] %v4224_v51  ;;  %3683 = vperm.xlu2 %4578, %v8640_v9   ;;  %4696 = vrsqrt.f32 %v7517_v34  ;;  %v2944_v45 = vmul.f32 0.5, %v2943_v27  ;;  %v4915_v51 = vld [vmem:[#allocation2 + $0x58] sm:$0xff]  ;;  %v2935_v27 = vsub.f32 1.5, %v2934_v50  ;;  %vm2977_vm8 = vweird.f32 %v7517_v34 }
 0x392   :  { %4349 = vst [vmem:[#allocation10 + $0x10] sm:$0xff] %v4221_v19  ;;  %v3968_v31 = vmul.f32 %v3516_v42, %v8650_v4  ;;  %v3966_v1 = vmul.f32 %v3514_v13, %v8651_v41  ;;  %v4101_v7 = vmul.f32 %v4914_v40, %v3516_v42  ;;  %v4102_v30 = vmul.f32 %v4915_v51, %v3516_v42  ;;  %v8652_v4 = vld [vmem:[#allocation39_spill] sm:$0xff] }
 0x393   :  { %4583 = vset.pattern.permute.xlu1 %v6841_v46  ;;  %4350 = vst [vmem:[#allocation10 + $0x18] sm:$0xff] %v4222_v24  ;;  %v2945_v24 = vsub.f32 1.5, %v2944_v45  ;;  %v4097_v44 = vmul.f32 %v4916_v60, %v3514_v13  ;;  %v4098_v53 = vmul.f32 %v4917_v16, %v3514_v13  ;;  %v2936_v13 = vmul.f32 %v7502_v63, %v2935_v27 }
 0x395   :  { %v2946_v45 = vmul.f32 %v7500_v29, %v2945_v24  ;;  %v8656_v24 = vld [vmem:[#allocation20_spill] sm:$0xff] }
 0x397   :  { %v7531_v62 = vpop.eup %4696  ;;  %v2950_v41 = vsel %vm2949_vm5, %v7500_v29, %v2946_v45  ;;  %v4918_v29 = vld [vmem:[#allocation2 + $0x70] sm:$0xff] }
 0x398   :  { %v2972_v42 = vmul.f32 %v7531_v62, %v7517_v34  ;;  %vm2978_vm7 = vweird.f32 %v7531_v62  ;;  %v8660_v34 = vld [vmem:[#allocation16_spill] sm:$0xff] }
 0x399   :  { %4582 = vset.pattern.permute.xlu2 %v6858_v39  ;;  %vm2979_vm9 = vmor %vm2977_vm8, %vm2978_vm7 }
 0x39b   :  { %3707 = vperm.xlu1 %4583, %v8640_v9   ;;  %v3611_v52 = vpop.permute.xlu2 %3610 }
 0x39c   :  { %v4032_v55 = vsub.f32 %v3611_v52, %v3968_v31  ;;  %v2367_v31 = vmul.f32 %v8652_v4, %v5563_v54  ;;  %v2973_v52 = vmul.f32 %v7531_v62, %v2972_v42 }
 0x39d   :  { %v3599_v19 = vpop.permute.xlu1 %3598 }
 0x39e   :  { %v4030_v25 = vsub.f32 %v3599_v19, %v3966_v1  ;;  %v4229_v21 = vadd.f32 %v4101_v7, %v4032_v55  ;;  %v4230_v28 = vadd.f32 %v4102_v30, %v4032_v55  ;;  %v7544_v50 = vadd.f32 1e-05, %v2367_v31  ;;  %v8653_v55 = vld [vmem:[#allocation40_spill] sm:$0xff] }
 0x39f   :  { %v2940_v1 = vsel %vm2939_vm6, %v7502_v63, %v2936_v13  ;;  %v3518_v40 = vmul.f32 %v2950_v41, %v8653_v55  ;;  %v8654_v7 = vld [vmem:[#allocation124_spill] sm:$0xff]  ;;  %v2974_v49 = vmul.f32 0.5, %v2973_v52  ;;  %v4919_v63 = vld [vmem:[#allocation2 + $0x78] sm:$0xff] }
 0x3a0   :  { %v4225_v47 = vadd.f32 %v4097_v44, %v4030_v25  ;;  %v4226_v32 = vadd.f32 %v4098_v53, %v4030_v25  ;;  %4357 = vst [vmem:[#allocation10 + $0x50] sm:$0xff] %v4229_v21  ;;  %v3517_v51 = vmul.f32 %v2940_v1, %v8654_v7  ;;  %4698 = vrsqrt.f32 %v7544_v50  ;;  %v4920_v21 = vld [vmem:[#allocation2 + $0x60] sm:$0xff]  ;;  %v8657_v41 = vld [vmem:[#allocation92_spill] sm:$0xff]  ;;  %v8658_v55 = vld [vmem:[#allocation85_spill] sm:$0xff] }
 0x3a1   :  { %4358 = vst [vmem:[#allocation10 + $0x58] sm:$0xff] %v4230_v28  ;;  %3701 = vperm.xlu2 %4582, %v8640_v9   ;;  %v3970_v30 = vmul.f32 %v3518_v40, %v8655_v43  ;;  %v4105_v16 = vmul.f32 %v4918_v29, %v3518_v40  ;;  %v4106_v53 = vmul.f32 %v4919_v63, %v3518_v40  ;;  %v2975_v27 = vsub.f32 1.5, %v2974_v49  ;;  %v8661_v63 = vld [vmem:[#allocation19_spill] sm:$0xff] }
 0x3a2   :  { %4353 = vst [vmem:[#allocation10 + $0x30] sm:$0xff] %v4225_v47  ;;  %v3969_v60 = vmul.f32 %v3517_v51, %v8656_v24  ;;  %v4103_v28 = vmul.f32 %v4920_v21, %v3517_v51  ;;  %v4921_v47 = vld [vmem:[#allocation2 + $0x68] sm:$0xff]  ;;  %v2370_v1 = vmul.f32 %v8657_v41, %v5563_v54  ;;  %v2368_v40 = vmul.f32 %v8658_v55, %v5563_v54  ;;  %v8659_v24 = vld [vmem:[#allocation130_spill] sm:$0xff] }
 0x3a3   :  { %4585 = vset.pattern.permute.xlu1 %v6873_v38  ;;  %4354 = vst [vmem:[#allocation10 + $0x38] sm:$0xff] %v4226_v32  ;;  %v4104_v32 = vmul.f32 %v4921_v47, %v3517_v51  ;;  %v2976_v49 = vmul.f32 %v7531_v62, %v2975_v27  ;;  %v4922_v27 = vld [vmem:[#allocation2 + $0xa0] sm:$0xff]  ;;  %v4923_v21 = vld [vmem:[#allocation2 + $0xa8] sm:$0xff]  ;;  %vm2997_vm11 = vweird.f32 %v7544_v50 }
 0x3a4   :  { %v7570_v51 = vadd.f32 1e-05, %v2370_v1  ;;  %v7572_v43 = vadd.f32 1e-05, %v2368_v40 }
 0x3a6   :  { %v7557_v31 = vpop.eup %4698  ;;  %4700 = vrsqrt.f32 %v7570_v51  ;;  %vm3027_vm15 = vweird.f32 %v7570_v51  ;;  %vm3007_vm1 = vweird.f32 %v7572_v43 }
 0x3a7   :  { %v2992_v7 = vmul.f32 %v7557_v31, %v7544_v50  ;;  %4702 = vrsqrt.f32 %v7572_v43  ;;  %vm2998_vm10 = vweird.f32 %v7557_v31  ;;  %v8664_v50 = vld [vmem:[#allocation24_spill] sm:$0xff] }
 0x3a8   :  { %vm2999_vm12 = vmor %vm2997_vm11, %vm2998_vm10 }
 0x3a9   :  { %4584 = vset.pattern.permute.xlu2 %v6881_v61 }
 0x3ab   :  { %3719 = vperm.xlu1 %4585, %v8640_v9   ;;  %v3623_v19 = vpop.permute.xlu2 %3622 }
 0x3ac   :  { %v4034_v44 = vsub.f32 %v3623_v19, %v3970_v30  ;;  %v2993_v30 = vmul.f32 %v7557_v31, %v2992_v7  ;;  %v2980_v19 = vsel %vm2979_vm9, %v7531_v62, %v2976_v49  ;;  %v7586_v41 = vpop.eup %4700 }
 0x3ad   :  { %v3617_v25 = vpop.permute.xlu1 %3616  ;;  %v7588_v40 = vpop.eup %4702  ;;  %vm3028_vm13 = vweird.f32 %v7586_v41 }
 0x3ae   :  { %v4033_v4 = vsub.f32 %v3617_v25, %v3969_v60  ;;  %v4233_v42 = vadd.f32 %v4105_v16, %v4034_v44  ;;  %v4234_v45 = vadd.f32 %v4106_v53, %v4034_v44  ;;  %v3521_v60 = vmul.f32 %v2980_v19, %v8659_v24  ;;  %vm3029_vm0 = vmor %vm3027_vm15, %vm3028_vm13 }
 0x3af   :  { %v2994_v44 = vmul.f32 0.5, %v2993_v30  ;;  %v3971_v53 = vmul.f32 %v7191_v3, %v8661_v63  ;;  %v8662_v30 = vld [vmem:[#allocation22_spill] sm:$0xff]  ;;  %v3022_v24 = vmul.f32 %v7586_v41, %v7570_v51  ;;  %v8663_v63 = vld [vmem:[#allocation27_spill] sm:$0xff]  ;;  %vm3008_vm14 = vweird.f32 %v7588_v40 }
 0x3b0   :  { %v4231_v13 = vadd.f32 %v4103_v28, %v4033_v4  ;;  %v4232_v52 = vadd.f32 %v4104_v32, %v4033_v4  ;;  %4361 = vst [vmem:[#allocation10 + $0x70] sm:$0xff] %v4233_v42  ;;  %v3973_v29 = vmul.f32 %v3521_v60, %v8660_v34  ;;  %v4111_v62 = vmul.f32 %v4922_v27, %v3521_v60  ;;  %v4924_v42 = vld [vmem:[#allocation2 + $0x80] sm:$0xff]  ;;  %vm3009_vm2 = vmor %vm3007_vm1, %vm3008_vm14 }
 0x3b1   :  { %4362 = vst [vmem:[#allocation10 + $0x78] sm:$0xff] %v4234_v45  ;;  %3713 = vperm.xlu2 %4584, %v8640_v9   ;;  %v4112_v28 = vmul.f32 %v4923_v21, %v3521_v60  ;;  %v2995_v32 = vsub.f32 1.5, %v2994_v44  ;;  %v4107_v45 = vmul.f32 %v4924_v42, %v7191_v3  ;;  %v2371_v19 = vmul.f32 %v8662_v30, %v5563_v54  ;;  %v4929_v30 = vld [vmem:[#allocation2 + $0xb8] sm:$0xff] }
 0x3b2   :  { %4359 = vst [vmem:[#allocation10 + $0x60] sm:$0xff] %v4231_v13  ;;  %v4925_v13 = vld [vmem:[#allocation2 + $0x88] sm:$0xff]  ;;  %v3023_v34 = vmul.f32 %v7586_v41, %v3022_v24 }
 0x3b3   :  { %4588 = vset.pattern.permute.xlu1 %v6863_v17  ;;  %4360 = vst [vmem:[#allocation10 + $0x68] sm:$0xff] %v4232_v52  ;;  %v4108_v52 = vmul.f32 %v4925_v13, %v7191_v3  ;;  %v2996_v60 = vmul.f32 %v7557_v31, %v2995_v32  ;;  %v3002_v3 = vmul.f32 %v7588_v40, %v7572_v43  ;;  %v7601_v44 = vadd.f32 1e-05, %v2371_v19  ;;  %v8669_v43 = vld [vmem:[#allocation26_spill] sm:$0xff] }
 0x3b5   :  { %4704 = vrsqrt.f32 %v7601_v44  ;;  %vm3037_vm4 = vweird.f32 %v7601_v44 }
 0x3b9   :  { %4587 = vset.pattern.permute.xlu2 %v6904_v59 }
 0x3bb   :  { %3737 = vperm.xlu1 %4588, %v8640_v9   ;;  %v3641_v16 = vpop.permute.xlu2 %3640 }
 0x3bc   :  { %v4037_v25 = vsub.f32 %v3641_v16, %v3973_v29  ;;  %v3000_v29 = vsel %vm2999_vm12, %v7557_v31, %v2996_v60  ;;  %v3003_v16 = vmul.f32 %v7588_v40, %v3002_v3  ;;  %v4926_v31 = vld [vmem:[#allocation2 + $0xc0] sm:$0xff] }
 0x3bd   :  { %v3629_v47 = vpop.permute.xlu1 %3628 }
 0x3be   :  { %v4035_v4 = vsub.f32 %v3629_v47, %v3971_v53  ;;  %v4239_v1 = vadd.f32 %v4111_v62, %v4037_v25  ;;  %v4240_v55 = vadd.f32 %v4112_v28, %v4037_v25  ;;  %v3523_v53 = vmul.f32 %v3000_v29, %v8663_v63  ;;  %v8665_v28 = vld [vmem:[#allocation23_spill] sm:$0xff]  ;;  %v8666_v47 = vld [vmem:[#allocation128_spill] sm:$0xff]  ;;  %v8667_v63 = vld [vmem:[#allocation94_spill] sm:$0xff] }
 0x3bf   :  { %v3024_v25 = vmul.f32 0.5, %v3023_v34  ;;  %v3004_v27 = vmul.f32 0.5, %v3003_v16  ;;  %v3974_v32 = vmul.f32 %v8666_v47, %v8665_v28  ;;  %v4114_v19 = vmul.f32 %v4929_v30, %v8666_v47  ;;  %v7615_v34 = vpop.eup %4704 }
 0x3c0   :  { %v4235_v7 = vadd.f32 %v4107_v45, %v4035_v4  ;;  %v4236_v49 = vadd.f32 %v4108_v52, %v4035_v4  ;;  %4367 = vst [vmem:[#allocation10 + $0xa0] sm:$0xff] %v4239_v1  ;;  %v3975_v62 = vmul.f32 %v3523_v53, %v8664_v50  ;;  %v4115_v42 = vmul.f32 %v4926_v31, %v3523_v53  ;;  %v4927_v45 = vld [vmem:[#allocation2 + $0xc8] sm:$0xff] }
 0x3c1   :  { %4368 = vst [vmem:[#allocation10 + $0xa8] sm:$0xff] %v4240_v55  ;;  %3731 = vperm.xlu2 %4587, %v8640_v9   ;;  %v4116_v13 = vmul.f32 %v4927_v45, %v3523_v53  ;;  %v3025_v1 = vsub.f32 1.5, %v3024_v25  ;;  %v3005_v24 = vsub.f32 1.5, %v3004_v27  ;;  %v2373_v53 = vmul.f32 %v8667_v63, %v5563_v54 }
 0x3c2   :  { %4363 = vst [vmem:[#allocation10 + $0x80] sm:$0xff] %v4235_v7  ;;  %v4928_v7 = vld [vmem:[#allocation2 + $0xb0] sm:$0xff]  ;;  %v3032_v27 = vmul.f32 %v7615_v34, %v7601_v44  ;;  %vm3038_vm3 = vweird.f32 %v7615_v34 }
 0x3c3   :  { %4590 = vset.pattern.permute.xlu1 %v6918_v20  ;;  %4364 = vst [vmem:[#allocation10 + $0x88] sm:$0xff] %v4236_v49  ;;  %v4113_v49 = vmul.f32 %v4928_v7, %v8666_v47  ;;  %v3026_v25 = vmul.f32 %v7586_v41, %v3025_v1  ;;  %v3006_v50 = vmul.f32 %v7588_v40, %v3005_v24  ;;  %v8668_v47 = vld [vmem:[#allocation131_spill] sm:$0xff]  ;;  %v4930_v1 = vld [vmem:[#allocation2 + $0xf0] sm:$0xff]  ;;  %v4931_v7 = vld [vmem:[#allocation2 + $0xf8] sm:$0xff] }
 0x3c4   :  { %v3033_v28 = vmul.f32 %v7615_v34, %v3032_v27  ;;  %v4933_v24 = vld [vmem:[#allocation2 + $0xd8] sm:$0xff]  ;;  %vm3039_vm5 = vmor %vm3037_vm4, %vm3038_vm3 }
 0x3c5   :  { %v8671_v27 = vld [vmem:[#allocation37_spill] sm:$0xff] }
 0x3c6   :  { %v3034_v51 = vmul.f32 0.5, %v3033_v28 }
 0x3c9   :  { %4589 = vset.pattern.permute.xlu2 %v6933_v33 }
 0x3cb   :  { %3749 = vperm.xlu1 %4590, %v8640_v9   ;;  %v3653_v21 = vpop.permute.xlu2 %3652 }
 0x3cc   :  { %v4039_v4 = vsub.f32 %v3653_v21, %v3975_v62  ;;  %v7629_v62 = vadd.f32 1e-05, %v2373_v53  ;;  %v3030_v21 = vsel %vm3029_vm0, %v7586_v41, %v3026_v25  ;;  %v8670_v41 = vld [vmem:[#allocation17_spill] sm:$0xff] }
 0x3cd   :  { %v3647_v52 = vpop.permute.xlu1 %3646 }
 0x3ce   :  { %v4038_v55 = vsub.f32 %v3647_v52, %v3974_v32  ;;  %v4243_v60 = vadd.f32 %v4115_v42, %v4039_v4  ;;  %v4244_v3 = vadd.f32 %v4116_v13, %v4039_v4  ;;  %v3526_v32 = vmul.f32 %v3030_v21, %v8668_v47  ;;  %v8672_v21 = vld [vmem:[#allocation96_spill] sm:$0xff] }
 0x3cf   :  { %v3010_v4 = vsel %vm3009_vm2, %v7588_v40, %v3006_v50  ;;  %4706 = vrsqrt.f32 %v7629_v62  ;;  %v2377_v50 = vmul.f32 %v8671_v27, %v5563_v54  ;;  %v2376_v28 = vmul.f32 %v8672_v21, %v5563_v54  ;;  %v8675_v27 = vld [vmem:[#allocation91_spill] sm:$0xff] }
 0x3d0   :  { %v4241_v29 = vadd.f32 %v4113_v49, %v4038_v55  ;;  %v4242_v16 = vadd.f32 %v4114_v19, %v4038_v55  ;;  %4371 = vst [vmem:[#allocation10 + $0xc0] sm:$0xff] %v4243_v60  ;;  %v3524_v31 = vmul.f32 %v3010_v4, %v7212_v5  ;;  %v3978_v42 = vmul.f32 %v3526_v32, %v8669_v43  ;;  %v4932_v5 = vld [vmem:[#allocation2 + $0xd0] sm:$0xff] }
 0x3d1   :  { %4372 = vst [vmem:[#allocation10 + $0xc8] sm:$0xff] %v4244_v3  ;;  %3743 = vperm.xlu2 %4589, %v8640_v9   ;;  %v4121_v55 = vmul.f32 %v4930_v1, %v3526_v32  ;;  %v4122_v49 = vmul.f32 %v4931_v7, %v3526_v32  ;;  %v3035_v3 = vsub.f32 1.5, %v3034_v51  ;;  %v7653_v4 = vadd.f32 1e-05, %v2377_v50  ;;  %v4934_v1 = vld [vmem:[#allocation2 + $0x110] sm:$0xff] }
 0x3d2   :  { %4369 = vst [vmem:[#allocation10 + $0xb0] sm:$0xff] %v4241_v29  ;;  %v3976_v13 = vmul.f32 %v3524_v31, %v8670_v41  ;;  %v4117_v19 = vmul.f32 %v4932_v5, %v3524_v31  ;;  %v4118_v60 = vmul.f32 %v4933_v24, %v3524_v31  ;;  %v7656_v31 = vadd.f32 1e-05, %v2376_v28  ;;  %v8674_v41 = vld [vmem:[#allocation25_spill] sm:$0xff] }
 0x3d3   :  { %4593 = vset.pattern.permute.xlu1 %v6888_v36  ;;  %4370 = vst [vmem:[#allocation10 + $0xb8] sm:$0xff] %v4242_v16  ;;  %v3036_v32 = vmul.f32 %v7615_v34, %v3035_v3  ;;  %4708 = vrsqrt.f32 %v7653_v4  ;;  %v2380_v50 = vmul.f32 %v8675_v27, %v5563_v54  ;;  %vm3057_vm7 = vweird.f32 %v7629_v62  ;;  %v8678_v27 = vld [vmem:[#allocation98_spill] sm:$0xff] }
 0x3d4   :  { %4710 = vrsqrt.f32 %v7656_v31  ;;  %vm3097_vm11 = vweird.f32 %v7653_v4  ;;  %vm3087_vm12 = vweird.f32 %v7656_v31 }
 0x3d5   :  { %v7641_v63 = vpop.eup %4706  ;;  %v3040_v51 = vsel %vm3039_vm5, %v7615_v34, %v3036_v32  ;;  %v4125_v34 = vmul.f32 %v4934_v1, %v7154_v6  ;;  %v4938_v1 = vld [vmem:[#allocation2 + $0x140] sm:$0xff] }
 0x3d6   :  { %v3052_v47 = vmul.f32 %v7641_v63, %v7629_v62  ;;  %v3527_v43 = vmul.f32 %v3040_v51, %v7142_v18  ;;  %v4935_v18 = vld [vmem:[#allocation2 + $0x118] sm:$0xff]  ;;  %vm3058_vm6 = vweird.f32 %v7641_v63 }
 0x3d7   :  { %vm3059_vm8 = vmor %vm3057_vm7, %vm3058_vm6 }
 0x3d9   :  { %4592 = vset.pattern.permute.xlu2 %v6950_v57  ;;  %v7670_v24 = vpop.eup %4708 }
 0x3da   :  { %vm3098_vm9 = vweird.f32 %v7670_v24 }
 0x3db   :  { %3767 = vperm.xlu1 %4593, %v8640_v9   ;;  %v3671_v45 = vpop.permute.xlu2 %3670  ;;  %vm3099_vm13 = vmor %vm3097_vm11, %vm3098_vm9 }
 0x3dc   :  { %v4042_v52 = vsub.f32 %v3671_v45, %v3978_v42  ;;  %v8673_v42 = vld [vmem:[#allocation21_spill] sm:$0xff] }
 0x3dd   :  { %v3659_v40 = vpop.permute.xlu1 %3658  ;;  %v3980_v44 = vmul.f32 %v7154_v6, %v8673_v42 }
 0x3de   :  { %v4040_v30 = vsub.f32 %v3659_v40, %v3976_v13  ;;  %v4249_v29 = vadd.f32 %v4121_v55, %v4042_v52  ;;  %v4250_v16 = vadd.f32 %v4122_v49, %v4042_v52  ;;  %v3979_v13 = vmul.f32 %v3527_v43, %v8674_v41  ;;  %v4936_v49 = vld [vmem:[#allocation2 + $0x100] sm:$0xff]  ;;  %v8677_v41 = vld [vmem:[#allocation44_spill] sm:$0xff] }
 0x3df   :  { %v4126_v55 = vmul.f32 %v4935_v18, %v7154_v6  ;;  %v4123_v40 = vmul.f32 %v4936_v49, %v3527_v43  ;;  %v3092_v6 = vmul.f32 %v7670_v24, %v7653_v4  ;;  %v4940_v49 = vld [vmem:[#allocation2 + $0x120] sm:$0xff]  ;;  %v8679_v4 = vld [vmem:[#allocation29_spill] sm:$0xff] }
 0x3e0   :  { %v4245_v53 = vadd.f32 %v4117_v19, %v4040_v30  ;;  %v4246_v25 = vadd.f32 %v4118_v60, %v4040_v30  ;;  %4377 = vst [vmem:[#allocation10 + $0xf0] sm:$0xff] %v4249_v29  ;;  %v4937_v30 = vld [vmem:[#allocation2 + $0x108] sm:$0xff] }
 0x3e1   :  { %4378 = vst [vmem:[#allocation10 + $0xf8] sm:$0xff] %v4250_v16  ;;  %3761 = vperm.xlu2 %4592, %v8640_v9   ;;  %v3053_v9 = vmul.f32 %v7641_v63, %v3052_v47  ;;  %v4124_v5 = vmul.f32 %v4937_v30, %v3527_v43  ;;  %v7672_v16 = vpop.eup %4710  ;;  %v7684_v47 = vadd.f32 1e-05, %v2380_v50  ;;  %v3093_v32 = vmul.f32 %v7670_v24, %v3092_v6  ;;  %v4941_v30 = vld [vmem:[#allocation2 + $0x128] sm:$0xff] }
 0x3e2   :  { %4373 = vst [vmem:[#allocation10 + $0xd0] sm:$0xff] %v4245_v53  ;;  %v3082_v21 = vmul.f32 %v7672_v16, %v7656_v31  ;;  %v2382_v50 = vmul.f32 %v8678_v27, %v5563_v54  ;;  %vm3088_vm10 = vweird.f32 %v7672_v16 }
 0x3e3   :  { %4595 = vset.pattern.permute.xlu1 %v6960_v37  ;;  %4374 = vst [vmem:[#allocation10 + $0xd8] sm:$0xff] %v4246_v25  ;;  %v3054_v37 = vmul.f32 0.5, %v3053_v9  ;;  %4712 = vrsqrt.f32 %v7684_v47  ;;  %vm3089_vm14 = vmor %vm3087_vm12, %vm3088_vm10  ;;  %vm3127_vm0 = vweird.f32 %v7684_v47 }
 0x3e4   :  { %v3083_v9 = vmul.f32 %v7672_v16, %v3082_v21 }
 0x3e5   :  { %v3055_v60 = vsub.f32 1.5, %v3054_v37  ;;  %v3094_v37 = vmul.f32 0.5, %v3093_v32 }
 0x3e6   :  { %v3084_v42 = vmul.f32 0.5, %v3083_v9 }
 0x3e7   :  { %v3056_v28 = vmul.f32 %v7641_v63, %v3055_v60 }
 0x3e8   :  { %v3085_v60 = vsub.f32 1.5, %v3084_v42 }
 0x3e9   :  { %4594 = vset.pattern.permute.xlu2 %v6788_v22  ;;  %v3060_v51 = vsel %vm3059_vm8, %v7641_v63, %v3056_v28  ;;  %v4131_v63 = vmul.f32 %v4938_v1, %v7178_v10  ;;  %v7712_v28 = vadd.f32 1e-05, %v2382_v50 }
 0x3ea   :  { %v3529_v43 = vmul.f32 %v3060_v51, %v7253_v58  ;;  %v3086_v21 = vmul.f32 %v7672_v16, %v3085_v60  ;;  %v8682_v60 = vld [vmem:[#allocation93_spill] sm:$0xff] }
 0x3eb   :  { %3780 = vperm.xlu1 %4595, %v7079_v26   ;;  %v3684_v45 = vpop.permute.xlu2 %3683  ;;  %4714 = vrsqrt.f32 %v7712_v28  ;;  %vm3147_vm3 = vweird.f32 %v7712_v28 }
 0x3ec   :  { %v4044_v52 = vsub.f32 %v3684_v45, %v3980_v44  ;;  %v8676_v44 = vld [vmem:[#allocation43_spill] sm:$0xff]  ;;  %v3090_v51 = vsel %vm3089_vm14, %v7672_v16, %v3086_v21 }
 0x3ed   :  { %v3678_v7 = vpop.permute.xlu1 %3677  ;;  %v3983_v62 = vmul.f32 %v7178_v10, %v8676_v44  ;;  %v8680_v44 = vld [vmem:[#allocation31_spill] sm:$0xff] }
 0x3ee   :  { %v4043_v19 = vsub.f32 %v3678_v7, %v3979_v13  ;;  %v4253_v3 = vadd.f32 %v4125_v34, %v4044_v52  ;;  %v4254_v29 = vadd.f32 %v4126_v55, %v4044_v52  ;;  %v3981_v13 = vmul.f32 %v3529_v43, %v8677_v41  ;;  %v4939_v34 = vld [vmem:[#allocation2 + $0x148] sm:$0xff] }
 0x3ef   :  { %v4132_v58 = vmul.f32 %v4939_v34, %v7178_v10  ;;  %v3095_v55 = vsub.f32 1.5, %v3094_v37  ;;  %v3532_v37 = vmul.f32 %v3090_v51, %v7184_v23  ;;  %v4943_v16 = vld [vmem:[#allocation2 + $0x168] sm:$0xff]  ;;  %v4944_v23 = vld [vmem:[#allocation2 + $0x150] sm:$0xff]  ;;  %v8684_v51 = vld [vmem:[#allocation30_spill] sm:$0xff] }
 0x3f0   :  { %v4251_v53 = vadd.f32 %v4123_v40, %v4043_v19  ;;  %v4252_v25 = vadd.f32 %v4124_v5, %v4043_v19  ;;  %4381 = vst [vmem:[#allocation10 + $0x110] sm:$0xff] %v4253_v3  ;;  %v4127_v40 = vmul.f32 %v4940_v49, %v3529_v43  ;;  %v4128_v5 = vmul.f32 %v4941_v30, %v3529_v43  ;;  %v7699_v19 = vpop.eup %4712  ;;  %v8681_v30 = vld [vmem:[#allocation100_spill] sm:$0xff] }
 0x3f1   :  { %4382 = vst [vmem:[#allocation10 + $0x118] sm:$0xff] %v4254_v29  ;;  %3774 = vperm.xlu2 %4594, %v7079_v26   ;;  %v3122_v10 = vmul.f32 %v7699_v19, %v7684_v47  ;;  %v3096_v6 = vmul.f32 %v7670_v24, %v3095_v55  ;;  %v4133_v1 = vmul.f32 %v4944_v23, %v3532_v37  ;;  %vm3128_vm15 = vweird.f32 %v7699_v19  ;;  %v8683_v47 = vld [vmem:[#allocation32_spill] sm:$0xff] }
 0x3f2   :  { %4379 = vst [vmem:[#allocation10 + $0x100] sm:$0xff] %v4251_v53  ;;  %vm3129_vm1 = vmor %vm3127_vm0, %vm3128_vm15 }
 0x3f3   :  { %4598 = vset.pattern.permute.xlu1 %v6858_v39  ;;  %4380 = vst [vmem:[#allocation10 + $0x108] sm:$0xff] %v4252_v25  ;;  %v3123_v32 = vmul.f32 %v7699_v19, %v3122_v10  ;;  %v3100_v9 = vsel %vm3099_vm13, %v7670_v24, %v3096_v6  ;;  %v4942_v24 = vld [vmem:[#allocation2 + $0x160] sm:$0xff] }
 0x3f4   :  { %v3533_v43 = vmul.f32 %v3100_v9, %v7227_v35 }
 0x3f6   :  { %v3985_v31 = vmul.f32 %v3533_v43, %v8679_v4  ;;  %v4135_v41 = vmul.f32 %v4942_v24, %v3533_v43  ;;  %v4947_v4 = vld [vmem:[#allocation2 + $0x198] sm:$0xff] }
 0x3f7   :  { %v4949_v24 = vld [vmem:[#allocation2 + $0x178] sm:$0xff] }
 0x3f9   :  { %4597 = vset.pattern.permute.xlu2 %v6836_v15 }
 0x3fb   :  { %3798 = vperm.xlu1 %4598, %v7079_v26   ;;  %v3702_v45 = vpop.permute.xlu2 %3701 }
 0x3fc   :  { %v4047_v52 = vsub.f32 %v3702_v45, %v3983_v62  ;;  %v3984_v62 = vmul.f32 %v3532_v37, %v8680_v44 }
 0x3fd   :  { %v3690_v18 = vpop.permute.xlu1 %3689 }
 0x3fe   :  { %v4045_v7 = vsub.f32 %v3690_v18, %v3981_v13  ;;  %v4259_v3 = vadd.f32 %v4131_v63, %v4047_v52  ;;  %v4260_v29 = vadd.f32 %v4132_v58, %v4047_v52  ;;  %v4136_v13 = vmul.f32 %v4943_v16, %v3533_v43  ;;  %v4945_v63 = vld [vmem:[#allocation2 + $0x158] sm:$0xff]  ;;  %v7725_v18 = vpop.eup %4714 }
 0x3ff   :  { %v4134_v34 = vmul.f32 %v4945_v63, %v3532_v37  ;;  %v3986_v43 = vmul.f32 %v7282_v0, %v8684_v51  ;;  %v8685_v63 = vld [vmem:[#allocation95_spill] sm:$0xff]  ;;  %vm3148_vm2 = vweird.f32 %v7725_v18 }
 0x400   :  { %v4255_v53 = vadd.f32 %v4127_v40, %v4045_v7  ;;  %v4256_v25 = vadd.f32 %v4128_v5, %v4045_v7  ;;  %4387 = vst [vmem:[#allocation10 + $0x140] sm:$0xff] %v4259_v3  ;;  %v2385_v5 = vmul.f32 %v8681_v30, %v5563_v54  ;;  %v2383_v3 = vmul.f32 %v8682_v60, %v5563_v54  ;;  %vm3149_vm4 = vmor %vm3147_vm3, %vm3148_vm2  ;;  %v4952_v51 = vld [vmem:[#allocation2 + $0x1a0] sm:$0xff] }
 0x401   :  { %4388 = vst [vmem:[#allocation10 + $0x148] sm:$0xff] %v4260_v29  ;;  %3792 = vperm.xlu2 %4597, %v7079_v26   ;;  %v3142_v29 = vmul.f32 %v7725_v18, %v7712_v28  ;;  %v8686_v28 = vld [vmem:[#allocation53_spill] sm:$0xff] }
 0x402   :  { %4383 = vst [vmem:[#allocation10 + $0x120] sm:$0xff] %v4255_v53  ;;  %v7740_v27 = vadd.f32 1e-05, %v2383_v3 }
 0x403   :  { %4600 = vset.pattern.permute.xlu1 %v6881_v61  ;;  %4384 = vst [vmem:[#allocation10 + $0x128] sm:$0xff] %v4256_v25  ;;  %v3124_v61 = vmul.f32 0.5, %v3123_v32  ;;  %v7738_v25 = vadd.f32 1e-05, %v2385_v5  ;;  %v3143_v50 = vmul.f32 %v7725_v18, %v3142_v29 }
 0x404   :  { %vm3157_vm9 = vweird.f32 %v7740_v27 }
 0x405   :  { %v3125_v52 = vsub.f32 1.5, %v3124_v61  ;;  %4716 = vrsqrt.f32 %v7738_v25  ;;  %v3144_v21 = vmul.f32 0.5, %v3143_v50  ;;  %v4946_v61 = vld [vmem:[#allocation2 + $0x190] sm:$0xff]  ;;  %vm3177_vm7 = vweird.f32 %v7738_v25 }
 0x406   :  { %4718 = vrsqrt.f32 %v7740_v27 }
 0x407   :  { %v3126_v53 = vmul.f32 %v7699_v19, %v3125_v52 }
 0x409   :  { %4599 = vset.pattern.permute.xlu2 %v6841_v46  ;;  %v3130_v10 = vsel %vm3129_vm1, %v7699_v19, %v3126_v53  ;;  %v8687_v53 = vld [vmem:[#allocation33_spill] sm:$0xff] }
 0x40a   :  { %v3536_v6 = vmul.f32 %v3130_v10, %v7238_v14  ;;  %v3989_v50 = vmul.f32 %v7207_v2, %v8687_v53 }
 0x40b   :  { %3810 = vperm.xlu1 %4600, %v7079_v26   ;;  %v3714_v42 = vpop.permute.xlu2 %3713  ;;  %v7754_v16 = vpop.eup %4716 }
 0x40c   :  { %v4049_v45 = vsub.f32 %v3714_v42, %v3985_v31  ;;  %v3988_v32 = vmul.f32 %v3536_v6, %v8683_v47  ;;  %v4141_v19 = vmul.f32 %v4946_v61, %v3536_v6  ;;  %v4142_v14 = vmul.f32 %v4947_v4, %v3536_v6  ;;  %v7756_v52 = vpop.eup %4718 }
 0x40d   :  { %v3708_v35 = vpop.permute.xlu1 %3707  ;;  %v3145_v42 = vsub.f32 1.5, %v3144_v21  ;;  %v4951_v21 = vld [vmem:[#allocation2 + $0x1b8] sm:$0xff]  ;;  %vm3178_vm5 = vweird.f32 %v7754_v16  ;;  %vm3158_vm6 = vweird.f32 %v7756_v52 }
 0x40e   :  { %v4048_v58 = vsub.f32 %v3708_v35, %v3984_v62  ;;  %v4263_v55 = vadd.f32 %v4135_v41, %v4049_v45  ;;  %v4264_v7 = vadd.f32 %v4136_v13, %v4049_v45  ;;  %v4948_v62 = vld [vmem:[#allocation2 + $0x170] sm:$0xff]  ;;  %v4138_v41 = vmul.f32 %v4949_v24, %v7282_v0  ;;  %vm3179_vm8 = vmor %vm3177_vm7, %vm3178_vm5 }
 0x40f   :  { %v4137_v45 = vmul.f32 %v4948_v62, %v7282_v0  ;;  %v3152_v0 = vmul.f32 %v7756_v52, %v7740_v27  ;;  %v8688_v62 = vld [vmem:[#allocation102_spill] sm:$0xff]  ;;  %vm3159_vm10 = vmor %vm3157_vm9, %vm3158_vm6  ;;  %v8690_v27 = vld [vmem:[#allocation56_spill] sm:$0xff] }
 0x410   :  { %v4261_v49 = vadd.f32 %v4133_v1, %v4048_v58  ;;  %v4262_v40 = vadd.f32 %v4134_v34, %v4048_v58  ;;  %4391 = vst [vmem:[#allocation10 + $0x160] sm:$0xff] %v4263_v55  ;;  %v2386_v34 = vmul.f32 %v8685_v63, %v5563_v54  ;;  %v3172_v58 = vmul.f32 %v7754_v16, %v7738_v25  ;;  %v8689_v25 = vld [vmem:[#allocation122_spill] sm:$0xff] }
 0x411   :  { %4392 = vst [vmem:[#allocation10 + $0x168] sm:$0xff] %v4264_v7  ;;  %3804 = vperm.xlu2 %4599, %v7079_v26   ;;  %v3146_v55 = vmul.f32 %v7725_v18, %v3145_v42  ;;  %v3153_v30 = vmul.f32 %v7756_v52, %v3152_v0 }
 0x412   :  { %4389 = vst [vmem:[#allocation10 + $0x150] sm:$0xff] %v4261_v49  ;;  %v7769_v7 = vadd.f32 1e-05, %v2386_v34  ;;  %v3173_v49 = vmul.f32 %v7754_v16, %v3172_v58 }
 0x413   :  { %4603 = vset.pattern.permute.xlu1 %v6904_v59  ;;  %4390 = vst [vmem:[#allocation10 + $0x158] sm:$0xff] %v4262_v40  ;;  %v3150_v40 = vsel %vm3149_vm4, %v7725_v18, %v3146_v55  ;;  %v4950_v18 = vld [vmem:[#allocation2 + $0x1b0] sm:$0xff] }
 0x414   :  { %v3538_v5 = vmul.f32 %v3150_v40, %v7250_v8  ;;  %4720 = vrsqrt.f32 %v7769_v7  ;;  %v3174_v60 = vmul.f32 0.5, %v3173_v49  ;;  %vm3187_vm12 = vweird.f32 %v7769_v7 }
 0x416   :  { %v3990_v3 = vmul.f32 %v3538_v5, %v8686_v28  ;;  %v4145_v6 = vmul.f32 %v4950_v18, %v3538_v5  ;;  %v4146_v47 = vmul.f32 %v4951_v21, %v3538_v5 }
 0x419   :  { %4602 = vset.pattern.permute.xlu2 %v7000_v12 }
 0x41b   :  { %3828 = vperm.xlu1 %4603, %v7079_v26   ;;  %v3732_v9 = vpop.permute.xlu2 %3731 }
 0x41c   :  { %v4052_v37 = vsub.f32 %v3732_v9, %v3988_v32  ;;  %v3175_v32 = vsub.f32 1.5, %v3174_v60 }
 0x41d   :  { %v3720_v31 = vpop.permute.xlu1 %3719 }
 0x41e   :  { %v4050_v44 = vsub.f32 %v3720_v31, %v3986_v43  ;;  %v4269_v13 = vadd.f32 %v4141_v19, %v4052_v37  ;;  %v4270_v35 = vadd.f32 %v4142_v14, %v4052_v37  ;;  %v4143_v43 = vmul.f32 %v4952_v51, %v7207_v2  ;;  %v4953_v37 = vld [vmem:[#allocation2 + $0x1a8] sm:$0xff]  ;;  %v7783_v31 = vpop.eup %4720 }
 0x41f   :  { %v4144_v61 = vmul.f32 %v4953_v37, %v7207_v2  ;;  %v3176_v24 = vmul.f32 %v7754_v16, %v3175_v32  ;;  %v3182_v2 = vmul.f32 %v7783_v31, %v7769_v7  ;;  %v8693_v32 = vld [vmem:[#allocation104_spill] sm:$0xff]  ;;  %vm3188_vm11 = vweird.f32 %v7783_v31  ;;  %v8697_v7 = vld [vmem:[#allocation45_spill] sm:$0xff] }
 0x420   :  { %v4265_v23 = vadd.f32 %v4137_v45, %v4050_v44  ;;  %v4266_v1 = vadd.f32 %v4138_v41, %v4050_v44  ;;  %4397 = vst [vmem:[#allocation10 + $0x190] sm:$0xff] %v4269_v13  ;;  %v2388_v45 = vmul.f32 %v8688_v62, %v5563_v54  ;;  %vm3189_vm13 = vmor %vm3187_vm12, %vm3188_vm11  ;;  %v8696_v62 = vld [vmem:[#allocation54_spill] sm:$0xff] }
 0x421   :  { %4398 = vst [vmem:[#allocation10 + $0x198] sm:$0xff] %v4270_v35  ;;  %3822 = vperm.xlu2 %4602, %v7079_v26   ;;  %v3180_v35 = vsel %vm3179_vm8, %v7754_v16, %v3176_v24  ;;  %v8691_v16 = vld [vmem:[#allocation52_spill] sm:$0xff] }
 0x422   :  { %4393 = vst [vmem:[#allocation10 + $0x170] sm:$0xff] %v4265_v23  ;;  %v7797_v13 = vadd.f32 1e-05, %v2388_v45  ;;  %v3183_v23 = vmul.f32 %v7783_v31, %v3182_v2  ;;  %v3995_v45 = vmul.f32 %v8697_v7, %v8696_v62  ;;  %v8698_v2 = vld [vmem:[#allocation55_spill] sm:$0xff] }
 0x423   :  { %4605 = vset.pattern.permute.xlu1 %v6933_v33  ;;  %4394 = vst [vmem:[#allocation10 + $0x178] sm:$0xff] %v4266_v1  ;;  %v3154_v33 = vmul.f32 0.5, %v3153_v30  ;;  %v3541_v1 = vmul.f32 %v3180_v35, %v7262_v11  ;;  %v4954_v30 = vld [vmem:[#allocation2 + $0x1e0] sm:$0xff]  ;;  %v4955_v11 = vld [vmem:[#allocation2 + $0x1e8] sm:$0xff] }
 0x424   :  { %4722 = vrsqrt.f32 %v7797_v13  ;;  %v3184_v58 = vmul.f32 0.5, %v3183_v23  ;;  %v4958_v23 = vld [vmem:[#allocation2 + $0x200] sm:$0xff]  ;;  %vm3207_vm15 = vweird.f32 %v7797_v13 }
 0x425   :  { %v3155_v19 = vsub.f32 1.5, %v3154_v33  ;;  %v3993_v55 = vmul.f32 %v3541_v1, %v8690_v27  ;;  %v4151_v5 = vmul.f32 %v4954_v30, %v3541_v1  ;;  %v4152_v60 = vmul.f32 %v4955_v11, %v3541_v1  ;;  %v4959_v1 = vld [vmem:[#allocation2 + $0x208] sm:$0xff] }
 0x426   :  { %v3185_v53 = vsub.f32 1.5, %v3184_v58  ;;  %v4960_v58 = vld [vmem:[#allocation2 + $0x1f0] sm:$0xff] }
 0x427   :  { %v3156_v41 = vmul.f32 %v7756_v52, %v3155_v19 }
 0x429   :  { %4604 = vset.pattern.permute.xlu2 %v6863_v17  ;;  %v3160_v63 = vsel %vm3159_vm10, %v7756_v52, %v3156_v41 }
 0x42a   :  { %v3539_v34 = vmul.f32 %v3160_v63, %v7309_v48  ;;  %v4956_v48 = vld [vmem:[#allocation2 + $0x1c0] sm:$0xff]  ;;  %v7809_v18 = vpop.eup %4722  ;;  %v4156_v63 = vmul.f32 %v4959_v1, %v8697_v7 }
 0x42b   :  { %3840 = vperm.xlu1 %4605, %v7079_v26   ;;  %v3744_v29 = vpop.permute.xlu2 %3743  ;;  %v3202_v51 = vmul.f32 %v7809_v18, %v7797_v13  ;;  %vm3208_vm14 = vweird.f32 %v7809_v18 }
 0x42c   :  { %v4054_v10 = vsub.f32 %v3744_v29, %v3990_v3  ;;  %v3991_v49 = vmul.f32 %v3539_v34, %v8691_v16  ;;  %v4147_v28 = vmul.f32 %v4956_v48, %v3539_v34  ;;  %v4957_v3 = vld [vmem:[#allocation2 + $0x1c8] sm:$0xff]  ;;  %vm3209_vm0 = vmor %vm3207_vm15, %vm3208_vm14 }
 0x42d   :  { %v3738_v8 = vpop.permute.xlu1 %3737  ;;  %v4148_v29 = vmul.f32 %v4957_v3, %v3539_v34  ;;  %v3203_v19 = vmul.f32 %v7809_v18, %v3202_v51  ;;  %v8703_v51 = vld [vmem:[#allocation59_spill] sm:$0xff] }
 0x42e   :  { %v4053_v9 = vsub.f32 %v3738_v8, %v3989_v50  ;;  %v4273_v4 = vadd.f32 %v4145_v6, %v4054_v10  ;;  %v4274_v14 = vadd.f32 %v4146_v47, %v4054_v10  ;;  %v8692_v47 = vld [vmem:[#allocation97_spill] sm:$0xff] }
 0x42f   :  { %v2392_v8 = vmul.f32 %v8692_v47, %v5563_v54 }
 0x430   :  { %v4271_v42 = vadd.f32 %v4143_v43, %v4053_v9  ;;  %v4272_v44 = vadd.f32 %v4144_v61, %v4053_v9  ;;  %4401 = vst [vmem:[#allocation10 + $0x1b0] sm:$0xff] %v4273_v4  ;;  %v2391_v9 = vmul.f32 %v8693_v32, %v5563_v54  ;;  %v3186_v43 = vmul.f32 %v7783_v31, %v3185_v53  ;;  %v8702_v32 = vld [vmem:[#allocation49_spill] sm:$0xff] }
 0x431   :  { %4402 = vst [vmem:[#allocation10 + $0x1b8] sm:$0xff] %v4274_v14  ;;  %3834 = vperm.xlu2 %4604, %v7079_v26   ;;  %v7821_v37 = vadd.f32 1e-05, %v2392_v8  ;;  %v8694_v14 = vld [vmem:[#allocation28_spill] sm:$0xff] }
 0x432   :  { %4399 = vst [vmem:[#allocation10 + $0x1a0] sm:$0xff] %v4271_v42  ;;  %v7824_v61 = vadd.f32 1e-05, %v2391_v9  ;;  %v3190_v4 = vsel %vm3189_vm13, %v7783_v31, %v3186_v43  ;;  %v4155_v31 = vmul.f32 %v4958_v23, %v8697_v7  ;;  %v8701_v8 = vld [vmem:[#allocation60_spill] sm:$0xff] }
 0x433   :  { %4608 = vset.pattern.permute.xlu1 %v6950_v57  ;;  %4400 = vst [vmem:[#allocation10 + $0x1a8] sm:$0xff] %v4272_v44  ;;  %v3542_v42 = vmul.f32 %v3190_v4, %v8694_v14  ;;  %4724 = vrsqrt.f32 %v7821_v37  ;;  %v8695_v44 = vld [vmem:[#allocation18_spill] sm:$0xff]  ;;  %v3998_v13 = vmul.f32 %v8702_v32, %v8701_v8  ;;  %v4962_v4 = vld [vmem:[#allocation2 + $0x230] sm:$0xff]  ;;  %vm3247_vm3 = vweird.f32 %v7821_v37  ;;  %v4969_v8 = vld [vmem:[#allocation2 + $0x248] sm:$0xff] }
 0x434   :  { %4726 = vrsqrt.f32 %v7824_v61  ;;  %v4963_v14 = vld [vmem:[#allocation2 + $0x238] sm:$0xff]  ;;  %vm3237_vm4 = vweird.f32 %v7824_v61 }
 0x435   :  { %v3994_v41 = vmul.f32 %v3542_v42, %v8698_v2  ;;  %v4153_v27 = vmul.f32 %v4960_v58, %v3542_v42 }
 0x439   :  { %4607 = vset.pattern.permute.xlu2 %v8689_v25 }
 0x43b   :  { %3858 = vperm.xlu1 %4608, %v7079_v26   ;;  %v3762_v0 = vpop.permute.xlu2 %3761 }
 0x43c   :  { %v4057_v40 = vsub.f32 %v3762_v0, %v3993_v55  ;;  %v4961_v55 = vld [vmem:[#allocation2 + $0x1f8] sm:$0xff] }
 0x43d   :  { %v3750_v52 = vpop.permute.xlu1 %3749  ;;  %v4154_v0 = vmul.f32 %v4961_v55, %v3542_v42  ;;  %v4162_v42 = vmul.f32 %v4963_v14, %v8702_v32  ;;  %v8710_v14 = vld [vmem:[#allocation101_spill] sm:$0xff] }
 0x43e   :  { %v4055_v33 = vsub.f32 %v3750_v52, %v3991_v49  ;;  %v4279_v50 = vadd.f32 %v4151_v5, %v4057_v40  ;;  %v4280_v10 = vadd.f32 %v4152_v60, %v4057_v40  ;;  %v7838_v49 = vpop.eup %4724 }
 0x43f   :  { %v7840_v11 = vpop.eup %4726  ;;  %vm3248_vm1 = vweird.f32 %v7838_v49 }
 0x440   :  { %v4275_v6 = vadd.f32 %v4147_v28, %v4055_v33  ;;  %v4276_v21 = vadd.f32 %v4148_v29, %v4055_v33  ;;  %4407 = vst [vmem:[#allocation10 + $0x1e0] sm:$0xff] %v4279_v50  ;;  %v8699_v33 = vld [vmem:[#allocation99_spill] sm:$0xff]  ;;  %v3242_v28 = vmul.f32 %v7838_v49, %v7821_v37  ;;  %v3232_v3 = vmul.f32 %v7840_v11, %v7824_v61  ;;  %vm3249_vm5 = vmor %vm3247_vm3, %vm3248_vm1  ;;  %v8707_v37 = vld [vmem:[#allocation65_spill] sm:$0xff] }
 0x441   :  { %4408 = vst [vmem:[#allocation10 + $0x1e8] sm:$0xff] %v4280_v10  ;;  %3852 = vperm.xlu2 %4607, %v7079_v26   ;;  %v2395_v48 = vmul.f32 %v8699_v33, %v5563_v54  ;;  %vm3238_vm2 = vweird.f32 %v7840_v11  ;;  %v8706_v33 = vld [vmem:[#allocation58_spill] sm:$0xff] }
 0x442   :  { %4403 = vst [vmem:[#allocation10 + $0x1c0] sm:$0xff] %v4275_v6  ;;  %v3243_v50 = vmul.f32 %v7838_v49, %v3242_v28  ;;  %v8700_v6 = vld [vmem:[#allocation133_spill] sm:$0xff]  ;;  %vm3239_vm6 = vmor %vm3237_vm4, %vm3238_vm2 }
 0x443   :  { %4610 = vset.pattern.permute.xlu1 %v6788_v22  ;;  %4404 = vst [vmem:[#allocation10 + $0x1c8] sm:$0xff] %v4276_v21  ;;  %v3204_v22 = vmul.f32 0.5, %v3203_v19  ;;  %v7852_v53 = vadd.f32 1e-05, %v2395_v48 }
 0x444   :  { %v3244_v47 = vmul.f32 0.5, %v3243_v50 }
 0x445   :  { %v3205_v40 = vsub.f32 1.5, %v3204_v22  ;;  %4728 = vrsqrt.f32 %v7852_v53  ;;  %vm3277_vm8 = vweird.f32 %v7852_v53 }
 0x446   :  { %v3245_v62 = vsub.f32 1.5, %v3244_v47  ;;  %v4968_v47 = vld [vmem:[#allocation2 + $0x240] sm:$0xff] }
 0x447   :  { %v3206_v29 = vmul.f32 %v7809_v18, %v3205_v40 }
 0x448   :  { %v3246_v55 = vmul.f32 %v7838_v49, %v3245_v62 }
 0x449   :  { %4609 = vset.pattern.permute.xlu2 %v6888_v36  ;;  %v3210_v10 = vsel %vm3209_vm0, %v7809_v18, %v3206_v29  ;;  %v4161_v18 = vmul.f32 %v4962_v4, %v8702_v32  ;;  %v8709_v4 = vld [vmem:[#allocation109_spill] sm:$0xff] }
 0x44a   :  { %v3544_v21 = vmul.f32 %v3210_v10, %v8700_v6 }
 0x44b   :  { %3871 = vperm.xlu1 %4610, %v8695_v44   ;;  %v3775_v24 = vpop.permute.xlu2 %3774 }
 0x44c   :  { %v4059_v35 = vsub.f32 %v3775_v24, %v3995_v45  ;;  %v3996_v43 = vmul.f32 %v3544_v21, %v8703_v51  ;;  %v4965_v24 = vld [vmem:[#allocation2 + $0x218] sm:$0xff] }
 0x44d   :  { %v3768_v34 = vpop.permute.xlu1 %3767  ;;  %v4158_v2 = vmul.f32 %v4965_v24, %v3544_v21 }
 0x44e   :  { %v4058_v16 = vsub.f32 %v3768_v34, %v3994_v41  ;;  %v4283_v30 = vadd.f32 %v4155_v31, %v4059_v35  ;;  %v4284_v5 = vadd.f32 %v4156_v63, %v4059_v35  ;;  %v7867_v41 = vpop.eup %4728  ;;  %v8704_v34 = vld [vmem:[#allocation106_spill] sm:$0xff] }
 0x44f   :  { %v2397_v58 = vmul.f32 %v8704_v34, %v5563_v54  ;;  %vm3278_vm7 = vweird.f32 %v7867_v41 }
 0x450   :  { %v4281_v60 = vadd.f32 %v4153_v27, %v4058_v16  ;;  %v4282_v52 = vadd.f32 %v4154_v0, %v4058_v16  ;;  %4411 = vst [vmem:[#allocation10 + $0x200] sm:$0xff] %v4283_v30  ;;  %v3272_v27 = vmul.f32 %v7867_v41, %v7852_v53  ;;  %v3250_v30 = vsel %vm3249_vm5, %v7838_v49, %v3246_v55  ;;  %v4966_v49 = vld [vmem:[#allocation2 + $0x250] sm:$0xff]  ;;  %vm3279_vm9 = vmor %vm3277_vm8, %vm3278_vm7  ;;  %v4971_v55 = vld [vmem:[#allocation2 + $0x288] sm:$0xff] }
 0x451   :  { %4412 = vst [vmem:[#allocation10 + $0x208] sm:$0xff] %v4284_v5  ;;  %3864 = vperm.xlu2 %4609, %v7079_v26   ;;  %v3233_v26 = vmul.f32 %v7840_v11, %v3232_v3  ;;  %v7880_v16 = vadd.f32 1e-05, %v2397_v58  ;;  %v8708_v3 = vld [vmem:[#allocation66_spill] sm:$0xff] }
 0x452   :  { %4409 = vst [vmem:[#allocation10 + $0x1f0] sm:$0xff] %v4281_v60  ;;  %v3273_v40 = vmul.f32 %v7867_v41, %v3272_v27  ;;  %v8705_v60 = vld [vmem:[#allocation132_spill] sm:$0xff]  ;;  %v4970_v27 = vld [vmem:[#allocation2 + $0x280] sm:$0xff] }
 0x453   :  { %4613 = vset.pattern.permute.xlu1 %v6836_v15  ;;  %4410 = vst [vmem:[#allocation10 + $0x1f8] sm:$0xff] %v4282_v52  ;;  %v3234_v15 = vmul.f32 0.5, %v3233_v26  ;;  %v3548_v52 = vmul.f32 %v3250_v30, %v8705_v60  ;;  %4730 = vrsqrt.f32 %v7880_v16  ;;  %v4972_v60 = vld [vmem:[#allocation2 + $0x260] sm:$0xff]  ;;  %vm3297_vm11 = vweird.f32 %v7880_v16 }
 0x455   :  { %v3235_v35 = vsub.f32 1.5, %v3234_v15  ;;  %v4000_v61 = vmul.f32 %v3548_v52, %v8707_v37  ;;  %v4165_v26 = vmul.f32 %v4966_v49, %v3548_v52 }
 0x457   :  { %v3236_v0 = vmul.f32 %v7840_v11, %v3235_v35 }
 0x459   :  { %4612 = vset.pattern.permute.xlu2 %v6798_v56  ;;  %v4964_v56 = vld [vmem:[#allocation2 + $0x210] sm:$0xff]  ;;  %v3240_v5 = vsel %vm3239_vm6, %v7840_v11, %v3236_v0  ;;  %v4967_v11 = vld [vmem:[#allocation2 + $0x258] sm:$0xff] }
 0x45a   :  { %v4157_v45 = vmul.f32 %v4964_v56, %v3544_v21  ;;  %v3547_v48 = vmul.f32 %v3240_v5, %v8706_v33  ;;  %v4166_v10 = vmul.f32 %v4967_v11, %v3548_v52 }
 0x45b   :  { %3889 = vperm.xlu1 %4613, %v8695_v44   ;;  %v3793_v9 = vpop.permute.xlu2 %3792 }
 0x45c   :  { %v4062_v19 = vsub.f32 %v3793_v9, %v3998_v13  ;;  %v3999_v29 = vmul.f32 %v3547_v48, %v8708_v3  ;;  %v4163_v15 = vmul.f32 %v4968_v47, %v3547_v48  ;;  %v4164_v32 = vmul.f32 %v4969_v8, %v3547_v48 }
 0x45d   :  { %v3781_v22 = vpop.permute.xlu1 %3780 }
 0x45e   :  { %v4060_v7 = vsub.f32 %v3781_v22, %v3996_v43  ;;  %v4289_v23 = vadd.f32 %v4161_v18, %v4062_v19  ;;  %v4290_v31 = vadd.f32 %v4162_v42, %v4062_v19  ;;  %v2400_v18 = vmul.f32 %v8709_v4, %v5563_v54 }
 0x45f   :  { %v2398_v42 = vmul.f32 %v8710_v14, %v5563_v54  ;;  %v4975_v14 = vld [vmem:[#allocation2 + $0x2a8] sm:$0xff] }
 0x460   :  { %v4285_v1 = vadd.f32 %v4157_v45, %v4060_v7  ;;  %v4286_v63 = vadd.f32 %v4158_v2, %v4060_v7  ;;  %4417 = vst [vmem:[#allocation10 + $0x230] sm:$0xff] %v4289_v23  ;;  %v7906_v7 = vadd.f32 1e-05, %v2400_v18  ;;  %v8711_v2 = vld [vmem:[#allocation72_spill] sm:$0xff] }
 0x461   :  { %4418 = vst [vmem:[#allocation10 + $0x238] sm:$0xff] %v4290_v31  ;;  %3883 = vperm.xlu2 %4612, %v8695_v44   ;;  %v7908_v56 = vadd.f32 1e-05, %v2398_v42 }
 0x462   :  { %4413 = vst [vmem:[#allocation10 + $0x210] sm:$0xff] %v4285_v1  ;;  %4732 = vrsqrt.f32 %v7906_v7  ;;  %v8713_v1 = vld [vmem:[#allocation63_spill] sm:$0xff]  ;;  %vm3327_vm15 = vweird.f32 %v7906_v7 }
 0x463   :  { %4615 = vset.pattern.permute.xlu1 %v6841_v46  ;;  %4414 = vst [vmem:[#allocation10 + $0x218] sm:$0xff] %v4286_v63  ;;  %v3274_v46 = vmul.f32 0.5, %v3273_v40  ;;  %4734 = vrsqrt.f32 %v7908_v56  ;;  %v8714_v63 = vld [vmem:[#allocation135_spill] sm:$0xff]  ;;  %vm3307_vm1 = vweird.f32 %v7908_v56 }
 0x464   :  { %v4001_v34 = vmul.f32 %v8714_v63, %v8713_v1  ;;  %v4167_v52 = vmul.f32 %v4972_v60, %v8714_v63 }
 0x465   :  { %v3275_v21 = vsub.f32 1.5, %v3274_v46 }
 0x467   :  { %v3276_v62 = vmul.f32 %v7867_v41, %v3275_v21 }
 0x469   :  { %4614 = vset.pattern.permute.xlu2 %v6858_v39  ;;  %v7893_v39 = vpop.eup %4730  ;;  %v3280_v24 = vsel %vm3279_vm9, %v7867_v41, %v3276_v62 }
 0x46a   :  { %v3292_v22 = vmul.f32 %v7893_v39, %v7880_v16  ;;  %v3551_v35 = vmul.f32 %v3280_v24, %v8711_v2  ;;  %v7922_v48 = vpop.eup %4732  ;;  %vm3298_vm10 = vweird.f32 %v7893_v39  ;;  %v8717_v16 = vld [vmem:[#allocation74_spill] sm:$0xff]  ;;  %v4976_v24 = vld [vmem:[#allocation2 + $0x290] sm:$0xff] }
 0x46b   :  { %3901 = vperm.xlu1 %4615, %v8695_v44   ;;  %v3805_v28 = vpop.permute.xlu2 %3804  ;;  %v3322_v49 = vmul.f32 %v7922_v48, %v7906_v7  ;;  %vm3299_vm12 = vmor %vm3297_vm11, %vm3298_vm10  ;;  %v4977_v2 = vld [vmem:[#allocation2 + $0x298] sm:$0xff]  ;;  %vm3328_vm13 = vweird.f32 %v7922_v48 }
 0x46c   :  { %v4064_v50 = vsub.f32 %v3805_v28, %v4000_v61  ;;  %v3293_v45 = vmul.f32 %v7893_v39, %v3292_v22  ;;  %v4171_v41 = vmul.f32 %v4970_v27, %v3551_v35  ;;  %v4172_v0 = vmul.f32 %v4971_v55, %v3551_v35  ;;  %v7924_v61 = vpop.eup %4734  ;;  %vm3329_vm0 = vmor %vm3327_vm15, %vm3328_vm13  ;;  %v8723_v7 = vld [vmem:[#allocation50_spill] sm:$0xff] }
 0x46d   :  { %v3799_v6 = vpop.permute.xlu1 %3798  ;;  %v3302_v11 = vmul.f32 %v7924_v61, %v7908_v56  ;;  %vm3308_vm14 = vweird.f32 %v7924_v61 }
 0x46e   :  { %v4063_v13 = vsub.f32 %v3799_v6, %v3999_v29  ;;  %v4293_v9 = vadd.f32 %v4165_v26, %v4064_v50  ;;  %v4294_v51 = vadd.f32 %v4166_v10, %v4064_v50  ;;  %v3294_v23 = vmul.f32 0.5, %v3293_v45  ;;  %v8715_v29 = vld [vmem:[#allocation103_spill] sm:$0xff]  ;;  %vm3309_vm2 = vmor %vm3307_vm1, %vm3308_vm14 }
 0x46f   :  { %v2401_v50 = vmul.f32 %v8715_v29, %v5563_v54  ;;  %v3323_v6 = vmul.f32 %v7922_v48, %v3322_v49  ;;  %v3303_v47 = vmul.f32 %v7924_v61, %v3302_v11  ;;  %v4980_v11 = vld [vmem:[#allocation2 + $0x2b0] sm:$0xff] }
 0x470   :  { %v4291_v43 = vadd.f32 %v4163_v15, %v4063_v13  ;;  %v4292_v19 = vadd.f32 %v4164_v32, %v4063_v13  ;;  %4421 = vst [vmem:[#allocation10 + $0x250] sm:$0xff] %v4293_v9  ;;  %v3295_v30 = vsub.f32 1.5, %v3294_v23  ;;  %v8716_v15 = vld [vmem:[#allocation134_spill] sm:$0xff] }
 0x471   :  { %4422 = vst [vmem:[#allocation10 + $0x258] sm:$0xff] %v4294_v51  ;;  %3895 = vperm.xlu2 %4614, %v8695_v44   ;;  %v7937_v10 = vadd.f32 1e-05, %v2401_v50  ;;  %v3324_v32 = vmul.f32 0.5, %v3323_v6  ;;  %v8718_v51 = vld [vmem:[#allocation67_spill] sm:$0xff]  ;;  %v4979_v50 = vld [vmem:[#allocation2 + $0x2d8] sm:$0xff] }
 0x472   :  { %4419 = vst [vmem:[#allocation10 + $0x240] sm:$0xff] %v4291_v43  ;;  %v3296_v26 = vmul.f32 %v7893_v39, %v3295_v30  ;;  %v8719_v43 = vld [vmem:[#allocation69_spill] sm:$0xff] }
 0x473   :  { %4618 = vset.pattern.permute.xlu1 %v7000_v12  ;;  %4420 = vst [vmem:[#allocation10 + $0x248] sm:$0xff] %v4292_v19  ;;  %v8712_v12 = vld [vmem:[#allocation68_spill] sm:$0xff]  ;;  %4736 = vrsqrt.f32 %v7937_v10  ;;  %v4004_v19 = vmul.f32 %v8719_v43, %v8718_v51  ;;  %v3325_v62 = vsub.f32 1.5, %v3324_v32  ;;  %vm3337_vm4 = vweird.f32 %v7937_v10 }
 0x474   :  { %v4003_v53 = vmul.f32 %v3551_v35, %v8712_v12  ;;  %v3300_v21 = vsel %vm3299_vm12, %v7893_v39, %v3296_v26  ;;  %v4974_v39 = vld [vmem:[#allocation2 + $0x2a0] sm:$0xff]  ;;  %v4174_v35 = vmul.f32 %v4977_v2, %v8719_v43  ;;  %v8726_v51 = vld [vmem:[#allocation116_spill] sm:$0xff] }
 0x475   :  { %v3553_v8 = vmul.f32 %v3300_v21, %v8716_v15  ;;  %v3326_v27 = vmul.f32 %v7922_v48, %v3325_v62  ;;  %v4981_v21 = vld [vmem:[#allocation2 + $0x2b8] sm:$0xff]  ;;  %v8730_v2 = vld [vmem:[#allocation48_spill] sm:$0xff] }
 0x477   :  { %v4005_v13 = vmul.f32 %v3553_v8, %v8717_v16  ;;  %v4175_v18 = vmul.f32 %v4974_v39, %v3553_v8  ;;  %v4176_v42 = vmul.f32 %v4975_v14, %v3553_v8 }
 0x479   :  { %4617 = vset.pattern.permute.xlu2 %v6873_v38  ;;  %v4973_v38 = vld [vmem:[#allocation2 + $0x268] sm:$0xff] }
 0x47a   :  { %v4168_v33 = vmul.f32 %v4973_v38, %v8714_v63  ;;  %v8722_v38 = vld [vmem:[#allocation71_spill] sm:$0xff] }
 0x47b   :  { %3919 = vperm.xlu1 %4618, %v8695_v44   ;;  %v3823_v31 = vpop.permute.xlu2 %3822 }
 0x47c   :  { %v4067_v58 = vsub.f32 %v3823_v31, %v4003_v53  ;;  %v7951_v31 = vpop.eup %4736 }
 0x47d   :  { %v3811_v40 = vpop.permute.xlu1 %3810  ;;  %vm3338_vm3 = vweird.f32 %v7951_v31 }
 0x47e   :  { %v4065_v5 = vsub.f32 %v3811_v40, %v4001_v34  ;;  %v4299_v46 = vadd.f32 %v4171_v41, %v4067_v58  ;;  %v4300_v37 = vadd.f32 %v4172_v0, %v4067_v58  ;;  %v8720_v34 = vld [vmem:[#allocation112_spill] sm:$0xff]  ;;  %v3332_v41 = vmul.f32 %v7951_v31, %v7937_v10  ;;  %vm3339_vm5 = vmor %vm3337_vm4, %vm3338_vm3  ;;  %v8729_v10 = vld [vmem:[#allocation138_spill] sm:$0xff] }
 0x47f   :  { %v2403_v58 = vmul.f32 %v8720_v34, %v5563_v54  ;;  %v3330_v40 = vsel %vm3329_vm0, %v7922_v48, %v3326_v27  ;;  %v8724_v48 = vld [vmem:[#allocation73_spill] sm:$0xff]  ;;  %v4984_v34 = vld [vmem:[#allocation2 + $0x2e0] sm:$0xff] }
 0x480   :  { %v4295_v28 = vadd.f32 %v4167_v52, %v4065_v5  ;;  %v4296_v3 = vadd.f32 %v4168_v33, %v4065_v5  ;;  %4427 = vst [vmem:[#allocation10 + $0x280] sm:$0xff] %v4299_v46  ;;  %v3333_v30 = vmul.f32 %v7951_v31, %v3332_v41  ;;  %v8721_v5 = vld [vmem:[#allocation137_spill] sm:$0xff] }
 0x481   :  { %4428 = vst [vmem:[#allocation10 + $0x288] sm:$0xff] %v4300_v37  ;;  %3913 = vperm.xlu2 %4617, %v8695_v44   ;;  %v7965_v0 = vadd.f32 1e-05, %v2403_v58  ;;  %v3556_v60 = vmul.f32 %v3330_v40, %v8721_v5 }
 0x482   :  { %4423 = vst [vmem:[#allocation10 + $0x260] sm:$0xff] %v4295_v28 }
 0x483   :  { %4620 = vset.pattern.permute.xlu1 %v6863_v17  ;;  %4424 = vst [vmem:[#allocation10 + $0x268] sm:$0xff] %v4296_v3  ;;  %v3304_v17 = vmul.f32 0.5, %v3303_v47  ;;  %4738 = vrsqrt.f32 %v7965_v0  ;;  %v4008_v56 = vmul.f32 %v3556_v60, %v8723_v7  ;;  %v4978_v3 = vld [vmem:[#allocation2 + $0x2d0] sm:$0xff]  ;;  %v4182_v49 = vmul.f32 %v4979_v50, %v3556_v60 }
 0x484   :  { %v4181_v29 = vmul.f32 %v4978_v3, %v3556_v60  ;;  %vm3357_vm7 = vweird.f32 %v7965_v0  ;;  %v8732_v3 = vld [vmem:[#allocation117_spill] sm:$0xff] }
 0x485   :  { %v3305_v23 = vsub.f32 1.5, %v3304_v17 }
 0x487   :  { %v3306_v55 = vmul.f32 %v7924_v61, %v3305_v23 }
 0x489   :  { %4619 = vset.pattern.permute.xlu2 %v6904_v59  ;;  %v4173_v59 = vmul.f32 %v4976_v24, %v8719_v43  ;;  %v3310_v52 = vsel %vm3309_vm2, %v7924_v61, %v3306_v55  ;;  %v7977_v32 = vpop.eup %4738  ;;  %v2406_v43 = vmul.f32 %v8726_v51, %v5563_v54 }
 0x48a   :  { %v3554_v33 = vmul.f32 %v3310_v52, %v8722_v38  ;;  %vm3358_vm6 = vweird.f32 %v7977_v32 }
 0x48b   :  { %3931 = vperm.xlu1 %4620, %v8695_v44   ;;  %v3835_v9 = vpop.permute.xlu2 %3834  ;;  %vm3359_vm8 = vmor %vm3357_vm7, %vm3358_vm6 }
 0x48c   :  { %v4069_v4 = vsub.f32 %v3835_v9, %v4005_v13  ;;  %v4006_v37 = vmul.f32 %v3554_v33, %v8724_v48  ;;  %v4177_v6 = vmul.f32 %v4980_v11, %v3554_v33  ;;  %v4178_v47 = vmul.f32 %v4981_v21, %v3554_v33  ;;  %v8725_v13 = vld [vmem:[#allocation105_spill] sm:$0xff]  ;;  %v8731_v33 = vld [vmem:[#allocation108_spill] sm:$0xff]  ;;  %v8735_v21 = vld [vmem:[#allocation62_spill] sm:$0xff] }
 0x48d   :  { %v3829_v22 = vpop.permute.xlu1 %3828  ;;  %v2407_v9 = vmul.f32 %v8725_v13, %v5563_v54 }
 0x48e   :  { %v4068_v45 = vsub.f32 %v3829_v22, %v4004_v19  ;;  %v4303_v12 = vadd.f32 %v4175_v18, %v4069_v4  ;;  %v4304_v53 = vadd.f32 %v4176_v42, %v4069_v4  ;;  %v3352_v19 = vmul.f32 %v7977_v32, %v7965_v0  ;;  %v8727_v22 = vld [vmem:[#allocation136_spill] sm:$0xff] }
 0x48f   :  { %v7989_v39 = vadd.f32 1e-05, %v2407_v9  ;;  %v7992_v18 = vadd.f32 1e-05, %v2406_v43  ;;  %v4988_v9 = vld [vmem:[#allocation2 + $0x300] sm:$0xff]  ;;  %v4989_v43 = vld [vmem:[#allocation2 + $0x308] sm:$0xff] }
 0x490   :  { %v4301_v1 = vadd.f32 %v4173_v59, %v4068_v45  ;;  %v4302_v63 = vadd.f32 %v4174_v35, %v4068_v45  ;;  %4431 = vst [vmem:[#allocation10 + $0x2a0] sm:$0xff] %v4303_v12  ;;  %v3353_v14 = vmul.f32 %v7977_v32, %v3352_v19  ;;  %v8728_v45 = vld [vmem:[#allocation46_spill] sm:$0xff]  ;;  %v4982_v12 = vld [vmem:[#allocation2 + $0x2f0] sm:$0xff] }
 0x491   :  { %4432 = vst [vmem:[#allocation10 + $0x2a8] sm:$0xff] %v4304_v53  ;;  %3925 = vperm.xlu2 %4619, %v8695_v44   ;;  %4740 = vrsqrt.f32 %v7989_v39  ;;  %v4010_v24 = vmul.f32 %v8729_v10, %v8728_v45  ;;  %v4185_v53 = vmul.f32 %v4982_v12, %v8729_v10  ;;  %v8736_v45 = vld [vmem:[#allocation121_spill] sm:$0xff]  ;;  %vm3397_vm11 = vweird.f32 %v7989_v39 }
 0x492   :  { %4429 = vst [vmem:[#allocation10 + $0x290] sm:$0xff] %v4301_v1  ;;  %4742 = vrsqrt.f32 %v7992_v18  ;;  %vm3387_vm12 = vweird.f32 %v7992_v18 }
 0x493   :  { %4622 = vset.pattern.permute.xlu1 %v8689_v25  ;;  %4430 = vst [vmem:[#allocation10 + $0x298] sm:$0xff] %v4302_v63  ;;  %v3334_v25 = vmul.f32 0.5, %v3333_v30 }
 0x497   :  { %v8006_v55 = vpop.eup %4740 }
 0x498   :  { %v8008_v60 = vpop.eup %4742  ;;  %v3392_v7 = vmul.f32 %v8006_v55, %v7989_v39  ;;  %vm3398_vm9 = vweird.f32 %v8006_v55 }
 0x499   :  { %4621 = vset.pattern.permute.xlu2 %v6918_v20  ;;  %v3335_v20 = vsub.f32 1.5, %v3334_v25  ;;  %v2410_v25 = vmul.f32 %v8731_v33, %v5563_v54  ;;  %vm3388_vm10 = vweird.f32 %v8008_v60  ;;  %vm3399_vm13 = vmor %vm3397_vm11, %vm3398_vm9 }
 0x49a   :  { %vm3389_vm14 = vmor %vm3387_vm12, %vm3388_vm10 }
 0x49b   :  { %3949 = vperm.xlu1 %4622, %v8695_v44   ;;  %v3853_v46 = vpop.permute.xlu2 %3852  ;;  %v3336_v4 = vmul.f32 %v7951_v31, %v3335_v20  ;;  %v8019_v48 = vadd.f32 1e-05, %v2410_v25  ;;  %v4986_v20 = vld [vmem:[#allocation2 + $0x320] sm:$0xff] }
 0x49c   :  { %v4072_v28 = vsub.f32 %v3853_v46, %v4008_v56  ;;  %v3382_v56 = vmul.f32 %v8008_v60, %v7992_v18 }
 0x49d   :  { %v3841_v61 = vpop.permute.xlu1 %3840  ;;  %v3340_v42 = vsel %vm3339_vm5, %v7951_v31, %v3336_v4  ;;  %v4983_v31 = vld [vmem:[#allocation2 + $0x2f8] sm:$0xff]  ;;  %4744 = vrsqrt.f32 %v8019_v48  ;;  %vm3427_vm0 = vweird.f32 %v8019_v48 }
 0x49e   :  { %v4070_v26 = vsub.f32 %v3841_v61, %v4006_v37  ;;  %v4309_v15 = vadd.f32 %v4181_v29, %v4072_v28  ;;  %v4310_v8 = vadd.f32 %v4182_v49, %v4072_v28  ;;  %v3557_v62 = vmul.f32 %v3340_v42, %v8727_v22  ;;  %v8733_v61 = vld [vmem:[#allocation61_spill] sm:$0xff] }
 0x49f   :  { %v4186_v1 = vmul.f32 %v4983_v31, %v8729_v10  ;;  %v3393_v37 = vmul.f32 %v8006_v55, %v3392_v7  ;;  %v3383_v28 = vmul.f32 %v8008_v60, %v3382_v56  ;;  %v2412_v10 = vmul.f32 %v8736_v45, %v5563_v54  ;;  %v8737_v31 = vld [vmem:[#allocation76_spill] sm:$0xff]  ;;  %v4993_v7 = vld [vmem:[#allocation2 + $0x338] sm:$0xff] }
 0x4a0   :  { %v4305_v17 = vadd.f32 %v4177_v6, %v4070_v26  ;;  %v4306_v16 = vadd.f32 %v4178_v47, %v4070_v26  ;;  %4437 = vst [vmem:[#allocation10 + $0x2d0] sm:$0xff] %v4309_v15  ;;  %v4009_v35 = vmul.f32 %v3557_v62, %v8730_v2  ;;  %v4183_v58 = vmul.f32 %v4984_v34, %v3557_v62  ;;  %v8734_v26 = vld [vmem:[#allocation57_spill] sm:$0xff] }
 0x4a1   :  { %4438 = vst [vmem:[#allocation10 + $0x2d8] sm:$0xff] %v4310_v8  ;;  %3943 = vperm.xlu2 %4621, %v8695_v44   ;;  %v3394_v50 = vmul.f32 0.5, %v3393_v37  ;;  %v3384_v49 = vmul.f32 0.5, %v3383_v28  ;;  %v4013_v11 = vmul.f32 %v8734_v26, %v8733_v61  ;;  %v4191_v15 = vmul.f32 %v4986_v20, %v8734_v26  ;;  %v4987_v8 = vld [vmem:[#allocation2 + $0x328] sm:$0xff]  ;;  %v4996_v45 = vld [vmem:[#allocation2 + $0x350] sm:$0xff] }
 0x4a2   :  { %4433 = vst [vmem:[#allocation10 + $0x2b0] sm:$0xff] %v4305_v17  ;;  %v4192_v17 = vmul.f32 %v4987_v8, %v8734_v26  ;;  %v8742_v61 = vld [vmem:[#allocation111_spill] sm:$0xff] }
 0x4a3   :  { %4624 = vset.pattern.permute.xlu1 %v6888_v36  ;;  %4434 = vst [vmem:[#allocation10 + $0x2b8] sm:$0xff] %v4306_v16  ;;  %v3354_v36 = vmul.f32 0.5, %v3353_v14  ;;  %v3395_v16 = vsub.f32 1.5, %v3394_v50  ;;  %v8032_v4 = vpop.eup %4744  ;;  %v3385_v14 = vsub.f32 1.5, %v3384_v49  ;;  %v8741_v50 = vld [vmem:[#allocation123_spill] sm:$0xff]  ;;  %v2413_v26 = vmul.f32 %v8742_v61, %v5563_v54 }
 0x4a4   :  { %v2415_v49 = vmul.f32 %v8741_v50, %v5563_v54  ;;  %vm3428_vm15 = vweird.f32 %v8032_v4 }
 0x4a5   :  { %v3355_v40 = vsub.f32 1.5, %v3354_v36  ;;  %v3386_v2 = vmul.f32 %v8008_v60, %v3385_v14  ;;  %vm3429_vm1 = vmor %vm3427_vm0, %vm3428_vm15 }
 0x4a7   :  { %v3356_v46 = vmul.f32 %v7977_v32, %v3355_v40 }
 0x4a9   :  { %4623 = vset.pattern.permute.xlu2 %v6950_v57  ;;  %v4985_v57 = vld [vmem:[#allocation2 + $0x2e8] sm:$0xff] }
 0x4aa   :  { %v4184_v27 = vmul.f32 %v4985_v57, %v3557_v62 }
 0x4ab   :  { %3961 = vperm.xlu1 %4624, %v8695_v44   ;;  %v3865_v59 = vpop.permute.xlu2 %3864 }
 0x4ac   :  { %v4074_v23 = vsub.f32 %v3865_v59, %v4010_v24  ;;  %v3422_v24 = vmul.f32 %v8032_v4, %v8019_v48  ;;  %v3396_v59 = vmul.f32 %v8006_v55, %v3395_v16  ;;  %v8745_v48 = vld [vmem:[#allocation64_spill] sm:$0xff] }
 0x4ad   :  { %v3859_v63 = vpop.permute.xlu1 %3858 }
 0x4ae   :  { %v4073_v41 = vsub.f32 %v3859_v63, %v4009_v35  ;;  %v4313_v30 = vadd.f32 %v4185_v53, %v4074_v23  ;;  %v4314_v5 = vadd.f32 %v4186_v1, %v4074_v23  ;;  %v8043_v35 = vadd.f32 1e-05, %v2412_v10  ;;  %v8738_v63 = vld [vmem:[#allocation107_spill] sm:$0xff] }
 0x4af   :  { %v3423_v23 = vmul.f32 %v8032_v4, %v3422_v24  ;;  %v3400_v12 = vsel %vm3399_vm13, %v8006_v55, %v3396_v59  ;;  %v3390_v53 = vsel %vm3389_vm14, %v8008_v60, %v3386_v2  ;;  %v4992_v60 = vld [vmem:[#allocation2 + $0x330] sm:$0xff]  ;;  %v4997_v24 = vld [vmem:[#allocation2 + $0x358] sm:$0xff] }
 0x4b0   :  { %v4311_v52 = vadd.f32 %v4183_v58, %v4073_v41  ;;  %v4312_v38 = vadd.f32 %v4184_v27, %v4073_v41  ;;  %4441 = vst [vmem:[#allocation10 + $0x2f0] sm:$0xff] %v4313_v30  ;;  %v3563_v1 = vmul.f32 %v3400_v12, %v8737_v31  ;;  %v3562_v34 = vmul.f32 %v3390_v53, %v8738_v63  ;;  %v8739_v58 = vld [vmem:[#allocation79_spill] sm:$0xff]  ;;  %v8740_v41 = vld [vmem:[#allocation80_spill] sm:$0xff] }
 0x4b1   :  { %4442 = vst [vmem:[#allocation10 + $0x2f8] sm:$0xff] %v4314_v5  ;;  %3955 = vperm.xlu2 %4623, %v8695_v44   ;;  %v3360_v44 = vsel %vm3359_vm8, %v7977_v32, %v3356_v46  ;;  %4746 = vrsqrt.f32 %v8043_v35  ;;  %v3424_v39 = vmul.f32 0.5, %v3423_v23  ;;  %v4990_v30 = vld [vmem:[#allocation2 + $0x340] sm:$0xff]  ;;  %vm3447_vm3 = vweird.f32 %v8043_v35 }
 0x4b2   :  { %4439 = vst [vmem:[#allocation10 + $0x2e0] sm:$0xff] %v4311_v52  ;;  %v3559_v29 = vmul.f32 %v3360_v44, %v8732_v3  ;;  %v4015_v57 = vmul.f32 %v3563_v1, %v8739_v58  ;;  %v4014_v18 = vmul.f32 %v3562_v34, %v8740_v41  ;;  %v4195_v5 = vmul.f32 %v4990_v30, %v3563_v1  ;;  %v4991_v52 = vld [vmem:[#allocation2 + $0x348] sm:$0xff] }
 0x4b3   :  { %4440 = vst [vmem:[#allocation10 + $0x2e8] sm:$0xff] %v4312_v38  ;;  %v4196_v38 = vmul.f32 %v4991_v52, %v3563_v1  ;;  %v3425_v33 = vsub.f32 1.5, %v3424_v39  ;;  %v4193_v25 = vmul.f32 %v4992_v60, %v3562_v34  ;;  %v4194_v56 = vmul.f32 %v4993_v7, %v3562_v34  ;;  %v8747_v63 = vld [vmem:[#allocation115_spill] sm:$0xff] }
 0x4b4   :  { %v4011_v47 = vmul.f32 %v3559_v29, %v8735_v21  ;;  %v4187_v51 = vmul.f32 %v4988_v9, %v3559_v29  ;;  %v4188_v19 = vmul.f32 %v4989_v43, %v3559_v29  ;;  %v8062_v21 = vadd.f32 1e-05, %v2415_v49  ;;  %v8746_v9 = vld [vmem:[#allocation119_spill] sm:$0xff] }
 0x4b5   :  { %v4197_v10 = vmul.f32 %v4996_v45, %v8746_v9  ;;  %v4198_v59 = vmul.f32 %v4997_v24, %v8746_v9  ;;  %v2416_v34 = vmul.f32 %v8747_v63, %v5563_v54  ;;  %v8748_v30 = vld [vmem:[#allocation51_spill] sm:$0xff] }
 0x4b6   :  { %4748 = vrsqrt.f32 %v8062_v21  ;;  %v5000_v49 = vld [vmem:[#allocation2 + $0x380] sm:$0xff]  ;;  %vm3477_vm7 = vweird.f32 %v8062_v21 }
 0x4b7   :  { %v4747_v37 = vpop.eup %4746 }
 0x4b8   :  { %vm3448_vm2 = vweird.f32 %v4747_v37 }
 0x4b9   :  { %vm3449_vm4 = vmor %vm3447_vm3, %vm3448_vm2 }
 0x4bb   :  { %v3884_v6 = vpop.permute.xlu2 %3883 }
 0x4bc   :  { %v4077_v0 = vsub.f32 %v3884_v6, %v4013_v11  ;;  %v3442_v11 = vmul.f32 %v4747_v37, %v8043_v35  ;;  %v3426_v6 = vmul.f32 %v8032_v4, %v3425_v33  ;;  %v8075_v2 = vpop.eup %4748  ;;  %v8751_v35 = vld [vmem:[#allocation110_spill] sm:$0xff] }
 0x4bd   :  { %v3872_v32 = vpop.permute.xlu1 %3871  ;;  %v3472_v39 = vmul.f32 %v8075_v2, %v8062_v21  ;;  %v4203_v61 = vmul.f32 %v5000_v49, %v8751_v35  ;;  %vm3478_vm5 = vweird.f32 %v8075_v2  ;;  %v8755_v21 = vld [vmem:[#allocation86_spill] sm:$0xff] }
 0x4be   :  { %v4075_v13 = vsub.f32 %v3872_v32, %v4011_v47  ;;  %v4319_v42 = vadd.f32 %v4191_v15, %v4077_v0  ;;  %v4320_v22 = vadd.f32 %v4192_v17, %v4077_v0  ;;  %v8064_v47 = vadd.f32 1e-05, %v2413_v26  ;;  %v8743_v15 = vld [vmem:[#allocation114_spill] sm:$0xff]  ;;  %v5001_v26 = vld [vmem:[#allocation2 + $0x388] sm:$0xff]  ;;  %vm3479_vm9 = vmor %vm3477_vm7, %vm3478_vm5 }
 0x4bf   :  { %v3443_v0 = vmul.f32 %v4747_v37, %v3442_v11  ;;  %v3430_v20 = vsel %vm3429_vm1, %v8032_v4, %v3426_v6  ;;  %v8744_v32 = vld [vmem:[#allocation82_spill] sm:$0xff]  ;;  %v3473_v41 = vmul.f32 %v8075_v2, %v3472_v39  ;;  %v4204_v11 = vmul.f32 %v5001_v26, %v8751_v35 }
 0x4c0   :  { %v4315_v62 = vadd.f32 %v4187_v51, %v4075_v13  ;;  %v4316_v36 = vadd.f32 %v4188_v19, %v4075_v13  ;;  %4447 = vst [vmem:[#allocation10 + $0x320] sm:$0xff] %v4319_v42  ;;  %v3566_v8 = vmul.f32 %v3430_v20, %v8743_v15  ;;  %4750 = vrsqrt.f32 %v8064_v47  ;;  %v4994_v19 = vld [vmem:[#allocation2 + $0x370] sm:$0xff]  ;;  %v4995_v42 = vld [vmem:[#allocation2 + $0x378] sm:$0xff] }
 0x4c1   :  { %4448 = vst [vmem:[#allocation10 + $0x328] sm:$0xff] %v4320_v22  ;;  %v3444_v17 = vmul.f32 0.5, %v3443_v0  ;;  %v4016_v51 = vmul.f32 %v8746_v9, %v8745_v48  ;;  %v3474_v52 = vmul.f32 0.5, %v3473_v41  ;;  %vm3457_vm8 = vweird.f32 %v8064_v47 }
 0x4c2   :  { %4443 = vst [vmem:[#allocation10 + $0x300] sm:$0xff] %v4315_v62  ;;  %v4018_v16 = vmul.f32 %v3566_v8, %v8744_v32  ;;  %v4201_v14 = vmul.f32 %v4994_v19, %v3566_v8  ;;  %v4202_v22 = vmul.f32 %v4995_v42, %v3566_v8  ;;  %v8752_v32 = vld [vmem:[#allocation125_spill] sm:$0xff] }
 0x4c3   :  { %4444 = vst [vmem:[#allocation10 + $0x308] sm:$0xff] %v4316_v36  ;;  %v3445_v4 = vsub.f32 1.5, %v3444_v17 }
 0x4c5   :  { %v3446_v58 = vmul.f32 %v4747_v37, %v3445_v4 }
 0x4c6   :  { %v8077_v53 = vpop.eup %4750 }
 0x4c7   :  { %vm3458_vm6 = vweird.f32 %v8077_v53 }
 0x4c8   :  { %vm3459_vm10 = vmor %vm3457_vm8, %vm3458_vm6 }
 0x4cb   :  { %v3896_v27 = vpop.permute.xlu2 %3895 }
 0x4cc   :  { %v4079_v40 = vsub.f32 %v3896_v27, %v4015_v57  ;;  %v3452_v57 = vmul.f32 %v8077_v53, %v8064_v47  ;;  %v8086_v27 = vadd.f32 1e-05, %v2416_v34  ;;  %v8756_v47 = vld [vmem:[#allocation84_spill] sm:$0xff] }
 0x4cd   :  { %v3890_v55 = vpop.permute.xlu1 %3889  ;;  %v5005_v34 = vld [vmem:[#allocation2 + $0x3a8] sm:$0xff] }
 0x4ce   :  { %v4078_v46 = vsub.f32 %v3890_v55, %v4014_v18  ;;  %v4323_v28 = vadd.f32 %v4195_v5, %v4079_v40  ;;  %v4324_v44 = vadd.f32 %v4196_v38, %v4079_v40  ;;  %v3450_v18 = vsel %vm3449_vm4, %v4747_v37, %v3446_v58  ;;  %v8749_v55 = vld [vmem:[#allocation47_spill] sm:$0xff] }
 0x4cf   :  { %v3453_v40 = vmul.f32 %v8077_v53, %v3452_v57  ;;  %v3568_v5 = vmul.f32 %v3450_v18, %v8748_v30  ;;  %4752 = vrsqrt.f32 %v8086_v27  ;;  %vm3487_vm12 = vweird.f32 %v8086_v27 }
 0x4d0   :  { %v4321_v3 = vadd.f32 %v4193_v25, %v4078_v46  ;;  %v4322_v29 = vadd.f32 %v4194_v56, %v4078_v46  ;;  %4451 = vst [vmem:[#allocation10 + $0x340] sm:$0xff] %v4323_v28  ;;  %v8750_v25 = vld [vmem:[#allocation75_spill] sm:$0xff]  ;;  %v4998_v46 = vld [vmem:[#allocation2 + $0x390] sm:$0xff] }
 0x4d1   :  { %4452 = vst [vmem:[#allocation10 + $0x348] sm:$0xff] %v4324_v44  ;;  %v3454_v38 = vmul.f32 0.5, %v3453_v40  ;;  %v4020_v33 = vmul.f32 %v3568_v5, %v8749_v55  ;;  %v4019_v7 = vmul.f32 %v8751_v35, %v8750_v25  ;;  %v4205_v28 = vmul.f32 %v4998_v46, %v3568_v5  ;;  %v4999_v44 = vld [vmem:[#allocation2 + $0x398] sm:$0xff] }
 0x4d2   :  { %4449 = vst [vmem:[#allocation10 + $0x330] sm:$0xff] %v4321_v3  ;;  %v4206_v3 = vmul.f32 %v4999_v44, %v3568_v5  ;;  %v8758_v35 = vld [vmem:[#allocation78_spill] sm:$0xff] }
 0x4d3   :  { %4450 = vst [vmem:[#allocation10 + $0x338] sm:$0xff] %v4322_v29  ;;  %v3475_v29 = vsub.f32 1.5, %v3474_v52  ;;  %v3455_v6 = vsub.f32 1.5, %v3454_v38 }
 0x4d5   :  { %v4753_v15 = vpop.eup %4752  ;;  %v3456_v9 = vmul.f32 %v8077_v53, %v3455_v6 }
 0x4d6   :  { %v3482_v48 = vmul.f32 %v4753_v15, %v8086_v27  ;;  %vm3488_vm11 = vweird.f32 %v4753_v15 }
 0x4d7   :  { %v3460_v19 = vsel %vm3459_vm10, %v8077_v53, %v3456_v9  ;;  %v5004_v53 = vld [vmem:[#allocation2 + $0x3a0] sm:$0xff]  ;;  %vm3489_vm13 = vmor %vm3487_vm12, %vm3488_vm11 }
 0x4db   :  { %v3914_v13 = vpop.permute.xlu2 %3913 }
 0x4dc   :  { %v4082_v43 = vsub.f32 %v3914_v13, %v4018_v16  ;;  %v2418_v16 = vmul.f32 %v8752_v32, %v5563_v54  ;;  %v3476_v13 = vmul.f32 %v8075_v2, %v3475_v29 }
 0x4dd   :  { %v3902_v62 = vpop.permute.xlu1 %3901 }
 0x4de   :  { %v4080_v36 = vsub.f32 %v3902_v62, %v4016_v51  ;;  %v4329_v23 = vadd.f32 %v4201_v14, %v4082_v43  ;;  %v4330_v12 = vadd.f32 %v4202_v22, %v4082_v43  ;;  %v8106_v51 = vadd.f32 1e-05, %v2418_v16  ;;  %v8753_v14 = vld [vmem:[#allocation36_spill] sm:$0xff]  ;;  %v8754_v22 = vld [vmem:[#allocation126_spill] sm:$0xff] }
 0x4df   :  { %v3480_v54 = vsel %vm3479_vm9, %v8075_v2, %v3476_v13  ;;  %v3483_v43 = vmul.f32 %v4753_v15, %v3482_v48  ;;  %v3569_v62 = vmul.f32 %v3460_v19, %v8754_v22  ;;  %v8761_v48 = vld [vmem:[#allocation129_spill] sm:$0xff] }
 0x4e0   :  { %v4325_v31 = vadd.f32 %v4197_v10, %v4080_v36  ;;  %v4326_v1 = vadd.f32 %v4198_v59, %v4080_v36  ;;  %4457 = vst [vmem:[#allocation10 + $0x370] sm:$0xff] %v4329_v23  ;;  %v3571_v42 = vmul.f32 %v3480_v54, %v8753_v14  ;;  %4754 = vrsqrt.f32 %v8106_v51  ;;  %v5002_v59 = vld [vmem:[#allocation2 + $0x3c0] sm:$0xff]  ;;  %v8762_v54 = vld [vmem:[#allocation89_spill] sm:$0xff] }
 0x4e1   :  { %4458 = vst [vmem:[#allocation10 + $0x378] sm:$0xff] %v4330_v12  ;;  %v3484_v4 = vmul.f32 0.5, %v3483_v43  ;;  %v4021_v10 = vmul.f32 %v3569_v62, %v8756_v47  ;;  %v5003_v12 = vld [vmem:[#allocation2 + $0x3c8] sm:$0xff]  ;;  %v4207_v63 = vmul.f32 %v5004_v53, %v3569_v62  ;;  %v4208_v39 = vmul.f32 %v5005_v34, %v3569_v62  ;;  %v5011_v62 = vld [vmem:[#allocation2 + $0x3f8] sm:$0xff] }
 0x4e2   :  { %4453 = vst [vmem:[#allocation10 + $0x350] sm:$0xff] %v4325_v31  ;;  %v4023_v36 = vmul.f32 %v3571_v42, %v8755_v21  ;;  %v4211_v23 = vmul.f32 %v5002_v59, %v3571_v42  ;;  %v4212_v2 = vmul.f32 %v5003_v12, %v3571_v42  ;;  %vm3507_vm15 = vweird.f32 %v8106_v51  ;;  %v5010_v42 = vld [vmem:[#allocation2 + $0x3f0] sm:$0xff] }
 0x4e3   :  { %4454 = vst [vmem:[#allocation10 + $0x358] sm:$0xff] %v4326_v1  ;;  %v3485_v58 = vsub.f32 1.5, %v3484_v4 }
 0x4e5   :  { %v3486_v52 = vmul.f32 %v4753_v15, %v3485_v58 }
 0x4e6   :  { %v4755_v18 = vpop.eup %4754 }
 0x4e7   :  { %v3502_v5 = vmul.f32 %v4755_v18, %v8106_v51  ;;  %v3490_v55 = vsel %vm3489_vm13, %v4753_v15, %v3486_v52  ;;  %vm3508_vm14 = vweird.f32 %v4755_v18 }
 0x4e8   :  { %vm3509_vm0 = vmor %vm3507_vm15, %vm3508_vm14 }
 0x4e9   :  { %v3503_v38 = vmul.f32 %v4755_v18, %v3502_v5 }
 0x4eb   :  { %v3926_v60 = vpop.permute.xlu2 %3925  ;;  %v3504_v25 = vmul.f32 0.5, %v3503_v38 }
 0x4ec   :  { %v4084_v56 = vsub.f32 %v3926_v60, %v4020_v33  ;;  %v8757_v33 = vld [vmem:[#allocation81_spill] sm:$0xff] }
 0x4ed   :  { %v3920_v37 = vpop.permute.xlu1 %3919  ;;  %v3572_v60 = vmul.f32 %v3490_v55, %v8757_v33 }
 0x4ee   :  { %v4083_v50 = vsub.f32 %v3920_v37, %v4019_v7  ;;  %v4333_v0 = vadd.f32 %v4205_v28, %v4084_v56  ;;  %v4334_v20 = vadd.f32 %v4206_v3, %v4084_v56  ;;  %v8759_v7 = vld [vmem:[#allocation77_spill] sm:$0xff]  ;;  %v8760_v28 = vld [vmem:[#allocation87_spill] sm:$0xff] }
 0x4ef   :  { %v4025_v56 = vmul.f32 %v8759_v7, %v8758_v35  ;;  %v4024_v44 = vmul.f32 %v3572_v60, %v8760_v28  ;;  %v5006_v37 = vld [vmem:[#allocation2 + $0x3e0] sm:$0xff] }
 0x4f0   :  { %v4331_v8 = vadd.f32 %v4203_v61, %v4083_v50  ;;  %v4332_v17 = vadd.f32 %v4204_v11, %v4083_v50  ;;  %4461 = vst [vmem:[#allocation10 + $0x390] sm:$0xff] %v4333_v0  ;;  %v4215_v29 = vmul.f32 %v5006_v37, %v8759_v7  ;;  %v5007_v50 = vld [vmem:[#allocation2 + $0x3e8] sm:$0xff]  ;;  %v5008_v61 = vld [vmem:[#allocation2 + $0x3d0] sm:$0xff]  ;;  %v5009_v11 = vld [vmem:[#allocation2 + $0x3d8] sm:$0xff] }
 0x4f1   :  { %4462 = vst [vmem:[#allocation10 + $0x398] sm:$0xff] %v4334_v20  ;;  %v4216_v49 = vmul.f32 %v5007_v50, %v8759_v7  ;;  %v4213_v26 = vmul.f32 %v5008_v61, %v3572_v60  ;;  %v4214_v6 = vmul.f32 %v5009_v11, %v3572_v60  ;;  %v3505_v20 = vsub.f32 1.5, %v3504_v25 }
 0x4f2   :  { %4459 = vst [vmem:[#allocation10 + $0x380] sm:$0xff] %v4331_v8 }
 0x4f3   :  { %4460 = vst [vmem:[#allocation10 + $0x388] sm:$0xff] %v4332_v17  ;;  %v3506_v16 = vmul.f32 %v4755_v18, %v3505_v20 }
 0x4f5   :  { %v3510_v13 = vsel %vm3509_vm0, %v4755_v18, %v3506_v16 }
 0x4f6   :  { %v3574_v9 = vmul.f32 %v3510_v13, %v8761_v48 }
 0x4f8   :  { %v4026_v43 = vmul.f32 %v3574_v9, %v8762_v54  ;;  %v4217_v22 = vmul.f32 %v5010_v42, %v3574_v9  ;;  %v4218_v4 = vmul.f32 %v5011_v62, %v3574_v9 }
 0x4fb   :  { %v3944_v45 = vpop.permute.xlu2 %3943 }
 0x4fc   :  { %v4087_v24 = vsub.f32 %v3944_v45, %v4023_v36 }
 0x4fd   :  { %v3932_v31 = vpop.permute.xlu1 %3931 }
 0x4fe   :  { %v4085_v1 = vsub.f32 %v3932_v31, %v4021_v10  ;;  %v4339_v57 = vadd.f32 %v4211_v23, %v4087_v24  ;;  %v4340_v41 = vadd.f32 %v4212_v2, %v4087_v24 }
 0x500   :  { %v4335_v40 = vadd.f32 %v4207_v63, %v4085_v1  ;;  %v4336_v30 = vadd.f32 %v4208_v39, %v4085_v1  ;;  %4467 = vst [vmem:[#allocation10 + $0x3c0] sm:$0xff] %v4339_v57 }
 0x501   :  { %4468 = vst [vmem:[#allocation10 + $0x3c8] sm:$0xff] %v4340_v41 }
 0x502   :  { %4463 = vst [vmem:[#allocation10 + $0x3a0] sm:$0xff] %v4335_v40 }
 0x503   :  { %4464 = vst [vmem:[#allocation10 + $0x3a8] sm:$0xff] %v4336_v30 }
 0x50b   :  { %v3956_v46 = vpop.permute.xlu2 %3955 }
 0x50c   :  { %v4089_v3 = vsub.f32 %v3956_v46, %v4025_v56 }
 0x50d   :  { %v3950_v27 = vpop.permute.xlu1 %3949 }
 0x50e   :  { %v4088_v0 = vsub.f32 %v3950_v27, %v4024_v44  ;;  %v4343_v15 = vadd.f32 %v4215_v29, %v4089_v3  ;;  %v4344_v8 = vadd.f32 %v4216_v49, %v4089_v3 }
 0x510   :  { %v4341_v17 = vadd.f32 %v4213_v26, %v4088_v0  ;;  %v4342_v32 = vadd.f32 %v4214_v6, %v4088_v0  ;;  %4471 = vst [vmem:[#allocation10 + $0x3e0] sm:$0xff] %v4343_v15 }
 0x511   :  { %4472 = vst [vmem:[#allocation10 + $0x3e8] sm:$0xff] %v4344_v8 }
 0x512   :  { %4469 = vst [vmem:[#allocation10 + $0x3d0] sm:$0xff] %v4341_v17 }
 0x513   :  { %4470 = vst [vmem:[#allocation10 + $0x3d8] sm:$0xff] %v4342_v32 }
 0x51d   :  { %v3962_v19 = vpop.permute.xlu1 %3961 }
 0x51e   :  { %v4090_v14 = vsub.f32 %v3962_v19, %v4026_v43 }
 0x520   :  { %v4345_v21 = vadd.f32 %v4217_v22, %v4090_v14  ;;  %v4346_v51 = vadd.f32 %v4218_v4, %v4090_v14 }
 0x522   :  { %4473 = vst [vmem:[#allocation10 + $0x3f0] sm:$0xff] %v4345_v21 }
 0x523   :  { %4474 = vst [vmem:[#allocation10 + $0x3f8] sm:$0xff] %v4346_v51 }
 0x524   :  { %4487 = dma.vmem_to_hbm [thread:$0]  %s4480_s3, 16384, %s4482_s13, [#allocation4], %s5142_s25, %s5142_s25, %s5143_s26  }
 0x525   :  { %5138 = dma.done.wait [#allocation4], 16384  }
 0x526   :  { %5139 = vsyncadd [#allocation4], 4294950912 }
 0x527   :  { %4492 = vsyncpa [#allocation3], 1 }
 0x528   :  { %4493 = vsyncpa [#allocation6], 1 }
 0x529   :  { %4494 = vsyncpa [#allocation9], 1 }
 0x52a   :  { %4495 = vsyncpa [#allocation4], 1 }

</bundles_post_ra>
